<compile_context>
chip_gen: v5e
topology: v5e:2x2
jax: 0.10.0
libtpu: 0.0.40
codegen_flags: <defaults>
</compile_context>

<pallas_src>
import functools

import jax
import jax.numpy as jnp
from jax.experimental import pallas as pl
from jax.experimental.pallas import tpu as pltpu

IN_C = 3           # RGB input channels
STEM_C = 16        # stem conv output channels
EXP_C = 128        # MBConv expanded channels (full 128-lane width)
SE_C = 8           # squeeze-excite bottleneck
OUT_C = 16         # MBConv projected channels (== STEM_C -> residual)
HEAD_C = 128       # encoder feature dim (stands in for B2's 1408)
NUM_CLASSES = 3
FC_PAD = 128       # lane-dense padded logits width (sliced to 3 in the wrapper)

_PARAM_ORDER = (
    "stem_w", "stem_sb",
    "exp_w", "exp_sb",
    "dw_w", "dw_sb",
    "se1_w", "se1_b", "se2_w", "se2_b",
    "proj_w", "proj_sb",
    "head_w", "head_sb",
    "fc_w", "fc_b",
)


def _sigmoid(y):
    # exp -> EUP, reciprocal -> EUP (approx); keeps the VALU slots free.
    return pl.reciprocal(1.0 + jnp.exp(-y), approx=True)


def _swish(y):
    return y * _sigmoid(y)


# ---------------------------------------------------------------------------
# Single fused kernel: one grid step == one image, everything stays in VMEM.
# ---------------------------------------------------------------------------
def _classifier_kernel(ho, wo,
                       cols_ref,
                       stem_w_ref, stem_sb_ref,
                       exp_w_ref, exp_sb_ref,
                       dw_w_ref, dw_sb_ref,
                       se1_w_ref, se1_b_ref, se2_w_ref, se2_b_ref,
                       proj_w_ref, proj_sb_ref,
                       head_w_ref, head_sb_ref,
                       fc_w_ref, fc_b_ref,
                       o_ref,
                       epad_ref):
    hw = ho * wo

    # ---- stem 3x3/s2 conv (im2col'd in the wrapper) + folded BN + swish ----
    h = jnp.dot(cols_ref[...], stem_w_ref[...],
                preferred_element_type=jnp.float32)                  # (hw, STEM_C)
    h = _swish(h * stem_sb_ref[0:1, :] + stem_sb_ref[1:2, :])

    # ---- MBConv expand 1x1 conv + BN + swish ----
    e = jnp.dot(h.astype(jnp.bfloat16), exp_w_ref[...],
                preferred_element_type=jnp.float32)                  # (hw, EXP_C)
    e = _swish(e * exp_sb_ref[0:1, :] + exp_sb_ref[1:2, :])

    # ---- depthwise 3x3/s1 conv via a zero-halo VMEM scratch (no HBM im2col) ----
    epad_ref[...] = jnp.zeros_like(epad_ref)
    epad_ref[1:ho + 1, 1:wo + 1, :] = e.reshape(ho, wo, EXP_C)
    acc = epad_ref[0:ho, 0:wo, :] * dw_w_ref[0:1, :]
    for t in range(1, 9):                                            # unrolled FMAs
        di, dj = t // 3, t % 3
        acc = acc + epad_ref[di:di + ho, dj:dj + wo, :] * dw_w_ref[t:t + 1, :]
    d = _swish(acc * dw_sb_ref[0:1, :] + dw_sb_ref[1:2, :])
    d = d.reshape(hw, EXP_C)

    # ---- squeeze-excite: pool -> fc -> swish -> fc -> sigmoid -> channel gate ----
    pooled = jnp.mean(d, axis=0, keepdims=True)                      # (1, EXP_C)
    s1 = _swish(jnp.dot(pooled.astype(jnp.bfloat16), se1_w_ref[...],
                        preferred_element_type=jnp.float32) + se1_b_ref[...])
    gate = _sigmoid(jnp.dot(s1.astype(jnp.bfloat16), se2_w_ref[...],
                            preferred_element_type=jnp.float32) + se2_b_ref[...])
    g = d * gate                                                     # (hw, EXP_C)

    # ---- project 1x1 conv + BN, residual add with the stem output ----
    pr = jnp.dot(g.astype(jnp.bfloat16), proj_w_ref[...],
                 preferred_element_type=jnp.float32)                 # (hw, OUT_C)
    r = h + (pr * proj_sb_ref[0:1, :] + proj_sb_ref[1:2, :])

    # ---- head 1x1 conv + BN + swish, then global average pool -> features ----
    hd = jnp.dot(r.astype(jnp.bfloat16), head_w_ref[...],
                 preferred_element_type=jnp.float32)                 # (hw, HEAD_C)
    hd = _swish(hd * head_sb_ref[0:1, :] + head_sb_ref[1:2, :])
    feats = jnp.mean(hd, axis=0, keepdims=True)                      # (1, HEAD_C)

    # ---- LinearClassifier: logits = feats @ W + b (lane-dense padded to 128) ----
    logits = jnp.dot(feats.astype(jnp.bfloat16), fc_w_ref[...],
                     preferred_element_type=jnp.float32) + fc_b_ref[...]
    o_ref[...] = logits.astype(o_ref.dtype)                          # (1, FC_PAD)


# ---------------------------------------------------------------------------
# Deterministic synthetic parameters (BN folded into per-channel scale/bias,
# scale+bias packed as one (2, C) f32 array; matmul weights stored in bf16).
# ---------------------------------------------------------------------------
def init_params(key):
    ks = jax.random.split(key, 16)

    def w(k, shape, scale=0.05, dtype=jnp.bfloat16):
        return (jax.random.normal(k, shape, jnp.float32) * scale).astype(dtype)

    def sb(k, c):
        s = 1.0 + 0.01 * jax.random.normal(k, (c,), jnp.float32)
        b = 0.05 * jax.random.normal(jax.random.fold_in(k, 1), (c,), jnp.float32)
        return jnp.stack([s, b], axis=0)          # (2, c) float32

    p = {}
    p["stem_w"] = w(ks[0], (9 * IN_C, STEM_C))
    p["stem_sb"] = sb(ks[1], STEM_C)
    p["exp_w"] = w(ks[2], (STEM_C, EXP_C))
    p["exp_sb"] = sb(ks[3], EXP_C)
    p["dw_w"] = w(ks[4], (9, EXP_C), dtype=jnp.float32)   # VPU path stays f32
    p["dw_sb"] = sb(ks[5], EXP_C)
    p["se1_w"] = w(ks[6], (EXP_C, SE_C))
    p["se1_b"] = w(ks[7], (1, SE_C), dtype=jnp.float32)
    p["se2_w"] = w(ks[8], (SE_C, EXP_C))
    p["se2_b"] = w(ks[9], (1, EXP_C), dtype=jnp.float32)
    p["proj_w"] = w(ks[10], (EXP_C, OUT_C))
    p["proj_sb"] = sb(ks[11], OUT_C)
    p["head_w"] = w(ks[12], (OUT_C, HEAD_C))
    p["head_sb"] = sb(ks[13], HEAD_C)
    # fc weights zero-padded NUM_CLASSES -> FC_PAD so the in-kernel matmul and
    # the output store are 128-lane dense (unmasked vst).
    fc_real = w(ks[14], (HEAD_C, NUM_CLASSES))
    p["fc_w"] = jnp.zeros((HEAD_C, FC_PAD), jnp.bfloat16).at[:, :NUM_CLASSES].set(fc_real)
    p["fc_b"] = jnp.zeros((1, FC_PAD), jnp.float32)
    return p


# ---------------------------------------------------------------------------
# classifier.forward: features = image_encoder(x); logits = LinearClassifier(features)
# ---------------------------------------------------------------------------
def classifier_forward(params, x_nchw):
    x = jnp.transpose(x_nchw, (0, 2, 3, 1)).astype(jnp.float32)      # NCHW -> NHWC
    n, h_in, w_in, _ = x.shape
    ho, wo = h_in // 2, w_in // 2
    hw = ho * wo

    # Stem im2col on the tiny RGB input (layout plumbing only).  TF-style SAME
    # padding for k=3,s=2 (matches EfficientNet's Conv2dStaticSamePadding).
    xp = jnp.pad(x, ((0, 0), (0, 1), (0, 1), (0, 0)))
    taps = [xp[:, i:i + 2 * ho:2, j:j + 2 * wo:2, :]
            for i in range(3) for j in range(3)]
    cols = jnp.stack(taps, axis=3).reshape(n, hw, 9 * IN_C).astype(jnp.bfloat16)

    plist = [params[name] for name in _PARAM_ORDER]

    def full_spec(a):
        nd = a.ndim
        return pl.BlockSpec(a.shape, lambda i, _nd=nd: (0,) * _nd)

    out = pl.pallas_call(
        functools.partial(_classifier_kernel, ho, wo),
        out_shape=jax.ShapeDtypeStruct((n, 1, FC_PAD), jnp.float32),
        grid=(n,),
        in_specs=[pl.BlockSpec((None, hw, 9 * IN_C), lambda i: (i, 0, 0))]
                 + [full_spec(a) for a in plist],
        out_specs=pl.BlockSpec((None, 1, FC_PAD), lambda i: (i, 0, 0)),
        scratch_shapes=[pltpu.VMEM((ho + 2, wo + 2, EXP_C), jnp.float32)],
        compiler_params=pltpu.CompilerParams(
            dimension_semantics=("parallel",)),
    )(cols, *plist)
    # Drop the lane-dense padding back to the real class count.
    return out[:, 0, :NUM_CLASSES]


if __name__ == "__main__":
    key = jax.random.PRNGKey(0)
    pkey, xkey = jax.random.split(key)
    params = init_params(pkey)
    # PyTorch-style NCHW input at a small shape.
    x = jax.random.normal(xkey, (2, 3, 32, 32), jnp.float32)
    logits = jax.jit(classifier_forward)(params, x)
    jax.block_until_ready(logits)
    assert logits.shape == (2, NUM_CLASSES)
    assert logits.dtype == jnp.float32
    assert bool(jnp.all(jnp.isfinite(logits)))
    print("KERNEL_OK")
</pallas_src>

<mosaic_0001>
module attributes {stable_mosaic.version = 11 : i64} {
  func.func @_classifier_kernel(%arg0: i32, %arg1: memref<1x256x27xbf16, #tpu.memory_space<vmem>>, %arg2: memref<27x16xbf16, #tpu.memory_space<vmem>>, %arg3: memref<2x16xf32, #tpu.memory_space<vmem>>, %arg4: memref<16x128xbf16, #tpu.memory_space<vmem>>, %arg5: memref<2x128xf32, #tpu.memory_space<vmem>>, %arg6: memref<9x128xf32, #tpu.memory_space<vmem>>, %arg7: memref<2x128xf32, #tpu.memory_space<vmem>>, %arg8: memref<128x8xbf16, #tpu.memory_space<vmem>>, %arg9: memref<1x8xf32, #tpu.memory_space<vmem>>, %arg10: memref<8x128xbf16, #tpu.memory_space<vmem>>, %arg11: memref<1x128xf32, #tpu.memory_space<vmem>>, %arg12: memref<128x16xbf16, #tpu.memory_space<vmem>>, %arg13: memref<2x16xf32, #tpu.memory_space<vmem>>, %arg14: memref<16x128xbf16, #tpu.memory_space<vmem>>, %arg15: memref<2x128xf32, #tpu.memory_space<vmem>>, %arg16: memref<128x128xbf16, #tpu.memory_space<vmem>>, %arg17: memref<1x128xf32, #tpu.memory_space<vmem>>, %arg18: memref<1x1x128xf32, #tpu.memory_space<vmem>>, %arg19: memref<18x18x128xf32, #tpu.memory_space<vmem>>) attributes {dimension_semantics = [#tpu.dimension_semantics<parallel>], iteration_bounds = array<i64: 2>, scalar_prefetch = 0 : i64, scratch_operands = 1 : i64, tpu.core_type = #tpu.core_type<tc>, window_params = [{transform_indices = @transform_0, window_bounds = array<i64: 1, 256, 27>}, {pipeline_mode = #tpu.pipeline_mode<synchronous>, transform_indices = @transform_1, window_bounds = array<i64: 27, 16>}, {pipeline_mode = #tpu.pipeline_mode<synchronous>, transform_indices = @transform_2, window_bounds = array<i64: 2, 16>}, {pipeline_mode = #tpu.pipeline_mode<synchronous>, transform_indices = @transform_3, window_bounds = array<i64: 16, 128>}, {pipeline_mode = #tpu.pipeline_mode<synchronous>, transform_indices = @transform_4, window_bounds = array<i64: 2, 128>}, {pipeline_mode = #tpu.pipeline_mode<synchronous>, transform_indices = @transform_5, window_bounds = array<i64: 9, 128>}, {pipeline_mode = #tpu.pipeline_mode<synchronous>, transform_indices = @transform_6, window_bounds = array<i64: 2, 128>}, {pipeline_mode = #tpu.pipeline_mode<synchronous>, transform_indices = @transform_7, window_bounds = array<i64: 128, 8>}, {pipeline_mode = #tpu.pipeline_mode<synchronous>, transform_indices = @transform_8, window_bounds = array<i64: 1, 8>}, {pipeline_mode = #tpu.pipeline_mode<synchronous>, transform_indices = @transform_9, window_bounds = array<i64: 8, 128>}, {pipeline_mode = #tpu.pipeline_mode<synchronous>, transform_indices = @transform_10, window_bounds = array<i64: 1, 128>}, {pipeline_mode = #tpu.pipeline_mode<synchronous>, transform_indices = @transform_11, window_bounds = array<i64: 128, 16>}, {pipeline_mode = #tpu.pipeline_mode<synchronous>, transform_indices = @transform_12, window_bounds = array<i64: 2, 16>}, {pipeline_mode = #tpu.pipeline_mode<synchronous>, transform_indices = @transform_13, window_bounds = array<i64: 16, 128>}, {pipeline_mode = #tpu.pipeline_mode<synchronous>, transform_indices = @transform_14, window_bounds = array<i64: 2, 128>}, {pipeline_mode = #tpu.pipeline_mode<synchronous>, transform_indices = @transform_15, window_bounds = array<i64: 128, 128>}, {pipeline_mode = #tpu.pipeline_mode<synchronous>, transform_indices = @transform_16, window_bounds = array<i64: 1, 128>}, {transform_indices = @transform_17, window_bounds = array<i64: 1, 1, 128>}]} {
    %c0 = arith.constant 0 : index
    %c0_0 = arith.constant 0 : index
    %c0_1 = arith.constant 0 : index
    %0 = vector.load %arg1[%c0, %c0_0, %c0_1] : memref<1x256x27xbf16, #tpu.memory_space<vmem>>, vector<1x256x27xbf16>
    %1 = vector.shape_cast %0 : vector<1x256x27xbf16> to vector<256x27xbf16>
    %c0_2 = arith.constant 0 : index
    %c0_3 = arith.constant 0 : index
    %2 = vector.load %arg2[%c0_2, %c0_3] : memref<27x16xbf16, #tpu.memory_space<vmem>>, vector<27x16xbf16>
    %cst = arith.constant dense<0.000000e+00> : vector<256x16xf32>
    %3 = tpu.matmul %1, %2, %cst {dimension_numbers = #tpu.dot_dimension_numbers<[1], [0], [0], [1], [0, 0, 1, 1], [], []>} : vector<256x27xbf16>, vector<27x16xbf16>, vector<256x16xf32> -> vector<256x16xf32>
    %c0_4 = arith.constant 0 : index
    %c0_5 = arith.constant 0 : index
    %4 = vector.load %arg3[%c0_4, %c0_5] : memref<2x16xf32, #tpu.memory_space<vmem>>, vector<1x16xf32>
    %5 = vector.broadcast %4 : vector<1x16xf32> to vector<256x16xf32>
    %6 = arith.mulf %3, %5 : vector<256x16xf32>
    %c1 = arith.constant 1 : index
    %c0_6 = arith.constant 0 : index
    %7 = vector.load %arg3[%c1, %c0_6] : memref<2x16xf32, #tpu.memory_space<vmem>>, vector<1x16xf32>
    %8 = vector.broadcast %7 : vector<1x16xf32> to vector<256x16xf32>
    %9 = arith.addf %6, %8 : vector<256x16xf32>
    %cst_7 = arith.constant 0.000000e+00 : f32
    %10 = vector.broadcast %cst_7 : f32 to vector<256x16xf32>
    %11 = arith.subf %10, %9 : vector<256x16xf32>
    %12 = math.exp %11 : vector<256x16xf32>
    %cst_8 = arith.constant 1.000000e+00 : f32
    %13 = vector.broadcast %cst_8 : f32 to vector<256x16xf32>
    %14 = arith.addf %13, %12 : vector<256x16xf32>
    %15 = tpu.reciprocal %14 {approx = true} : vector<256x16xf32> -> vector<256x16xf32>
    %16 = arith.mulf %9, %15 : vector<256x16xf32>
    %17 = arith.truncf %16 : vector<256x16xf32> to vector<256x16xbf16>
    %c0_9 = arith.constant 0 : index
    %c0_10 = arith.constant 0 : index
    %18 = vector.load %arg4[%c0_9, %c0_10] : memref<16x128xbf16, #tpu.memory_space<vmem>>, vector<16x128xbf16>
    %cst_11 = arith.constant dense<0.000000e+00> : vector<256x128xf32>
    %19 = tpu.matmul %17, %18, %cst_11 {dimension_numbers = #tpu.dot_dimension_numbers<[1], [0], [0], [1], [0, 0, 1, 1], [], []>} : vector<256x16xbf16>, vector<16x128xbf16>, vector<256x128xf32> -> vector<256x128xf32>
    %c0_12 = arith.constant 0 : index
    %c0_13 = arith.constant 0 : index
    %20 = vector.load %arg5[%c0_12, %c0_13] : memref<2x128xf32, #tpu.memory_space<vmem>>, vector<1x128xf32>
    %21 = vector.broadcast %20 : vector<1x128xf32> to vector<256x128xf32>
    %22 = arith.mulf %19, %21 : vector<256x128xf32>
    %c1_14 = arith.constant 1 : index
    %c0_15 = arith.constant 0 : index
    %23 = vector.load %arg5[%c1_14, %c0_15] : memref<2x128xf32, #tpu.memory_space<vmem>>, vector<1x128xf32>
    %24 = vector.broadcast %23 : vector<1x128xf32> to vector<256x128xf32>
    %25 = arith.addf %22, %24 : vector<256x128xf32>
    %cst_16 = arith.constant 0.000000e+00 : f32
    %26 = vector.broadcast %cst_16 : f32 to vector<256x128xf32>
    %27 = arith.subf %26, %25 : vector<256x128xf32>
    %28 = math.exp %27 : vector<256x128xf32>
    %cst_17 = arith.constant 1.000000e+00 : f32
    %29 = vector.broadcast %cst_17 : f32 to vector<256x128xf32>
    %30 = arith.addf %29, %28 : vector<256x128xf32>
    %31 = tpu.reciprocal %30 {approx = true} : vector<256x128xf32> -> vector<256x128xf32>
    %32 = arith.mulf %25, %31 : vector<256x128xf32>
    %cst_18 = arith.constant 0.000000e+00 : f32
    %33 = vector.broadcast %cst_18 : f32 to vector<18x18x128xf32>
    %c0_19 = arith.constant 0 : index
    %c0_20 = arith.constant 0 : index
    %c0_21 = arith.constant 0 : index
    %34 = vector.load %arg19[%c0_19, %c0_20, %c0_21] : memref<18x18x128xf32, #tpu.memory_space<vmem>>, vector<18x18x128xf32>
    tpu.vector_store %arg19[%c0_19, %c0_20, %c0_21], %33 {strides = array<i32>} : memref<18x18x128xf32, #tpu.memory_space<vmem>>, vector<18x18x128xf32>,
    %35 = vector.shape_cast %32 : vector<256x128xf32> to vector<16x16x128xf32>
    %c1_22 = arith.constant 1 : index
    %c1_23 = arith.constant 1 : index
    %c0_24 = arith.constant 0 : index
    %36 = vector.load %arg19[%c1_22, %c1_23, %c0_24] : memref<18x18x128xf32, #tpu.memory_space<vmem>>, vector<16x16x128xf32>
    tpu.vector_store %arg19[%c1_22, %c1_23, %c0_24], %35 {strides = array<i32>} : memref<18x18x128xf32, #tpu.memory_space<vmem>>, vector<16x16x128xf32>,
    %c0_25 = arith.constant 0 : index
    %c0_26 = arith.constant 0 : index
    %c0_27 = arith.constant 0 : index
    %37 = vector.load %arg19[%c0_25, %c0_26, %c0_27] : memref<18x18x128xf32, #tpu.memory_space<vmem>>, vector<16x16x128xf32>
    %c0_28 = arith.constant 0 : index
    %c0_29 = arith.constant 0 : index
    %38 = vector.load %arg6[%c0_28, %c0_29] : memref<9x128xf32, #tpu.memory_space<vmem>>, vector<1x128xf32>
    %39 = vector.shape_cast %38 : vector<1x128xf32> to vector<1x1x128xf32>
    %40 = vector.broadcast %39 : vector<1x1x128xf32> to vector<16x16x128xf32>
    %41 = arith.mulf %37, %40 : vector<16x16x128xf32>
    %c0_30 = arith.constant 0 : index
    %c1_31 = arith.constant 1 : index
    %c0_32 = arith.constant 0 : index
    %42 = vector.load %arg19[%c0_30, %c1_31, %c0_32] : memref<18x18x128xf32, #tpu.memory_space<vmem>>, vector<16x16x128xf32>
    %c1_33 = arith.constant 1 : index
    %c0_34 = arith.constant 0 : index
    %43 = vector.load %arg6[%c1_33, %c0_34] : memref<9x128xf32, #tpu.memory_space<vmem>>, vector<1x128xf32>
    %44 = vector.shape_cast %43 : vector<1x128xf32> to vector<1x1x128xf32>
    %45 = vector.broadcast %44 : vector<1x1x128xf32> to vector<16x16x128xf32>
    %46 = arith.mulf %42, %45 : vector<16x16x128xf32>
    %47 = arith.addf %41, %46 : vector<16x16x128xf32>
    %c0_35 = arith.constant 0 : index
    %c2 = arith.constant 2 : index
    %c0_36 = arith.constant 0 : index
    %48 = vector.load %arg19[%c0_35, %c2, %c0_36] : memref<18x18x128xf32, #tpu.memory_space<vmem>>, vector<16x16x128xf32>
    %c2_37 = arith.constant 2 : index
    %c0_38 = arith.constant 0 : index
    %49 = vector.load %arg6[%c2_37, %c0_38] : memref<9x128xf32, #tpu.memory_space<vmem>>, vector<1x128xf32>
    %50 = vector.shape_cast %49 : vector<1x128xf32> to vector<1x1x128xf32>
    %51 = vector.broadcast %50 : vector<1x1x128xf32> to vector<16x16x128xf32>
    %52 = arith.mulf %48, %51 : vector<16x16x128xf32>
    %53 = arith.addf %47, %52 : vector<16x16x128xf32>
    %c1_39 = arith.constant 1 : index
    %c0_40 = arith.constant 0 : index
    %c0_41 = arith.constant 0 : index
    %54 = vector.load %arg19[%c1_39, %c0_40, %c0_41] : memref<18x18x128xf32, #tpu.memory_space<vmem>>, vector<16x16x128xf32>
    %c3 = arith.constant 3 : index
    %c0_42 = arith.constant 0 : index
    %55 = vector.load %arg6[%c3, %c0_42] : memref<9x128xf32, #tpu.memory_space<vmem>>, vector<1x128xf32>
    %56 = vector.shape_cast %55 : vector<1x128xf32> to vector<1x1x128xf32>
    %57 = vector.broadcast %56 : vector<1x1x128xf32> to vector<16x16x128xf32>
    %58 = arith.mulf %54, %57 : vector<16x16x128xf32>
    %59 = arith.addf %53, %58 : vector<16x16x128xf32>
    %c1_43 = arith.constant 1 : index
    %c1_44 = arith.constant 1 : index
    %c0_45 = arith.constant 0 : index
    %60 = vector.load %arg19[%c1_43, %c1_44, %c0_45] : memref<18x18x128xf32, #tpu.memory_space<vmem>>, vector<16x16x128xf32>
    %c4 = arith.constant 4 : index
    %c0_46 = arith.constant 0 : index
    %61 = vector.load %arg6[%c4, %c0_46] : memref<9x128xf32, #tpu.memory_space<vmem>>, vector<1x128xf32>
    %62 = vector.shape_cast %61 : vector<1x128xf32> to vector<1x1x128xf32>
    %63 = vector.broadcast %62 : vector<1x1x128xf32> to vector<16x16x128xf32>
    %64 = arith.mulf %60, %63 : vector<16x16x128xf32>
    %65 = arith.addf %59, %64 : vector<16x16x128xf32>
    %c1_47 = arith.constant 1 : index
    %c2_48 = arith.constant 2 : index
    %c0_49 = arith.constant 0 : index
    %66 = vector.load %arg19[%c1_47, %c2_48, %c0_49] : memref<18x18x128xf32, #tpu.memory_space<vmem>>, vector<16x16x128xf32>
    %c5 = arith.constant 5 : index
    %c0_50 = arith.constant 0 : index
    %67 = vector.load %arg6[%c5, %c0_50] : memref<9x128xf32, #tpu.memory_space<vmem>>, vector<1x128xf32>
    %68 = vector.shape_cast %67 : vector<1x128xf32> to vector<1x1x128xf32>
    %69 = vector.broadcast %68 : vector<1x1x128xf32> to vector<16x16x128xf32>
    %70 = arith.mulf %66, %69 : vector<16x16x128xf32>
    %71 = arith.addf %65, %70 : vector<16x16x128xf32>
    %c2_51 = arith.constant 2 : index
    %c0_52 = arith.constant 0 : index
    %c0_53 = arith.constant 0 : index
    %72 = vector.load %arg19[%c2_51, %c0_52, %c0_53] : memref<18x18x128xf32, #tpu.memory_space<vmem>>, vector<16x16x128xf32>
    %c6 = arith.constant 6 : index
    %c0_54 = arith.constant 0 : index
    %73 = vector.load %arg6[%c6, %c0_54] : memref<9x128xf32, #tpu.memory_space<vmem>>, vector<1x128xf32>
    %74 = vector.shape_cast %73 : vector<1x128xf32> to vector<1x1x128xf32>
    %75 = vector.broadcast %74 : vector<1x1x128xf32> to vector<16x16x128xf32>
    %76 = arith.mulf %72, %75 : vector<16x16x128xf32>
    %77 = arith.addf %71, %76 : vector<16x16x128xf32>
    %c2_55 = arith.constant 2 : index
    %c1_56 = arith.constant 1 : index
    %c0_57 = arith.constant 0 : index
    %78 = vector.load %arg19[%c2_55, %c1_56, %c0_57] : memref<18x18x128xf32, #tpu.memory_space<vmem>>, vector<16x16x128xf32>
    %c7 = arith.constant 7 : index
    %c0_58 = arith.constant 0 : index
    %79 = vector.load %arg6[%c7, %c0_58] : memref<9x128xf32, #tpu.memory_space<vmem>>, vector<1x128xf32>
    %80 = vector.shape_cast %79 : vector<1x128xf32> to vector<1x1x128xf32>
    %81 = vector.broadcast %80 : vector<1x1x128xf32> to vector<16x16x128xf32>
    %82 = arith.mulf %78, %81 : vector<16x16x128xf32>
    %83 = arith.addf %77, %82 : vector<16x16x128xf32>
    %c2_59 = arith.constant 2 : index
    %c2_60 = arith.constant 2 : index
    %c0_61 = arith.constant 0 : index
    %84 = vector.load %arg19[%c2_59, %c2_60, %c0_61] : memref<18x18x128xf32, #tpu.memory_space<vmem>>, vector<16x16x128xf32>
    %c8 = arith.constant 8 : index
    %c0_62 = arith.constant 0 : index
    %85 = vector.load %arg6[%c8, %c0_62] : memref<9x128xf32, #tpu.memory_space<vmem>>, vector<1x128xf32>
    %86 = vector.shape_cast %85 : vector<1x128xf32> to vector<1x1x128xf32>
    %87 = vector.broadcast %86 : vector<1x1x128xf32> to vector<16x16x128xf32>
    %88 = arith.mulf %84, %87 : vector<16x16x128xf32>
    %89 = arith.addf %83, %88 : vector<16x16x128xf32>
    %c0_63 = arith.constant 0 : index
    %c0_64 = arith.constant 0 : index
    %90 = vector.load %arg7[%c0_63, %c0_64] : memref<2x128xf32, #tpu.memory_space<vmem>>, vector<1x128xf32>
    %91 = vector.shape_cast %90 : vector<1x128xf32> to vector<1x1x128xf32>
    %92 = vector.broadcast %91 : vector<1x1x128xf32> to vector<16x16x128xf32>
    %93 = arith.mulf %89, %92 : vector<16x16x128xf32>
    %c1_65 = arith.constant 1 : index
    %c0_66 = arith.constant 0 : index
    %94 = vector.load %arg7[%c1_65, %c0_66] : memref<2x128xf32, #tpu.memory_space<vmem>>, vector<1x128xf32>
    %95 = vector.shape_cast %94 : vector<1x128xf32> to vector<1x1x128xf32>
    %96 = vector.broadcast %95 : vector<1x1x128xf32> to vector<16x16x128xf32>
    %97 = arith.addf %93, %96 : vector<16x16x128xf32>
    %cst_67 = arith.constant 0.000000e+00 : f32
    %98 = vector.broadcast %cst_67 : f32 to vector<16x16x128xf32>
    %99 = arith.subf %98, %97 : vector<16x16x128xf32>
    %100 = math.exp %99 : vector<16x16x128xf32>
    %cst_68 = arith.constant 1.000000e+00 : f32
    %101 = vector.broadcast %cst_68 : f32 to vector<16x16x128xf32>
    %102 = arith.addf %101, %100 : vector<16x16x128xf32>
    %103 = tpu.reciprocal %102 {approx = true} : vector<16x16x128xf32> -> vector<16x16x128xf32>
    %104 = arith.mulf %97, %103 : vector<16x16x128xf32>
    %105 = vector.shape_cast %104 : vector<16x16x128xf32> to vector<256x128xf32>
    %cst_69 = arith.constant dense<0.000000e+00> : vector<128xf32>
    %106 = vector.multi_reduction <add>, %105, %cst_69 [0] : vector<256x128xf32> to vector<128xf32>
    %107 = vector.shape_cast %106 : vector<128xf32> to vector<1x128xf32>
    %cst_70 = arith.constant 2.560000e+02 : f32
    %108 = vector.broadcast %cst_70 : f32 to vector<1x128xf32>
    %109 = arith.divf %107, %108 : vector<1x128xf32>
    %110 = arith.truncf %109 : vector<1x128xf32> to vector<1x128xbf16>
    %c0_71 = arith.constant 0 : index
    %c0_72 = arith.constant 0 : index
    %111 = vector.load %arg8[%c0_71, %c0_72] : memref<128x8xbf16, #tpu.memory_space<vmem>>, vector<128x8xbf16>
    %cst_73 = arith.constant dense<0.000000e+00> : vector<1x8xf32>
    %112 = tpu.matmul %110, %111, %cst_73 {dimension_numbers = #tpu.dot_dimension_numbers<[1], [0], [0], [1], [0, 0, 1, 1], [], []>} : vector<1x128xbf16>, vector<128x8xbf16>, vector<1x8xf32> -> vector<1x8xf32>
    %c0_74 = arith.constant 0 : index
    %c0_75 = arith.constant 0 : index
    %113 = vector.load %arg9[%c0_74, %c0_75] : memref<1x8xf32, #tpu.memory_space<vmem>>, vector<1x8xf32>
    %114 = arith.addf %112, %113 : vector<1x8xf32>
    %cst_76 = arith.constant 0.000000e+00 : f32
    %115 = vector.broadcast %cst_76 : f32 to vector<1x8xf32>
    %116 = arith.subf %115, %114 : vector<1x8xf32>
    %117 = math.exp %116 : vector<1x8xf32>
    %cst_77 = arith.constant 1.000000e+00 : f32
    %118 = vector.broadcast %cst_77 : f32 to vector<1x8xf32>
    %119 = arith.addf %118, %117 : vector<1x8xf32>
    %120 = tpu.reciprocal %119 {approx = true} : vector<1x8xf32> -> vector<1x8xf32>
    %121 = arith.mulf %114, %120 : vector<1x8xf32>
    %122 = arith.truncf %121 : vector<1x8xf32> to vector<1x8xbf16>
    %c0_78 = arith.constant 0 : index
    %c0_79 = arith.constant 0 : index
    %123 = vector.load %arg10[%c0_78, %c0_79] : memref<8x128xbf16, #tpu.memory_space<vmem>>, vector<8x128xbf16>
    %cst_80 = arith.constant dense<0.000000e+00> : vector<1x128xf32>
    %124 = tpu.matmul %122, %123, %cst_80 {dimension_numbers = #tpu.dot_dimension_numbers<[1], [0], [0], [1], [0, 0, 1, 1], [], []>} : vector<1x8xbf16>, vector<8x128xbf16>, vector<1x128xf32> -> vector<1x128xf32>
    %c0_81 = arith.constant 0 : index
    %c0_82 = arith.constant 0 : index
    %125 = vector.load %arg11[%c0_81, %c0_82] : memref<1x128xf32, #tpu.memory_space<vmem>>, vector<1x128xf32>
    %126 = arith.addf %124, %125 : vector<1x128xf32>
    %cst_83 = arith.constant 0.000000e+00 : f32
    %127 = vector.broadcast %cst_83 : f32 to vector<1x128xf32>
    %128 = arith.subf %127, %126 : vector<1x128xf32>
    %129 = math.exp %128 : vector<1x128xf32>
    %cst_84 = arith.constant 1.000000e+00 : f32
    %130 = vector.broadcast %cst_84 : f32 to vector<1x128xf32>
    %131 = arith.addf %130, %129 : vector<1x128xf32>
    %132 = tpu.reciprocal %131 {approx = true} : vector<1x128xf32> -> vector<1x128xf32>
    %133 = vector.broadcast %132 : vector<1x128xf32> to vector<256x128xf32>
    %134 = arith.mulf %105, %133 : vector<256x128xf32>
    %135 = arith.truncf %134 : vector<256x128xf32> to vector<256x128xbf16>
    %c0_85 = arith.constant 0 : index
    %c0_86 = arith.constant 0 : index
    %136 = vector.load %arg12[%c0_85, %c0_86] : memref<128x16xbf16, #tpu.memory_space<vmem>>, vector<128x16xbf16>
    %cst_87 = arith.constant dense<0.000000e+00> : vector<256x16xf32>
    %137 = tpu.matmul %135, %136, %cst_87 {dimension_numbers = #tpu.dot_dimension_numbers<[1], [0], [0], [1], [0, 0, 1, 1], [], []>} : vector<256x128xbf16>, vector<128x16xbf16>, vector<256x16xf32> -> vector<256x16xf32>
    %c0_88 = arith.constant 0 : index
    %c0_89 = arith.constant 0 : index
    %138 = vector.load %arg13[%c0_88, %c0_89] : memref<2x16xf32, #tpu.memory_space<vmem>>, vector<1x16xf32>
    %139 = vector.broadcast %138 : vector<1x16xf32> to vector<256x16xf32>
    %140 = arith.mulf %137, %139 : vector<256x16xf32>
    %c1_90 = arith.constant 1 : index
    %c0_91 = arith.constant 0 : index
    %141 = vector.load %arg13[%c1_90, %c0_91] : memref<2x16xf32, #tpu.memory_space<vmem>>, vector<1x16xf32>
    %142 = vector.broadcast %141 : vector<1x16xf32> to vector<256x16xf32>
    %143 = arith.addf %140, %142 : vector<256x16xf32>
    %144 = arith.addf %16, %143 : vector<256x16xf32>
    %145 = arith.truncf %144 : vector<256x16xf32> to vector<256x16xbf16>
    %c0_92 = arith.constant 0 : index
    %c0_93 = arith.constant 0 : index
    %146 = vector.load %arg14[%c0_92, %c0_93] : memref<16x128xbf16, #tpu.memory_space<vmem>>, vector<16x128xbf16>
    %cst_94 = arith.constant dense<0.000000e+00> : vector<256x128xf32>
    %147 = tpu.matmul %145, %146, %cst_94 {dimension_numbers = #tpu.dot_dimension_numbers<[1], [0], [0], [1], [0, 0, 1, 1], [], []>} : vector<256x16xbf16>, vector<16x128xbf16>, vector<256x128xf32> -> vector<256x128xf32>
    %c0_95 = arith.constant 0 : index
    %c0_96 = arith.constant 0 : index
    %148 = vector.load %arg15[%c0_95, %c0_96] : memref<2x128xf32, #tpu.memory_space<vmem>>, vector<1x128xf32>
    %149 = vector.broadcast %148 : vector<1x128xf32> to vector<256x128xf32>
    %150 = arith.mulf %147, %149 : vector<256x128xf32>
    %c1_97 = arith.constant 1 : index
    %c0_98 = arith.constant 0 : index
    %151 = vector.load %arg15[%c1_97, %c0_98] : memref<2x128xf32, #tpu.memory_space<vmem>>, vector<1x128xf32>
    %152 = vector.broadcast %151 : vector<1x128xf32> to vector<256x128xf32>
    %153 = arith.addf %150, %152 : vector<256x128xf32>
    %cst_99 = arith.constant 0.000000e+00 : f32
    %154 = vector.broadcast %cst_99 : f32 to vector<256x128xf32>
    %155 = arith.subf %154, %153 : vector<256x128xf32>
    %156 = math.exp %155 : vector<256x128xf32>
    %cst_100 = arith.constant 1.000000e+00 : f32
    %157 = vector.broadcast %cst_100 : f32 to vector<256x128xf32>
    %158 = arith.addf %157, %156 : vector<256x128xf32>
    %159 = tpu.reciprocal %158 {approx = true} : vector<256x128xf32> -> vector<256x128xf32>
    %160 = arith.mulf %153, %159 : vector<256x128xf32>
    %cst_101 = arith.constant dense<0.000000e+00> : vector<128xf32>
    %161 = vector.multi_reduction <add>, %160, %cst_101 [0] : vector<256x128xf32> to vector<128xf32>
    %162 = vector.shape_cast %161 : vector<128xf32> to vector<1x128xf32>
    %cst_102 = arith.constant 2.560000e+02 : f32
    %163 = vector.broadcast %cst_102 : f32 to vector<1x128xf32>
    %164 = arith.divf %162, %163 : vector<1x128xf32>
    %165 = arith.truncf %164 : vector<1x128xf32> to vector<1x128xbf16>
    %c0_103 = arith.constant 0 : index
    %c0_104 = arith.constant 0 : index
    %166 = vector.load %arg16[%c0_103, %c0_104] : memref<128x128xbf16, #tpu.memory_space<vmem>>, vector<128x128xbf16>
    %cst_105 = arith.constant dense<0.000000e+00> : vector<1x128xf32>
    %167 = tpu.matmul %165, %166, %cst_105 {dimension_numbers = #tpu.dot_dimension_numbers<[1], [0], [0], [1], [0, 0, 1, 1], [], []>} : vector<1x128xbf16>, vector<128x128xbf16>, vector<1x128xf32> -> vector<1x128xf32>
    %c0_106 = arith.constant 0 : index
    %c0_107 = arith.constant 0 : index
    %168 = vector.load %arg17[%c0_106, %c0_107] : memref<1x128xf32, #tpu.memory_space<vmem>>, vector<1x128xf32>
    %169 = arith.addf %167, %168 : vector<1x128xf32>
    %c0_108 = arith.constant 0 : index
    %c0_109 = arith.constant 0 : index
    %c0_110 = arith.constant 0 : index
    %170 = vector.load %arg18[%c0_108, %c0_109, %c0_110] : memref<1x1x128xf32, #tpu.memory_space<vmem>>, vector<1x1x128xf32>
    %171 = vector.shape_cast %170 : vector<1x1x128xf32> to vector<1x128xf32>
    %172 = vector.shape_cast %169 : vector<1x128xf32> to vector<1x1x128xf32>
    tpu.vector_store %arg18[%c0_108, %c0_109, %c0_110], %172 {strides = array<i32>} : memref<1x1x128xf32, #tpu.memory_space<vmem>>, vector<1x1x128xf32>,
    return
  }
  func.func @transform_0(%arg0: i32) -> (i32, i32, i32) {
    %c0_i32 = arith.constant 0 : i32
    %c0_i32_0 = arith.constant 0 : i32
    %c0_i32_1 = arith.constant 0 : i32
    return %arg0, %c0_i32, %c0_i32_0 : i32, i32, i32
  }
  func.func @transform_1(%arg0: i32) -> (i32, i32) {
    %c0_i32 = arith.constant 0 : i32
    %c0_i32_0 = arith.constant 0 : i32
    %c0_i32_1 = arith.constant 0 : i32
    return %c0_i32, %c0_i32_0 : i32, i32
  }
  func.func @transform_2(%arg0: i32) -> (i32, i32) {
    %c0_i32 = arith.constant 0 : i32
    %c0_i32_0 = arith.constant 0 : i32
    %c0_i32_1 = arith.constant 0 : i32
    return %c0_i32, %c0_i32_0 : i32, i32
  }
  func.func @transform_3(%arg0: i32) -> (i32, i32) {
    %c0_i32 = arith.constant 0 : i32
    %c0_i32_0 = arith.constant 0 : i32
    %c0_i32_1 = arith.constant 0 : i32
    return %c0_i32, %c0_i32_0 : i32, i32
  }
  func.func @transform_4(%arg0: i32) -> (i32, i32) {
    %c0_i32 = arith.constant 0 : i32
    %c0_i32_0 = arith.constant 0 : i32
    %c0_i32_1 = arith.constant 0 : i32
    return %c0_i32, %c0_i32_0 : i32, i32
  }
  func.func @transform_5(%arg0: i32) -> (i32, i32) {
    %c0_i32 = arith.constant 0 : i32
    %c0_i32_0 = arith.constant 0 : i32
    %c0_i32_1 = arith.constant 0 : i32
    return %c0_i32, %c0_i32_0 : i32, i32
  }
  func.func @transform_6(%arg0: i32) -> (i32, i32) {
    %c0_i32 = arith.constant 0 : i32
    %c0_i32_0 = arith.constant 0 : i32
    %c0_i32_1 = arith.constant 0 : i32
    return %c0_i32, %c0_i32_0 : i32, i32
  }
  func.func @transform_7(%arg0: i32) -> (i32, i32) {
    %c0_i32 = arith.constant 0 : i32
    %c0_i32_0 = arith.constant 0 : i32
    %c0_i32_1 = arith.constant 0 : i32
    return %c0_i32, %c0_i32_0 : i32, i32
  }
  func.func @transform_8(%arg0: i32) -> (i32, i32) {
    %c0_i32 = arith.constant 0 : i32
    %c0_i32_0 = arith.constant 0 : i32
    %c0_i32_1 = arith.constant 0 : i32
    return %c0_i32, %c0_i32_0 : i32, i32
  }
  func.func @transform_9(%arg0: i32) -> (i32, i32) {
    %c0_i32 = arith.constant 0 : i32
    %c0_i32_0 = arith.constant 0 : i32
    %c0_i32_1 = arith.constant 0 : i32
    return %c0_i32, %c0_i32_0 : i32, i32
  }
  func.func @transform_10(%arg0: i32) -> (i32, i32) {
    %c0_i32 = arith.constant 0 : i32
    %c0_i32_0 = arith.constant 0 : i32
    %c0_i32_1 = arith.constant 0 : i32
    return %c0_i32, %c0_i32_0 : i32, i32
  }
  func.func @transform_11(%arg0: i32) -> (i32, i32) {
    %c0_i32 = arith.constant 0 : i32
    %c0_i32_0 = arith.constant 0 : i32
    %c0_i32_1 = arith.constant 0 : i32
    return %c0_i32, %c0_i32_0 : i32, i32
  }
  func.func @transform_12(%arg0: i32) -> (i32, i32) {
    %c0_i32 = arith.constant 0 : i32
    %c0_i32_0 = arith.constant 0 : i32
    %c0_i32_1 = arith.constant 0 : i32
    return %c0_i32, %c0_i32_0 : i32, i32
  }
  func.func @transform_13(%arg0: i32) -> (i32, i32) {
    %c0_i32 = arith.constant 0 : i32
    %c0_i32_0 = arith.constant 0 : i32
    %c0_i32_1 = arith.constant 0 : i32
    return %c0_i32, %c0_i32_0 : i32, i32
  }
  func.func @transform_14(%arg0: i32) -> (i32, i32) {
    %c0_i32 = arith.constant 0 : i32
    %c0_i32_0 = arith.constant 0 : i32
    %c0_i32_1 = arith.constant 0 : i32
    return %c0_i32, %c0_i32_0 : i32, i32
  }
  func.func @transform_15(%arg0: i32) -> (i32, i32) {
    %c0_i32 = arith.constant 0 : i32
    %c0_i32_0 = arith.constant 0 : i32
    %c0_i32_1 = arith.constant 0 : i32
    return %c0_i32, %c0_i32_0 : i32, i32
  }
  func.func @transform_16(%arg0: i32) -> (i32, i32) {
    %c0_i32 = arith.constant 0 : i32
    %c0_i32_0 = arith.constant 0 : i32
    %c0_i32_1 = arith.constant 0 : i32
    return %c0_i32, %c0_i32_0 : i32, i32
  }
  func.func @transform_17(%arg0: i32) -> (i32, i32, i32) {
    %c0_i32 = arith.constant 0 : i32
    %c0_i32_0 = arith.constant 0 : i32
    %c0_i32_1 = arith.constant 0 : i32
    return %arg0, %c0_i32, %c0_i32_0 : i32, i32, i32
  }
}

</mosaic_0001>

<bundles_post_ra>
// kernel: classifier_forward.1
= control target key start
LH: loop header
LB: loop body
LE: loop exit
PB: predicated region body
PF: predicated region fallthrough
CT: control target
= control target key end

     0   :  { %s6944_s0 = inlined_call_operand.vmem [shape: bf16[2,256,27], index: 0, kind: input, shape index: {}]   ;;  %s6945_s1 = inlined_call_operand.vmem [shape: bf16[27,16], index: 1, kind: input, shape index: {}]   ;;  %s6946_s2 = inlined_call_operand.vmem [shape: f32[2,16], index: 2, kind: input, shape index: {}]   ;;  %s6947_s3 = inlined_call_operand.vmem [shape: bf16[16,128], index: 3, kind: input, shape index: {}]   ;;  %s6948_s4 = inlined_call_operand.vmem [shape: f32[2,128], index: 4, kind: input, shape index: {}]   ;;  %s6949_s5 = inlined_call_operand.vmem [shape: f32[9,128], index: 5, kind: input, shape index: {}]   ;;  %s6950_s6 = inlined_call_operand.vmem [shape: f32[2,128], index: 6, kind: input, shape index: {}]   ;;  %s6951_s7 = inlined_call_operand.vmem [shape: bf16[128,8], index: 7, kind: input, shape index: {}]   ;;  %s6952_s8 = inlined_call_operand.vmem [shape: f32[1,8], index: 8, kind: input, shape index: {}]   ;;  %s6953_s9 = inlined_call_operand.vmem [shape: bf16[8,128], index: 9, kind: input, shape index: {}]   ;;  %s6954_s10 = inlined_call_operand.vmem [shape: f32[1,128], index: 10, kind: input, shape index: {}]   ;;  %s6955_s11 = inlined_call_operand.vmem [shape: bf16[128,16], index: 11, kind: input, shape index: {}]   ;;  %s6956_s12 = inlined_call_operand.vmem [shape: f32[2,16], index: 12, kind: input, shape index: {}]   ;;  %s6957_s13 = inlined_call_operand.vmem [shape: bf16[16,128], index: 13, kind: input, shape index: {}]   ;;  %s6958_s14 = inlined_call_operand.vmem [shape: f32[2,128], index: 14, kind: input, shape index: {}]   ;;  %s6959_s15 = inlined_call_operand.vmem [shape: bf16[128,128], index: 15, kind: input, shape index: {}]   ;;  %s6960_s16 = inlined_call_operand.vmem [shape: f32[1,128], index: 16, kind: input, shape index: {}]   ;;  %s6961_s17 = inlined_call_operand.hbm [shape: f32[2,1,128], index: 17, kind: output, shape index: {}]  }
   0x1   :  { %7015 = sst [smem:[#allocation59_spill]] %s6944_s0 }
   0x2   :  { %7016 = sst [smem:[#allocation60_spill]] %s6945_s1 }
   0x3   :  { %7017 = sst [smem:[#allocation61_spill]] %s6946_s2 }
   0x4   :  { %7018 = sst [smem:[#allocation62_spill]] %s6947_s3 }
   0x5   :  { %7019 = sst [smem:[#allocation63_spill]] %s6948_s4 }
   0x6   :  { %22 = vsyncpa [#allocation4], 0 }
   0x7   :  { %24 = vsyncpa [#allocation4 + $0x1], 0  ;;  %s4814_s24 = smov 0   ;;  %s4816_s25 = smov 0  }
   0x8   :  { %s4818_s26 = smov 0   ;;  %s4820_s27 = smov 0  }
   0x9 LB: > { %7020 = sst [smem:[#allocation6_spill]] %s4715_s26  ;;  %s4835_s28 = sadd.s32 4294967295, %s4719_s27   ;;  %s4719_s27 = sphi %s4820_s27, %s7130_s27   ;;  %s4715_s26 = sphi %s4818_s26, %s7132_s26   ;;  %s4711_s25 = sphi %s4816_s25, %s7134_s25   ;;  %s4707_s24 = sphi %s4814_s24, %s7133_s24  }
   0xa   : > { %s3767_s29 = sadd.s32 4294967294, %s4719_s27   ;;  %s4839_s0 = sadd.s32 1, %s4719_s27  }
   0xb   : > { %7021 = sst [smem:[#allocation7_spill]] %s4839_s0  ;;  %s399_s30 = sadd.s32 1, %s4715_s26 }
   0xc   : > { %s396_s18 = ssub.s32 %s4719_s27, %s4839_s0  ;;  %p409_p0 = scmp.ne.s32.totalorder %s4715_s26, %s4711_s25 }
   0xd   : > { %p397_p1 = scmp.eq.s32.totalorder %s396_s18, 0  ;;  %p410_p2 = scmp.eq.s32.totalorder %s4835_s28, 1 }
   0xe   : > { %p415_p3 = scmp.ne.s32.totalorder %s4711_s25, %s4707_s24  ;;  %p416_p4 = scmp.eq.s32.totalorder %s3767_s29, 1 }
   0xf   : > { %s4850_s19 = scalar_select %p397_p1, %s4715_s26, %s399_s30  }
  0x10   : > { %p4852_p5 = por %p410_p2, %p409_p0  ;;  %p4856_p6 = por %p416_p4, %p415_p3 }
  0x11   : > { %7022 = sst [smem:[#allocation8_spill]] %s4850_s19  ;;  %p3770_p7 = scmp.ge.s32.totalorder %s4719_s27, 1 }
  0x12   : > { %s7024_s20 = scalar_select %p4856_p6, 1, 0 }
  0x13   : > { %p490_p8 = scmp.lt.s32.totalorder %s4719_s27, 3 }
  0x14   : > { %7025 = sst [smem:[#allocation9_spill]] %s7024_s20 }
  0x15   : > { %p491_p9 = pnand %p3770_p7, %p490_p8 }
  0x17   : > { %494 = sbr.rel (%p491_p9) target bundleno = 1711 (0x6af), region = 88 }
  0x1c   : > { %s7026_s23 = sld [smem:[#allocation60_spill]]  ;;  %vm723_vm0 = vcmask 1044480   ;;  %vm724_vm1 = vcmask 1045504   ;;  %p541_p10 = scmp.lt.s32.totalorder %s4835_s28, 1  ;;  %v4721_v3 = vmov 65535   ;;  %vm674_vm2 = vcmask 220160  }
  0x1d   : > { %v725_v4 = vsel %vm723_vm0, 4294967295, %v4721_v3  ;;  %s7027_s20 = sld [smem:[#allocation59_spill]]  ;;  %vm1103_vm3 = vcmask 130048   ;;  %vm2836_vm5 = vcmask 1043456   ;;  %vm2832_vm6 = vcmask 64512   ;;  %s3708_s19 = scalar_lea.hbm %s6961_s17, %s4835_s28 }
  0x1e   : > { %v726_v5 = vsel %vm724_vm1, %v725_v4, 0  ;;  %s542_s18 = scalar_select %p541_p10, %s4835_s28, 1 }
  0x1f   : > { %s7028_s2 = sld [smem:[#allocation61_spill]]  ;;  %s3712_s22 = sshll.u32 %s3708_s19, 4  ;;  %s3713_s22 = int_to_ptr.hbm [resolvable:$true] %s3712_s22 }
  0x20   : > { %s4000_s21 = sshll.u32 %s542_s18, 7  ;;  %s7029_s3 = sld [smem:[#allocation62_spill]] }
  0x21   : > { %s7046_s4 = sld [smem:[#allocation63_spill]]  ;;  %s4677_s0 = scalar_lea.hbm %s6961_s17, 2 }
  0x22   : > { %v3843_v0 = vld [vmem:[%s7026_s23 + $0x8] sm:$0xf]  ;;  %v4018_v1 = vld [vmem:[%s7026_s23 + $0x8] sm:$0x30]  ;;  %v4017_v7 = vld [vmem:[%s7026_s23] sm:$0xff] }
  0x23   : > { %v3844_v2 = vor.u32 %v4018_v1, %v3843_v0  ;;  %s4876_s29 = scalar_lea.vmem %s7027_s20, %s4000_s21 }
  0x24   : > { %v4001_v8 = vld [vmem:[%s4876_s29] sm:$0xff]  ;;  %v4002_v9 = vld [vmem:[%s4876_s29 + $0x8] sm:$0xff]  ;;  %v4003_v10 = vld [vmem:[%s4876_s29 + $0x10] sm:$0xff] }
  0x25   : > { %v728_v6 = vand.u32 %v3844_v2, %v726_v5  ;;  %v4004_v11 = vld [vmem:[%s4876_s29 + $0x18] sm:$0xff]  ;;  %v4005_v12 = vld [vmem:[%s4876_s29 + $0x20] sm:$0xff]  ;;  %v4006_v13 = vld [vmem:[%s4876_s29 + $0x28] sm:$0xff] }
  0x26   : > { %v4007_v14 = vld [vmem:[%s4876_s29 + $0x30] sm:$0xff]  ;;  %v4008_v15 = vld [vmem:[%s4876_s29 + $0x38] sm:$0xff]  ;;  %v4897_v16 = vld [vmem:[%s7028_s2] ss:$0 sm:$0xff] }
  0x27   : > { %736 = vmatpush.bf16.msra.mxu0 %v728_v6  ;;  %v4902_v17 = vld [vmem:[%s7028_s2 + $0x1] ss:$0 sm:$0xff]  ;;  %v4010_v30 = vld [vmem:[%s4876_s29 + $0x48] sm:$0xff]  ;;  %v4011_v46 = vld [vmem:[%s4876_s29 + $0x50] sm:$0xff] }
  0x28   : > { %v4009_v18 = vld [vmem:[%s4876_s29 + $0x40] sm:$0xff]  ;;  %v4012_v2 = vld [vmem:[%s4876_s29 + $0x58] sm:$0xff] }
  0x29   : > { %v4019_v20 = vld [vmem:[%s7029_s3] sm:$0xff]  ;;  %s4671_s3 = sshra.s32 %s3713_s22, 4  ;;  %s4672_s3 = int_to_ptr.hbm [resolvable:$true] %s4671_s3 }
  0x2a   : > { %1159 = vmatpush.bf16.msra.mxu1 %v4019_v20  ;;  %p4678_p0 = scmp.lt.s32.totalorder %s4672_s3, %s6961_s17 }
  0x2b   : > { %737 = vmatpush.bf16.msra.mxu0 %v4017_v7 }
  0x2e   : > { %3845 = vmatmul.msk.bf16.vlgmr.msra.gmra.mxu0 %vm674_vm2, %v4001_v8 }
  0x3e   : > { %3846 = vmatmul.msk.bf16.gmra.mxu0 %vm674_vm2, %v4002_v9 }
  0x4e   : > { %3847 = vmatmul.msk.bf16.gmra.mxu0 %vm674_vm2, %v4003_v10 }
  0x5e   : > { %3848 = vmatmul.msk.bf16.gmra.mxu0 %vm674_vm2, %v4004_v11 }
  0x6e   : > { %3849 = vmatmul.msk.bf16.gmra.mxu0 %vm674_vm2, %v4005_v12 }
  0x7e   : > { %3850 = vmatmul.msk.bf16.gmra.mxu0 %vm674_vm2, %v4006_v13 }
  0x8e   : > { %3851 = vmatmul.msk.bf16.gmra.mxu0 %vm674_vm2, %v4007_v14 }
  0x9e   : > { %3852 = vmatmul.msk.bf16.gmra.mxu0 %vm674_vm2, %v4008_v15 }
  0xab   : > { %v739_v19 = vpop.f32.mrf.mxu0 }
  0xac   : > { %v821_v21 = vmul.f32 %v4897_v16, %v739_v19 }
  0xae   : > { %v855_v22 = vadd.f32 %v4902_v17, %v821_v21  ;;  %3853 = vmatmul.msk.bf16.gmra.mxu0 %vm674_vm2, %v4009_v18 }
  0xb0   : > { %v887_v23 = vsub.f32 0.0, %v855_v22 }
  0xb2   : > { %v919_v24 = vmul.f32 1.442695, %v887_v23 }
  0xb3   : > { %v741_v25 = vpop.f32.mrf.mxu0 }
  0xb4   : > { %v822_v26 = vmul.f32 %v4897_v16, %v741_v25  ;;  %4106 = vpow2.f32 %v919_v24  ;;  %v4013_v24 = vld [vmem:[%s4876_s29 + $0x60] sm:$0xff] }
  0xb6   : > { %v856_v27 = vadd.f32 %v4902_v17, %v822_v26 }
  0xb8   : > { %v888_v28 = vsub.f32 0.0, %v856_v27 }
  0xba   : > { %v921_v29 = vmul.f32 1.442695, %v888_v28  ;;  %v4107_v32 = vpop.eup %4106 }
  0xbb   : > { %v744_v31 = vpop.f32.mrf.mxu0  ;;  %v983_v35 = vadd.f32 1.0, %v4107_v32 }
  0xbc   : > { %4108 = vpow2.f32 %v921_v29  ;;  %v823_v33 = vmul.f32 %v4897_v16, %v744_v31 }
  0xbd   : > { %4110 = vrcp.f32 %v983_v35 }
  0xbe   : > { %v857_v34 = vadd.f32 %v4902_v17, %v823_v33  ;;  %3854 = vmatmul.msk.bf16.gmra.mxu0 %vm674_vm2, %v4010_v30 }
  0xc0   : > { %v889_v36 = vsub.f32 0.0, %v857_v34 }
  0xc2   : > { %v4109_v37 = vpop.eup %4108  ;;  %v923_v38 = vmul.f32 1.442695, %v889_v36 }
  0xc3   : > { %v984_v39 = vadd.f32 1.0, %v4109_v37  ;;  %v746_v40 = vpop.f32.mrf.mxu0  ;;  %v4111_v44 = vpop.eup %4110 }
  0xc4   : > { %v824_v41 = vmul.f32 %v4897_v16, %v746_v40  ;;  %v4920_v50 = vmul.f32 %v4111_v44, %v855_v22  ;;  %v4014_v44 = vld [vmem:[%s4876_s29 + $0x68] sm:$0xff] }
  0xc5   : > { %4112 = vrcp.f32 %v984_v39 }
  0xc6   : > { %4114 = vpow2.f32 %v923_v38  ;;  %v858_v42 = vadd.f32 %v4902_v17, %v824_v41  ;;  %7030 = vst [vmem:[#allocation10_spill] sm:$0xff] %v4920_v50 }
  0xc8   : > { %v890_v43 = vsub.f32 0.0, %v858_v42 }
  0xca   : > { %v925_v45 = vmul.f32 1.442695, %v890_v43 }
  0xcb   : > { %v4113_v47 = vpop.eup %4112  ;;  %v749_v48 = vpop.f32.mrf.mxu0 }
  0xcc   : > { %v4115_v49 = vpop.eup %4114  ;;  %v4922_v51 = vmul.f32 %v4113_v47, %v856_v27  ;;  %4116 = vpow2.f32 %v925_v45  ;;  %v825_v52 = vmul.f32 %v4897_v16, %v749_v48 }
  0xcd   : > { %v985_v55 = vadd.f32 1.0, %v4115_v49 }
  0xce   : > { %7031 = vst [vmem:[#allocation11_spill] sm:$0xff] %v4922_v51  ;;  %v859_v53 = vadd.f32 %v4902_v17, %v825_v52  ;;  %3855 = vmatmul.msk.bf16.gmra.mxu0 %vm674_vm2, %v4011_v46  ;;  %v1079_v54 = vpack.c.bf16 %v4922_v51, %v4920_v50 }
  0xcf   : > { %4118 = vrcp.f32 %v985_v55 }
  0xd0   : > { %v891_v56 = vsub.f32 0.0, %v859_v53  ;;  %3865 = vmatmul.msk.bf16.vlgmr.msra.gmra.mxu1 %vm1103_vm3, %v1079_v54 }
  0xd2   : > { %v4117_v57 = vpop.eup %4116  ;;  %v927_v58 = vmul.f32 1.442695, %v891_v56 }
  0xd3   : > { %v986_v59 = vadd.f32 1.0, %v4117_v57  ;;  %v751_v60 = vpop.f32.mrf.mxu0 }
  0xd4   : > { %v826_v61 = vmul.f32 %v4897_v16, %v751_v60 }
  0xd5   : > { %4120 = vrcp.f32 %v986_v59  ;;  %v4119_v0 = vpop.eup %4118 }
  0xd6   : > { %4122 = vpow2.f32 %v927_v58  ;;  %v860_v62 = vadd.f32 %v4902_v17, %v826_v61  ;;  %v4933_v6 = vmul.f32 %v4119_v0, %v857_v34 }
  0xd8   : > { %v892_v63 = vsub.f32 0.0, %v860_v62  ;;  %7032 = vst [vmem:[#allocation12_spill] sm:$0xff] %v4933_v6 }
  0xda   : > { %v929_v1 = vmul.f32 1.442695, %v892_v63 }
  0xdb   : > { %v4121_v3 = vpop.eup %4120  ;;  %v754_v4 = vpop.f32.mrf.mxu0 }
  0xdc   : > { %v4123_v5 = vpop.eup %4122  ;;  %v4935_v7 = vmul.f32 %v4121_v3, %v858_v42  ;;  %4124 = vpow2.f32 %v929_v1  ;;  %v827_v8 = vmul.f32 %v4897_v16, %v754_v4 }
  0xdd   : > { %v987_v11 = vadd.f32 1.0, %v4123_v5 }
  0xde   : > { %7033 = vst [vmem:[#allocation13_spill] sm:$0xff] %v4935_v7  ;;  %v861_v9 = vadd.f32 %v4902_v17, %v827_v8  ;;  %3856 = vmatmul.msk.bf16.gmra.mxu0 %vm674_vm2, %v4012_v2  ;;  %v1080_v10 = vpack.c.bf16 %v4935_v7, %v4933_v6  ;;  %v4015_v2 = vld [vmem:[%s4876_s29 + $0x70] sm:$0xff] }
  0xdf   : > { %4126 = vrcp.f32 %v987_v11 }
  0xe0   : > { %v893_v12 = vsub.f32 0.0, %v861_v9  ;;  %3866 = vmatmul.msk.bf16.gmra.mxu1 %vm1103_vm3, %v1080_v10 }
  0xe2   : > { %v4125_v13 = vpop.eup %4124  ;;  %v931_v14 = vmul.f32 1.442695, %v893_v12 }
  0xe3   : > { %v988_v15 = vadd.f32 1.0, %v4125_v13  ;;  %v756_v18 = vpop.f32.mrf.mxu0 }
  0xe4   : > { %v828_v19 = vmul.f32 %v4897_v16, %v756_v18 }
  0xe5   : > { %4128 = vrcp.f32 %v988_v15  ;;  %v4127_v22 = vpop.eup %4126 }
  0xe6   : > { %4130 = vpow2.f32 %v931_v14  ;;  %v862_v20 = vadd.f32 %v4902_v17, %v828_v19  ;;  %v4946_v28 = vmul.f32 %v4127_v22, %v859_v53 }
  0xe8   : > { %v894_v21 = vsub.f32 0.0, %v862_v20  ;;  %7034 = vst [vmem:[#allocation14_spill] sm:$0xff] %v4946_v28 }
  0xea   : > { %v933_v23 = vmul.f32 1.442695, %v894_v21 }
  0xeb   : > { %v4129_v25 = vpop.eup %4128  ;;  %v759_v26 = vpop.f32.mrf.mxu0 }
  0xec   : > { %v4131_v27 = vpop.eup %4130  ;;  %v4948_v29 = vmul.f32 %v4129_v25, %v860_v62  ;;  %4132 = vpow2.f32 %v933_v23  ;;  %v829_v30 = vmul.f32 %v4897_v16, %v759_v26  ;;  %v4016_v26 = vld [vmem:[%s4876_s29 + $0x78] sm:$0xff]  ;;  %s539_s29 = sand.u32 1, %s4711_s25  }
  0xed   : > { %v989_v33 = vadd.f32 1.0, %v4131_v27  ;;  %s540_s18 = scalar_lea.vmem [#allocation3], %s539_s29 }
  0xee   : > { %7035 = vst [vmem:[#allocation15_spill] sm:$0xff] %v4948_v29  ;;  %v863_v31 = vadd.f32 %v4902_v17, %v829_v30  ;;  %3857 = vmatmul.msk.bf16.gmra.mxu0 %vm674_vm2, %v4013_v24  ;;  %v1081_v32 = vpack.c.bf16 %v4948_v29, %v4946_v28  ;;  %s3710_s21 = sshll.u32 %s540_s18, 4  ;;  %s3711_s21 = int_to_ptr.vmem [resolvable:$true] %s3710_s21 }
  0xef   : > { %4134 = vrcp.f32 %v989_v33 }
  0xf0   : > { %v895_v34 = vsub.f32 0.0, %v863_v31  ;;  %3867 = vmatmul.msk.bf16.gmra.mxu1 %vm1103_vm3, %v1081_v32 }
  0xf2   : > { %v4133_v35 = vpop.eup %4132  ;;  %v935_v36 = vmul.f32 1.442695, %v895_v34 }
  0xf3   : > { %v990_v37 = vadd.f32 1.0, %v4133_v35  ;;  %v761_v38 = vpop.f32.mrf.mxu0 }
  0xf4   : > { %v830_v39 = vmul.f32 %v4897_v16, %v761_v38 }
  0xf5   : > { %4136 = vrcp.f32 %v990_v37  ;;  %v4135_v42 = vpop.eup %4134 }
  0xf6   : > { %4138 = vpow2.f32 %v935_v36  ;;  %v864_v40 = vadd.f32 %v4902_v17, %v830_v39  ;;  %v4959_v48 = vmul.f32 %v4135_v42, %v861_v9 }
  0xf8   : > { %v896_v41 = vsub.f32 0.0, %v864_v40  ;;  %7036 = vst [vmem:[#allocation16_spill] sm:$0xff] %v4959_v48 }
  0xfa   : > { %v937_v43 = vmul.f32 1.442695, %v896_v41 }
  0xfb   : > { %v4137_v45 = vpop.eup %4136  ;;  %v764_v46 = vpop.f32.mrf.mxu0 }
  0xfc   : > { %v4139_v47 = vpop.eup %4138  ;;  %v4961_v49 = vmul.f32 %v4137_v45, %v862_v20  ;;  %4140 = vpow2.f32 %v937_v43  ;;  %v831_v52 = vmul.f32 %v4897_v16, %v764_v46 }
  0xfd   : > { %v991_v55 = vadd.f32 1.0, %v4139_v47 }
  0xfe   : > { %7037 = vst [vmem:[#allocation17_spill] sm:$0xff] %v4961_v49  ;;  %v865_v53 = vadd.f32 %v4902_v17, %v831_v52  ;;  %3858 = vmatmul.msk.bf16.gmra.mxu0 %vm674_vm2, %v4014_v44  ;;  %v1082_v54 = vpack.c.bf16 %v4961_v49, %v4959_v48 }
  0xff   : > { %4142 = vrcp.f32 %v991_v55 }
 0x100   : > { %v897_v56 = vsub.f32 0.0, %v865_v53  ;;  %3868 = vmatmul.msk.bf16.gmra.mxu1 %vm1103_vm3, %v1082_v54 }
 0x102   : > { %v4141_v57 = vpop.eup %4140  ;;  %v939_v58 = vmul.f32 1.442695, %v897_v56 }
 0x103   : > { %v992_v59 = vadd.f32 1.0, %v4141_v57  ;;  %v766_v60 = vpop.f32.mrf.mxu0 }
 0x104   : > { %v832_v61 = vmul.f32 %v4897_v16, %v766_v60 }
 0x105   : > { %4144 = vrcp.f32 %v992_v59  ;;  %v4143_v0 = vpop.eup %4142 }
 0x106   : > { %4146 = vpow2.f32 %v939_v58  ;;  %v866_v62 = vadd.f32 %v4902_v17, %v832_v61  ;;  %v4972_v8 = vmul.f32 %v4143_v0, %v863_v31 }
 0x108   : > { %v898_v63 = vsub.f32 0.0, %v866_v62  ;;  %7038 = vst [vmem:[#allocation18_spill] sm:$0xff] %v4972_v8 }
 0x10a   : > { %v941_v1 = vmul.f32 1.442695, %v898_v63 }
 0x10b   : > { %v4145_v3 = vpop.eup %4144  ;;  %v769_v4 = vpop.f32.mrf.mxu0 }
 0x10c   : > { %v4147_v5 = vpop.eup %4146  ;;  %v4974_v9 = vmul.f32 %v4145_v3, %v864_v40  ;;  %4148 = vpow2.f32 %v941_v1  ;;  %v833_v10 = vmul.f32 %v4897_v16, %v769_v4 }
 0x10d   : > { %v993_v13 = vadd.f32 1.0, %v4147_v5 }
 0x10e   : > { %7039 = vst [vmem:[#allocation19_spill] sm:$0xff] %v4974_v9  ;;  %v867_v11 = vadd.f32 %v4902_v17, %v833_v10  ;;  %3859 = vmatmul.msk.bf16.gmra.mxu0 %vm674_vm2, %v4015_v2  ;;  %v1083_v12 = vpack.c.bf16 %v4974_v9, %v4972_v8 }
 0x10f   : > { %4150 = vrcp.f32 %v993_v13 }
 0x110   : > { %v899_v14 = vsub.f32 0.0, %v867_v11  ;;  %3869 = vmatmul.msk.bf16.gmra.mxu1 %vm1103_vm3, %v1083_v12 }
 0x112   : > { %v4149_v15 = vpop.eup %4148  ;;  %v943_v18 = vmul.f32 1.442695, %v899_v14 }
 0x113   : > { %v994_v19 = vadd.f32 1.0, %v4149_v15  ;;  %v771_v20 = vpop.f32.mrf.mxu0 }
 0x114   : > { %v834_v21 = vmul.f32 %v4897_v16, %v771_v20 }
 0x115   : > { %4152 = vrcp.f32 %v994_v19  ;;  %v4151_v24 = vpop.eup %4150 }
 0x116   : > { %4154 = vpow2.f32 %v943_v18  ;;  %v868_v22 = vadd.f32 %v4902_v17, %v834_v21  ;;  %v4985_v32 = vmul.f32 %v4151_v24, %v865_v53 }
 0x118   : > { %v900_v23 = vsub.f32 0.0, %v868_v22  ;;  %7040 = vst [vmem:[#allocation20_spill] sm:$0xff] %v4985_v32 }
 0x11a   : > { %v945_v25 = vmul.f32 1.442695, %v900_v23 }
 0x11b   : > { %v4153_v27 = vpop.eup %4152  ;;  %v774_v30 = vpop.f32.mrf.mxu0 }
 0x11c   : > { %v4155_v31 = vpop.eup %4154  ;;  %v4987_v33 = vmul.f32 %v4153_v27, %v866_v62  ;;  %4156 = vpow2.f32 %v945_v25  ;;  %v835_v34 = vmul.f32 %v4897_v16, %v774_v30  ;;  %v4722_v30 = vmov 0.0  }
 0x11d   : > { %v995_v37 = vadd.f32 1.0, %v4155_v31  ;;  %1501 = vst [vmem:[#allocation2] sm:$0xff] %v4722_v30 }
 0x11e   : > { %7041 = vst [vmem:[#allocation21_spill] sm:$0xff] %v4987_v33  ;;  %v869_v35 = vadd.f32 %v4902_v17, %v835_v34  ;;  %3860 = vmatmul.msk.bf16.gmra.mxu0 %vm674_vm2, %v4016_v26  ;;  %v1084_v36 = vpack.c.bf16 %v4987_v33, %v4985_v32 }
 0x11f   : > { %4158 = vrcp.f32 %v995_v37  ;;  %1502 = vst [vmem:[#allocation2 + $0x8] sm:$0xff] %v4722_v30 }
 0x120   : > { %v901_v38 = vsub.f32 0.0, %v869_v35  ;;  %3870 = vmatmul.msk.bf16.gmra.mxu1 %vm1103_vm3, %v1084_v36  ;;  %1504 = vst [vmem:[#allocation2 + $0x18] sm:$0xff] %v4722_v30 }
 0x121   : > { %1505 = vst [vmem:[#allocation2 + $0x20] sm:$0xff] %v4722_v30 }
 0x122   : > { %v4157_v39 = vpop.eup %4156  ;;  %v947_v40 = vmul.f32 1.442695, %v901_v38  ;;  %1503 = vst [vmem:[#allocation2 + $0x10] sm:$0x3] %v4722_v30  ;;  %v5034_v38 = vld [vmem:[%s7046_s4] ss:$0 sm:$0xff] }
 0x123   : > { %v996_v41 = vadd.f32 1.0, %v4157_v39  ;;  %v776_v42 = vpop.f32.mrf.mxu0  ;;  %1506 = vst [vmem:[#allocation2 + $0x28] sm:$0x3] %v4722_v30 }
 0x124   : > { %v836_v43 = vmul.f32 %v4897_v16, %v776_v42  ;;  %1507 = vst [vmem:[#allocation2 + $0x30] sm:$0xff] %v4722_v30 }
 0x125   : > { %4160 = vrcp.f32 %v996_v41  ;;  %v4159_v46 = vpop.eup %4158  ;;  %1508 = vst [vmem:[#allocation2 + $0x38] sm:$0xff] %v4722_v30 }
 0x126   : > { %4162 = vpow2.f32 %v947_v40  ;;  %v870_v44 = vadd.f32 %v4902_v17, %v836_v43  ;;  %v4997_v55 = vmul.f32 %v4159_v46, %v867_v11  ;;  %1509 = vst [vmem:[#allocation2 + $0x40] sm:$0x3] %v4722_v30 }
 0x127   : > { %1510 = vst [vmem:[#allocation2 + $0x48] sm:$0xff] %v4722_v30 }
 0x128   : > { %v902_v45 = vsub.f32 0.0, %v870_v44  ;;  %7042 = vst [vmem:[#allocation22_spill] sm:$0xff] %v4997_v55 }
 0x129   : > { %1511 = vst [vmem:[#allocation2 + $0x50] sm:$0xff] %v4722_v30 }
 0x12a   : > { %v949_v47 = vmul.f32 1.442695, %v902_v45  ;;  %1512 = vst [vmem:[#allocation2 + $0x58] sm:$0x3] %v4722_v30 }
 0x12b   : > { %v4161_v52 = vpop.eup %4160  ;;  %v779_v53 = vpop.f32.mrf.mxu0  ;;  %1513 = vst [vmem:[#allocation2 + $0x60] sm:$0xff] %v4722_v30 }
 0x12c   : > { %v4163_v54 = vpop.eup %4162  ;;  %v4999_v56 = vmul.f32 %v4161_v52, %v868_v22  ;;  %4164 = vpow2.f32 %v949_v47  ;;  %v837_v57 = vmul.f32 %v4897_v16, %v779_v53  ;;  %1514 = vst [vmem:[#allocation2 + $0x68] sm:$0xff] %v4722_v30 }
 0x12d   : > { %v997_v60 = vadd.f32 1.0, %v4163_v54  ;;  %1515 = vst [vmem:[#allocation2 + $0x70] sm:$0x3] %v4722_v30 }
 0x12e   : > { %7043 = vst [vmem:[#allocation23_spill] sm:$0xff] %v4999_v56  ;;  %v871_v58 = vadd.f32 %v4902_v17, %v837_v57  ;;  %v1085_v59 = vpack.c.bf16 %v4999_v56, %v4997_v55 }
 0x12f   : > { %4166 = vrcp.f32 %v997_v60  ;;  %1516 = vst [vmem:[#allocation2 + $0x78] sm:$0xff] %v4722_v30 }
 0x130   : > { %v903_v61 = vsub.f32 0.0, %v871_v58  ;;  %3871 = vmatmul.msk.bf16.gmra.mxu1 %vm1103_vm3, %v1085_v59  ;;  %1517 = vst [vmem:[#allocation2 + $0x80] sm:$0xff] %v4722_v30 }
 0x131   : > { %1518 = vst [vmem:[#allocation2 + $0x88] sm:$0x3] %v4722_v30 }
 0x132   : > { %v4165_v62 = vpop.eup %4164  ;;  %v951_v63 = vmul.f32 1.442695, %v903_v61  ;;  %1519 = vst [vmem:[#allocation2 + $0x90] sm:$0xff] %v4722_v30 }
 0x133   : > { %v998_v0 = vadd.f32 1.0, %v4165_v62  ;;  %v781_v1 = vpop.f32.mrf.mxu0  ;;  %1520 = vst [vmem:[#allocation2 + $0x98] sm:$0xff] %v4722_v30 }
 0x134   : > { %v838_v2 = vmul.f32 %v4897_v16, %v781_v1  ;;  %1521 = vst [vmem:[#allocation2 + $0xa0] sm:$0x3] %v4722_v30 }
 0x135   : > { %4168 = vrcp.f32 %v998_v0  ;;  %v4167_v5 = vpop.eup %4166  ;;  %1522 = vst [vmem:[#allocation2 + $0xa8] sm:$0xff] %v4722_v30 }
 0x136   : > { %4170 = vpow2.f32 %v951_v63  ;;  %v872_v3 = vadd.f32 %v4902_v17, %v838_v2  ;;  %v5008_v14 = vmul.f32 %v4167_v5, %v869_v35  ;;  %1523 = vst [vmem:[#allocation2 + $0xb0] sm:$0xff] %v4722_v30 }
 0x137   : > { %1524 = vst [vmem:[#allocation2 + $0xb8] sm:$0x3] %v4722_v30 }
 0x138   : > { %v904_v4 = vsub.f32 0.0, %v872_v3  ;;  %7044 = vst [vmem:[#allocation24_spill] sm:$0xff] %v5008_v14 }
 0x139   : > { %1525 = vst [vmem:[#allocation2 + $0xc0] sm:$0xff] %v4722_v30 }
 0x13a   : > { %v953_v10 = vmul.f32 1.442695, %v904_v4  ;;  %1526 = vst [vmem:[#allocation2 + $0xc8] sm:$0xff] %v4722_v30 }
 0x13b   : > { %v4169_v11 = vpop.eup %4168  ;;  %v784_v12 = vpop.f32.mrf.mxu0  ;;  %1527 = vst [vmem:[#allocation2 + $0xd0] sm:$0x3] %v4722_v30 }
 0x13c   : > { %v4171_v13 = vpop.eup %4170  ;;  %v5010_v15 = vmul.f32 %v4169_v11, %v870_v44  ;;  %4172 = vpow2.f32 %v953_v10  ;;  %v839_v18 = vmul.f32 %v4897_v16, %v784_v12  ;;  %v5046_v44 = vld [vmem:[%s7046_s4 + $0x1] ss:$0 sm:$0xff]  ;;  %1528 = vst [vmem:[#allocation2 + $0xd8] sm:$0xff] %v4722_v30 }
 0x13d   : > { %v999_v21 = vadd.f32 1.0, %v4171_v13  ;;  %1529 = vst [vmem:[#allocation2 + $0xe0] sm:$0xff] %v4722_v30 }
 0x13e   : > { %7045 = vst [vmem:[#allocation25_spill] sm:$0xff] %v5010_v15  ;;  %v5014_v19 = vadd.f32 %v4902_v17, %v839_v18  ;;  %v1086_v20 = vpack.c.bf16 %v5010_v15, %v5008_v14 }
 0x13f   : > { %4174 = vrcp.f32 %v999_v21  ;;  %1530 = vst [vmem:[#allocation2 + $0xe8] sm:$0x3] %v4722_v30 }
 0x140   : > { %v905_v22 = vsub.f32 0.0, %v5014_v19  ;;  %3872 = vmatmul.msk.bf16.gmra.mxu1 %vm1103_vm3, %v1086_v20  ;;  %1531 = vst [vmem:[#allocation2 + $0xf0] sm:$0xff] %v4722_v30 }
 0x141   : > { %1532 = vst [vmem:[#allocation2 + $0xf8] sm:$0xff] %v4722_v30 }
 0x142   : > { %v4173_v23 = vpop.eup %4172  ;;  %v955_v24 = vmul.f32 1.442695, %v905_v22  ;;  %1533 = vst [vmem:[#allocation2 + $0x100] sm:$0x3] %v4722_v30 }
 0x143   : > { %v1000_v25 = vadd.f32 1.0, %v4173_v23  ;;  %v786_v26 = vpop.f32.mrf.mxu0  ;;  %1534 = vst [vmem:[#allocation2 + $0x108] sm:$0xff] %v4722_v30 }
 0x144   : > { %4176 = vpow2.f32 %v955_v24  ;;  %v840_v27 = vmul.f32 %v4897_v16, %v786_v26  ;;  %1535 = vst [vmem:[#allocation2 + $0x110] sm:$0xff] %v4722_v30 }
 0x145   : > { %4178 = vrcp.f32 %v1000_v25  ;;  %v4175_v35 = vpop.eup %4174  ;;  %1536 = vst [vmem:[#allocation2 + $0x118] sm:$0x3] %v4722_v30 }
 0x146   : > { %v5024_v31 = vadd.f32 %v4902_v17, %v840_v27  ;;  %v5038_v41 = vmul.f32 %v4175_v35, %v871_v58  ;;  %1537 = vst [vmem:[#allocation2 + $0x120] sm:$0xff] %v4722_v30 }
 0x147   : > { %1538 = vst [vmem:[#allocation2 + $0x128] sm:$0xff] %v4722_v30 }
 0x148   : > { %v906_v34 = vsub.f32 0.0, %v5024_v31  ;;  %7047 = vst [vmem:[#allocation26_spill] sm:$0xff] %v5038_v41 }
 0x149   : > { %1539 = vst [vmem:[#allocation2 + $0x130] sm:$0x3] %v4722_v30 }
 0x14a   : > { %v4177_v36 = vpop.eup %4176  ;;  %v957_v37 = vmul.f32 1.442695, %v906_v34  ;;  %1540 = vst [vmem:[#allocation2 + $0x138] sm:$0xff] %v4722_v30 }
 0x14b   : > { %v4179_v39 = vpop.eup %4178  ;;  %v789_v40 = vpop.f32.mrf.mxu0  ;;  %v1001_v46 = vadd.f32 1.0, %v4177_v36  ;;  %1541 = vst [vmem:[#allocation2 + $0x140] sm:$0xff] %v4722_v30 }
 0x14c   : > { %v5040_v42 = vmul.f32 %v4179_v39, %v872_v3  ;;  %4180 = vpow2.f32 %v957_v37  ;;  %v841_v43 = vmul.f32 %v4897_v16, %v789_v40  ;;  %1542 = vst [vmem:[#allocation2 + $0x148] sm:$0x3] %v4722_v30 }
 0x14d   : > { %v1161_v45 = vpop.f32.mrf.mxu1  ;;  %4182 = vrcp.f32 %v1001_v46  ;;  %1543 = vst [vmem:[#allocation2 + $0x150] sm:$0xff] %v4722_v30 }
 0x14e   : > { %7048 = vst [vmem:[#allocation27_spill] sm:$0xff] %v5040_v42  ;;  %v5051_v47 = vadd.f32 %v4902_v17, %v841_v43  ;;  %v1243_v52 = vmul.f32 %v5034_v38, %v1161_v45  ;;  %v1087_v53 = vpack.c.bf16 %v5040_v42, %v5038_v41 }
 0x14f   : > { %1544 = vst [vmem:[#allocation2 + $0x158] sm:$0xff] %v4722_v30 }
 0x150   : > { %v907_v54 = vsub.f32 0.0, %v5051_v47  ;;  %v5060_v57 = vadd.f32 %v5046_v44, %v1243_v52  ;;  %3873 = vmatmul.msk.bf16.gmra.mxu1 %vm1103_vm3, %v1087_v53  ;;  %1545 = vst [vmem:[#allocation2 + $0x160] sm:$0x3] %v4722_v30 }
 0x151   : > { %1546 = vst [vmem:[#allocation2 + $0x168] sm:$0xff] %v4722_v30 }
 0x152   : > { %v4181_v58 = vpop.eup %4180  ;;  %v959_v59 = vmul.f32 1.442695, %v907_v54  ;;  %v1309_v60 = vsub.f32 0.0, %v5060_v57  ;;  %1547 = vst [vmem:[#allocation2 + $0x170] sm:$0xff] %v4722_v30 }
 0x153   : > { %v1002_v61 = vadd.f32 1.0, %v4181_v58  ;;  %v791_v62 = vpop.f32.mrf.mxu0  ;;  %v4183_v4 = vpop.eup %4182  ;;  %1548 = vst [vmem:[#allocation2 + $0x178] sm:$0x3] %v4722_v30 }
 0x154   : > { %4184 = vpow2.f32 %v959_v59  ;;  %v1341_v63 = vmul.f32 1.442695, %v1309_v60  ;;  %v842_v0 = vmul.f32 %v4897_v16, %v791_v62  ;;  %v5086_v20 = vmul.f32 %v4183_v4, %v5014_v19  ;;  %1549 = vst [vmem:[#allocation2 + $0x180] sm:$0xff] %v4722_v30 }
 0x155   : > { %4186 = vrcp.f32 %v1002_v61  ;;  %v1163_v1 = vpop.f32.mrf.mxu1  ;;  %1550 = vst [vmem:[#allocation2 + $0x188] sm:$0xff] %v4722_v30 }
 0x156   : > { %4188 = vpow2.f32 %v1341_v63  ;;  %v5073_v2 = vadd.f32 %v4902_v17, %v842_v0  ;;  %v1244_v3 = vmul.f32 %v5034_v38, %v1163_v1  ;;  %7049 = vst [vmem:[#allocation28_spill] sm:$0xff] %v5086_v20 }
 0x157   : > { %1551 = vst [vmem:[#allocation2 + $0x190] sm:$0x3] %v4722_v30 }
 0x158   : > { %v908_v5 = vsub.f32 0.0, %v5073_v2  ;;  %v5080_v10 = vadd.f32 %v5046_v44, %v1244_v3  ;;  %1552 = vst [vmem:[#allocation2 + $0x198] sm:$0xff] %v4722_v30 }
 0x159   : > { %1553 = vst [vmem:[#allocation2 + $0x1a0] sm:$0xff] %v4722_v30 }
 0x15a   : > { %v4185_v11 = vpop.eup %4184  ;;  %v961_v12 = vmul.f32 1.442695, %v908_v5  ;;  %v1310_v13 = vsub.f32 0.0, %v5080_v10  ;;  %1554 = vst [vmem:[#allocation2 + $0x1a8] sm:$0x3] %v4722_v30 }
 0x15b   : > { %v4187_v18 = vpop.eup %4186  ;;  %v794_v21 = vpop.f32.mrf.mxu0  ;;  %v1003_v35 = vadd.f32 1.0, %v4185_v11 }
 0x15c   : > { %v4189_v22 = vpop.eup %4188  ;;  %v5090_v23 = vmul.f32 %v4187_v18, %v5024_v31  ;;  %4190 = vpow2.f32 %v961_v12  ;;  %v1343_v24 = vmul.f32 1.442695, %v1310_v13  ;;  %v843_v25 = vmul.f32 %v4897_v16, %v794_v21 }
 0x15d   : > { %v1405_v26 = vadd.f32 1.0, %v4189_v22  ;;  %v1166_v27 = vpop.f32.mrf.mxu1 }
 0x15e   : > { %7050 = vst [vmem:[#allocation29_spill] sm:$0xff] %v5090_v23  ;;  %v5097_v19 = vadd.f32 %v4902_v17, %v843_v25  ;;  %v1245_v34 = vmul.f32 %v5034_v38, %v1166_v27  ;;  %v1088_v31 = vpack.c.bf16 %v5090_v23, %v5086_v20 }
 0x15f   : > { %4192 = vrcp.f32 %v1405_v26 }
 0x160   : > { %4194 = vpow2.f32 %v1343_v24  ;;  %v909_v36 = vsub.f32 0.0, %v5097_v19  ;;  %v5106_v37 = vadd.f32 %v5046_v44, %v1245_v34  ;;  %3874 = vmatmul.msk.bf16.gmra.mxu1 %vm1103_vm3, %v1088_v31  ;;  %v5151_v34 = vld [vmem:[%s6949_s5] ss:$0 sm:$0xff]  ;;  %v1654_v31 = vld [vmem:[#allocation2 + $0x1] sm:$0xff] }
 0x161   : > { %4196 = vrcp.f32 %v1003_v35 }
 0x162   : > { %v4191_v39 = vpop.eup %4190  ;;  %v963_v40 = vmul.f32 1.442695, %v909_v36  ;;  %v1311_v43 = vsub.f32 0.0, %v5106_v37 }
 0x163   : > { %v1004_v45 = vadd.f32 1.0, %v4191_v39  ;;  %v796_v46 = vpop.f32.mrf.mxu0 }
 0x164   : > { %4198 = vpow2.f32 %v963_v40  ;;  %v1345_v52 = vmul.f32 1.442695, %v1311_v43  ;;  %v844_v53 = vmul.f32 %v4897_v16, %v796_v46  ;;  %v5165_v40 = vld [vmem:[%s6949_s5 + $0x1] ss:$0 sm:$0xff] }
 0x165   : > { %v4193_v54 = vpop.eup %4192  ;;  %4200 = vrcp.f32 %v1004_v45  ;;  %v1168_v58 = vpop.f32.mrf.mxu1 }
 0x166   : > { %v4195_v59 = vpop.eup %4194  ;;  %v5117_v60 = vmul.f32 %v4193_v54, %v5060_v57  ;;  %4202 = vpow2.f32 %v1345_v52  ;;  %v5121_v61 = vadd.f32 %v4902_v17, %v844_v53  ;;  %v1246_v62 = vmul.f32 %v5034_v38, %v1168_v58  ;;  %v5174_v58 = vld [vmem:[%s6949_s5 + $0x2] ss:$0 sm:$0xff] }
 0x167   : > { %v4197_v1 = vpop.eup %4196  ;;  %v1406_v57 = vadd.f32 1.0, %v4195_v59  ;;  %v1622_v53 = vmul.f32 0.0, %v5151_v34  ;;  %v1688_v54 = vmul.f32 %v5165_v40, %v1654_v31 }
 0x168   : > { %1556 = vst [vmem:[#allocation2 + $0x19] sm:$0xff] %v5117_v60  ;;  %v910_v63 = vsub.f32 0.0, %v5121_v61  ;;  %v5128_v0 = vadd.f32 %v5046_v44, %v1246_v62  ;;  %v5139_v22 = vmul.f32 %v4197_v1, %v5051_v47  ;;  %v1752_v1 = vld [vmem:[#allocation2 + $0x2] sm:$0xff] }
 0x16a   : > { %v4199_v3 = vpop.eup %4198  ;;  %v965_v4 = vmul.f32 1.442695, %v910_v63  ;;  %v1312_v5 = vsub.f32 0.0, %v5128_v0  ;;  %7052 = vst [vmem:[#allocation31_spill] sm:$0xff] %v5139_v22 }
 0x16b   : > { %v4201_v11 = vpop.eup %4200  ;;  %v799_v12 = vpop.f32.mrf.mxu0 }
 0x16c   : > { %v4203_v13 = vpop.eup %4202  ;;  %v5136_v18 = vmul.f32 %v4201_v11, %v5073_v2  ;;  %4204 = vpow2.f32 %v965_v4  ;;  %v1347_v21 = vmul.f32 1.442695, %v1312_v5  ;;  %v845_v25 = vmul.f32 %v4897_v16, %v799_v12  ;;  %v1655_v5 = vld [vmem:[#allocation2 + $0x9] sm:$0xff] }
 0x16d   : > { %4206 = vrcp.f32 %v1406_v57  ;;  %v1407_v24 = vadd.f32 1.0, %v4203_v13  ;;  %v1171_v26 = vpop.f32.mrf.mxu1  ;;  %v1005_v2 = vadd.f32 1.0, %v4199_v3 }
 0x16e   : > { %7051 = vst [vmem:[#allocation30_spill] sm:$0xff] %v5136_v18  ;;  %4208 = vpow2.f32 %v1347_v21  ;;  %v1247_v27 = vmul.f32 %v5034_v38, %v1171_v26  ;;  %v1089_v47 = vpack.c.bf16 %v5136_v18, %v5139_v22  ;;  %v5156_v35 = vadd.f32 %v4902_v17, %v845_v25  ;;  %v5192_v26 = vld [vmem:[%s6949_s5 + $0x3] ss:$0 sm:$0xff] }
 0x16f   : > { %4210 = vrcp.f32 %v1407_v24  ;;  %v1720_v24 = vadd.f32 %v1688_v54, %v1622_v53  ;;  %v1786_v25 = vmul.f32 %v5174_v58, %v1752_v1 }
 0x170   : > { %v5159_v36 = vadd.f32 %v5046_v44, %v1247_v27  ;;  %3875 = vmatmul.msk.bf16.gmra.mxu1 %vm1103_vm3, %v1089_v47  ;;  %4212 = vrcp.f32 %v1005_v2  ;;  %v911_v3 = vsub.f32 0.0, %v5156_v35  ;;  %v1590_v47 = vld [vmem:[#allocation2 + $0x18] sm:$0xff] }
 0x172   : > { %v4205_v39 = vpop.eup %4204  ;;  %v1313_v59 = vsub.f32 0.0, %v5159_v36  ;;  %v967_v31 = vmul.f32 1.442695, %v911_v3 }
 0x173   : > { %v4207_v43 = vpop.eup %4206  ;;  %v1006_v45 = vadd.f32 1.0, %v4205_v39  ;;  %v801_v46 = vpop.f32.mrf.mxu0 }
 0x174   : > { %v4209_v52 = vpop.eup %4208  ;;  %v846_v62 = vmul.f32 %v4897_v16, %v801_v46  ;;  %v1349_v11 = vmul.f32 1.442695, %v1313_v59  ;;  %v1470_v13 = vmul.f32 %v4207_v43, %v5080_v10  ;;  %v1689_v10 = vmul.f32 %v5165_v40, %v1655_v5 }
 0x175   : > { %v4211_v63 = vpop.eup %4210  ;;  %4214 = vrcp.f32 %v1006_v45  ;;  %v1408_v57 = vadd.f32 1.0, %v4209_v52  ;;  %v1173_v4 = vpop.f32.mrf.mxu1  ;;  %v1753_v45 = vld [vmem:[#allocation2 + $0xa] sm:$0xff]  ;;  %v1818_v59 = vadd.f32 %v1786_v25, %v1720_v24  ;;  %v1690_v25 = vmul.f32 %v5165_v40, %v5117_v60 }
 0x176   : > { %v5183_v12 = vadd.f32 %v4902_v17, %v846_v62  ;;  %v1248_v21 = vmul.f32 %v5034_v38, %v1173_v4  ;;  %v5196_v27 = vmul.f32 %v4211_v63, %v5106_v37  ;;  %v4213_v2 = vpop.eup %4212  ;;  %1557 = vst [vmem:[#allocation2 + $0x21] sm:$0xff] %v1470_v13  ;;  %v1884_v62 = vmul.f32 %v5192_v26, %v1590_v47 }
 0x177   : > { %4216 = vrcp.f32 %v1408_v57  ;;  %v5208_v63 = vmul.f32 %v4213_v2, %v5097_v19  ;;  %v1721_v30 = vadd.f32 %v1689_v10, %v1622_v53  ;;  %v1787_v3 = vmul.f32 %v5174_v58, %v1753_v45  ;;  %v5219_v19 = vld [vmem:[%s6949_s5 + $0x4] ss:$0 sm:$0xff] }
 0x178   : > { %4218 = vpow2.f32 %v1349_v11  ;;  %v912_v39 = vsub.f32 0.0, %v5183_v12  ;;  %v5202_v43 = vadd.f32 %v5046_v44, %v1248_v21  ;;  %1558 = vst [vmem:[#allocation2 + $0x31] sm:$0xff] %v5196_v27  ;;  %v1624_v21 = vmul.f32 %v5151_v34, %v1590_v47  ;;  %v5231_v47 = vld [vmem:[%s6949_s5 + $0x5] ss:$0 sm:$0xff] }
 0x179   : > { %7053 = vst [vmem:[#allocation32_spill] sm:$0xff] %v5208_v63  ;;  %4220 = vpow2.f32 %v967_v31  ;;  %v1916_v2 = vadd.f32 %v1884_v62, %v1818_v59  ;;  %v1819_v10 = vadd.f32 %v1787_v3, %v1721_v30  ;;  %v5247_v59 = vld [vmem:[%s6949_s5 + $0x7] ss:$0 sm:$0xff] }
 0x17a   : > { %v969_v37 = vmul.f32 1.442695, %v912_v39  ;;  %v1314_v52 = vsub.f32 0.0, %v5202_v43  ;;  %v1722_v31 = vadd.f32 %v1690_v25, %v1624_v21  ;;  %v1982_v39 = vmul.f32 %v5219_v19, %v5117_v60 }
 0x17b   : > { %v4215_v46 = vpop.eup %4214  ;;  %v804_v54 = vpop.f32.mrf.mxu0 }
 0x17c   : > { %v5212_v1 = vmul.f32 %v4215_v46, %v5121_v61  ;;  %v1351_v4 = vmul.f32 1.442695, %v1314_v52  ;;  %4222 = vpow2.f32 %v969_v37  ;;  %v1691_v46 = vmul.f32 %v5165_v40, %v1470_v13 }
 0x17d   : > { %v4217_v57 = vpop.eup %4216  ;;  %v1176_v5 = vpop.f32.mrf.mxu1  ;;  %v1591_v45 = vld [vmem:[#allocation2 + $0x20] sm:$0xff]  ;;  %v1983_v52 = vmul.f32 %v5219_v19, %v1470_v13  ;;  %v847_v25 = vmul.f32 %v4897_v16, %v804_v54 }
 0x17e   : > { %7054 = vst [vmem:[#allocation33_spill] sm:$0xff] %v5212_v1  ;;  %v4219_v11 = vpop.eup %4218  ;;  %v5222_v24 = vmul.f32 %v4217_v57, %v5128_v0  ;;  %v1090_v61 = vpack.c.bf16 %v5212_v1, %v5208_v63  ;;  %4224 = vpow2.f32 %v1351_v4  ;;  %v5237_v0 = vld [vmem:[%s6949_s5 + $0x6] ss:$0 sm:$0xff]  ;;  %v1754_v37 = vld [vmem:[#allocation2 + $0x1a] sm:$0xff]  ;;  %v1625_v57 = vmul.f32 %v5151_v34, %v1591_v45 }
 0x17f   : > { %v1409_v53 = vadd.f32 1.0, %v4219_v11  ;;  %v4221_v62 = vpop.eup %4220  ;;  %v1788_v30 = vmul.f32 %v5174_v58, %v1754_v37  ;;  %v1885_v3 = vmul.f32 %v5192_v26, %v1591_v45  ;;  %v1592_v4 = vld [vmem:[#allocation2 + $0x30] sm:$0xff]  ;;  %v2014_v11 = vadd.f32 %v1982_v39, %v1916_v2  ;;  %v1755_v21 = vld [vmem:[#allocation2 + $0x22] sm:$0xff] }
 0x180   : > { %1559 = vst [vmem:[#allocation2 + $0x39] sm:$0xff] %v5222_v24  ;;  %3876 = vmatmul.msk.bf16.gmra.mxu1 %vm1103_vm3, %v1090_v61  ;;  %v2080_v61 = vmul.f32 %v5231_v47, %v1754_v37  ;;  %v1886_v13 = vmul.f32 %v5192_v26, %v1592_v4  ;;  %v1723_v63 = vadd.f32 %v1691_v46, %v1625_v57  ;;  %v1007_v39 = vadd.f32 1.0, %v4221_v62 }
 0x181   : > { %4226 = vrcp.f32 %v1409_v53  ;;  %v1820_v18 = vadd.f32 %v1788_v30, %v1722_v31  ;;  %v1917_v22 = vadd.f32 %v1885_v3, %v1819_v10  ;;  %v2179_v23 = vmul.f32 %v5237_v0, %v1592_v4 }
 0x182   : > { %v4223_v1 = vpop.eup %4222  ;;  %v2112_v45 = vadd.f32 %v2080_v61, %v2014_v11  ;;  %v1984_v53 = vmul.f32 %v5219_v19, %v5196_v27  ;;  %v2277_v2 = vmul.f32 %v5247_v59, %v5196_v27  ;;  %v1789_v37 = vmul.f32 %v5174_v58, %v1755_v21 }
 0x183   : > { %v806_v60 = vpop.f32.mrf.mxu0  ;;  %v2015_v41 = vadd.f32 %v1983_v52, %v1917_v22  ;;  %v1918_v16 = vadd.f32 %v1886_v13, %v1820_v18  ;;  %v1249_v31 = vmul.f32 %v5034_v38, %v1176_v5  ;;  %v2081_v10 = vmul.f32 %v5231_v47, %v1755_v21 }
 0x184   : > { %v4225_v42 = vpop.eup %4224  ;;  %v2211_v46 = vadd.f32 %v2179_v23, %v2112_v45  ;;  %v1008_v57 = vadd.f32 1.0, %v4223_v1  ;;  %v5264_v30 = vadd.f32 %v4902_v17, %v847_v25  ;;  %v1821_v11 = vadd.f32 %v1789_v37, %v1723_v63 }
 0x185   : > { %v1178_v20 = vpop.f32.mrf.mxu1  ;;  %v2016_v61 = vadd.f32 %v1984_v53, %v1918_v16  ;;  %v1410_v62 = vadd.f32 1.0, %v4225_v42  ;;  %v1985_v18 = vmul.f32 %v5219_v19, %v5222_v24  ;;  %4228 = vrcp.f32 %v1007_v39  ;;  %v5293_v39 = vld [vmem:[%s7028_s2] ss:$0 sm:$0xff] }
 0x186   : > { %v5267_v14 = vadd.f32 %v2277_v2, %v2211_v46  ;;  %v2113_v22 = vadd.f32 %v2081_v10, %v2015_v41  ;;  %v5273_v1 = vadd.f32 %v5046_v44, %v1249_v31  ;;  %v2278_v17 = vmul.f32 %v5247_v59, %v5222_v24 }
 0x187   : > { %v1593_v54 = vld [vmem:[#allocation2 + $0x38] sm:$0xff]  ;;  %v4227_v3 = vpop.eup %4226  ;;  %4230 = vrcp.f32 %v1008_v57  ;;  %v913_v41 = vsub.f32 0.0, %v5264_v30  ;;  %v1626_v13 = vmul.f32 %v5151_v34, %v1592_v4  ;;  %v1692_v2 = vmul.f32 %v5165_v40, %v5196_v27 }
 0x188   : > { %v1887_v15 = vmul.f32 %v5192_v26, %v1593_v54  ;;  %v2180_v23 = vmul.f32 %v5237_v0, %v1593_v54  ;;  %v5278_v63 = vmul.f32 %v4227_v3, %v5159_v36  ;;  %4232 = vrcp.f32 %v1410_v62  ;;  %v1756_v25 = vld [vmem:[#allocation2 + $0x32] sm:$0xff]  ;;  %v5301_v3 = vld [vmem:[%s7028_s2 + $0x1] ss:$0 sm:$0xff]  ;;  %s3700_s2 = scalar_lea.sflag [#allocation4], %s539_s29 }
 0x189   : > { %v1315_v53 = vsub.f32 0.0, %v5273_v1  ;;  %v848_v37 = vmul.f32 %v5293_v39, %v806_v60  ;;  %v1790_v4 = vmul.f32 %v5174_v58, %v1756_v25  ;;  %v971_v16 = vmul.f32 1.442695, %v913_v41  ;;  %v5309_v60 = vld [vmem:[%s6949_s5 + $0x8] ss:$0 sm:$0xff] }
 0x18a   : > { %v1919_v5 = vadd.f32 %v1887_v15, %v1821_v11  ;;  %v2212_v21 = vadd.f32 %v2180_v23, %v2113_v22  ;;  %1560 = vst [vmem:[#allocation2 + $0x49] sm:$0xff] %v5278_v63  ;;  %v1724_v46 = vadd.f32 %v1692_v2, %v1626_v13  ;;  %v2082_v57 = vmul.f32 %v5231_v47, %v1756_v25 }
 0x18b   : > { %v809_v42 = vpop.f32.mrf.mxu0  ;;  %v4229_v36 = vpop.eup %4228  ;;  %v1353_v31 = vmul.f32 1.442695, %v1315_v53  ;;  %v5304_v27 = vadd.f32 %v5301_v3, %v848_v37  ;;  %v1250_v22 = vmul.f32 %v5034_v38, %v1178_v20  ;;  %v2375_v2 = vmul.f32 %v5309_v60, %v1756_v25 }
 0x18c   : > { %v5280_v52 = vadd.f32 %v1985_v18, %v1919_v5  ;;  %v5285_v45 = vadd.f32 %v2278_v17, %v2212_v21  ;;  %v5312_v62 = vmul.f32 %v4229_v36, %v5156_v35  ;;  %v1627_v5 = vmul.f32 %v5151_v34, %v1593_v54 }
 0x18d   : > { %v1181_v15 = vpop.f32.mrf.mxu1  ;;  %v4231_v10 = vpop.eup %4230  ;;  %4234 = vpow2.f32 %v1353_v31  ;;  %v1822_v17 = vadd.f32 %v1790_v4, %v1724_v46  ;;  %v914_v35 = vsub.f32 0.0, %v5304_v27  ;;  %v1693_v36 = vmul.f32 %v5165_v40, %v5222_v24  ;;  %v1757_v4 = vld [vmem:[#allocation2 + $0x3a] sm:$0xff] }
 0x18e   : > { %v4233_v11 = vpop.eup %4232  ;;  %7055 = vst [vmem:[#allocation34_spill] sm:$0xff] %v5312_v62  ;;  %v5315_v18 = vmul.f32 %v4231_v10, %v5183_v12  ;;  %4236 = vpow2.f32 %v971_v16  ;;  %v2114_v12 = vadd.f32 %v2082_v57, %v2016_v61  ;;  %v1986_v37 = vmul.f32 %v5219_v19, %v5278_v63 }
 0x18f   : > { %v5320_v23 = vmul.f32 %v4233_v11, %v5202_v43  ;;  %v849_v43 = vmul.f32 %v5293_v39, %v809_v42  ;;  %v5339_v61 = vadd.f32 %v5046_v44, %v1250_v22  ;;  %v2279_v42 = vmul.f32 %v5247_v59, %v5278_v63 }
 0x190   : > { %7056 = vst [vmem:[#allocation35_spill] sm:$0xff] %v5315_v18  ;;  %v1091_v41 = vpack.c.bf16 %v5315_v18, %v5312_v62  ;;  %v1251_v10 = vmul.f32 %v5034_v38, %v1181_v15  ;;  %v1725_v24 = vadd.f32 %v1693_v36, %v1627_v5  ;;  %v973_v57 = vmul.f32 1.442695, %v914_v35  ;;  %v5358_v5 = vld [vmem:[%s6950_s6] ss:$0 sm:$0xff] }
 0x191   : > { %v5322_v21 = vld [vmem:[#allocation2 + $0x48] sm:$0xff]  ;;  %1561 = vst [vmem:[#allocation2 + $0x51] sm:$0xff] %v5320_v23  ;;  %v5349_v62 = vadd.f32 %v5301_v3, %v849_v43  ;;  %v2407_v15 = vadd.f32 %v2375_v2, %v5267_v14 }
 0x192   : > { %v1888_v53 = vmul.f32 %v5192_v26, %v5322_v21  ;;  %v2181_v20 = vmul.f32 %v5237_v0, %v5322_v21  ;;  %3877 = vmatmul.msk.bf16.gmra.mxu1 %vm1103_vm3, %v1091_v41  ;;  %v5361_v35 = vadd.f32 %v5046_v44, %v1251_v10  ;;  %v1628_v32 = vmul.f32 %v5151_v34, %v5322_v21 }
 0x193   : > { %v811_v54 = vpop.f32.mrf.mxu0  ;;  %v4235_v46 = vpop.eup %4234 }
 0x194   : > { %v1920_v16 = vadd.f32 %v1888_v53, %v1822_v17  ;;  %v2213_v31 = vadd.f32 %v2181_v20, %v2114_v12  ;;  %v850_v25 = vmul.f32 %v5293_v39, %v811_v54  ;;  %v1411_v22 = vadd.f32 1.0, %v4235_v46  ;;  %v4237_v41 = vpop.eup %4236 }
 0x195   : > { %v1183_v13 = vpop.f32.mrf.mxu1  ;;  %v1791_v17 = vmul.f32 %v5174_v58, %v1757_v4  ;;  %v1316_v12 = vsub.f32 0.0, %v5339_v61  ;;  %v2376_v53 = vmul.f32 %v5309_v60, %v1757_v4  ;;  %v2083_v20 = vmul.f32 %v5231_v47, %v1757_v4 }
 0x196   : > { %v5346_v11 = vadd.f32 %v1986_v37, %v1920_v16  ;;  %v2311_v18 = vadd.f32 %v2279_v42, %v2213_v31  ;;  %4238 = vrcp.f32 %v1411_v22  ;;  %v5367_v54 = vadd.f32 %v5301_v3, %v850_v25 }
 0x197   : > { %4240 = vpow2.f32 %v973_v57  ;;  %v1823_v37 = vadd.f32 %v1791_v17, %v1725_v24  ;;  %v2408_v14 = vadd.f32 %v2376_v53, %v5285_v45  ;;  %v1009_v2 = vadd.f32 1.0, %v4237_v41 }
 0x198   : > { %v5364_v43 = vld [vmem:[#allocation2 + $0x50] sm:$0xff]  ;;  %v915_v16 = vsub.f32 0.0, %v5349_v62  ;;  %v2115_v31 = vadd.f32 %v2083_v20, %v5280_v52  ;;  %v1355_v10 = vmul.f32 1.442695, %v1316_v12  ;;  %v2441_v46 = vmul.f32 %v5358_v5, %v2407_v15  ;;  %v5387_v12 = vld [vmem:[%s6950_s6 + $0x1] ss:$0 sm:$0xff] }
 0x199   : > { %v1889_v42 = vmul.f32 %v5192_v26, %v5364_v43  ;;  %v2182_v4 = vmul.f32 %v5237_v0, %v5364_v43  ;;  %v1987_v57 = vmul.f32 %v5219_v19, %v5320_v23  ;;  %v1317_v24 = vsub.f32 0.0, %v5361_v35  ;;  %v1758_v25 = vld [vmem:[#allocation2 + $0x4a] sm:$0xff] }
 0x19a   : > { %v2280_v52 = vmul.f32 %v5247_v59, %v5320_v23  ;;  %v916_v17 = vsub.f32 0.0, %v5367_v54  ;;  %v2442_v20 = vmul.f32 %v5358_v5, %v2408_v14  ;;  %4242 = vrcp.f32 %v1009_v2 }
 0x19b   : > { %v814_v45 = vpop.f32.mrf.mxu0  ;;  %v1921_v22 = vadd.f32 %v1889_v42, %v1823_v37  ;;  %v2214_v41 = vadd.f32 %v2182_v4, %v2115_v31  ;;  %v975_v15 = vmul.f32 1.442695, %v915_v16  ;;  %v1252_v56 = vmul.f32 %v5034_v38, %v1183_v13 }
 0x19c   : > { %v4239_v53 = vpop.eup %4238  ;;  %4244 = vpow2.f32 %v1355_v10  ;;  %v2377_v4 = vmul.f32 %v5309_v60, %v1758_v25  ;;  %v1357_v33 = vmul.f32 1.442695, %v1317_v24  ;;  %v977_v2 = vmul.f32 1.442695, %v916_v17  ;;  %v5410_v10 = vld [vmem:[#allocation2 + $0x52] sm:$0xff] }
 0x19d   : > { %v1186_v36 = vpop.f32.mrf.mxu1  ;;  %v4241_v55 = vpop.eup %4240  ;;  %v5390_v37 = vadd.f32 %v1987_v57, %v1921_v22  ;;  %v2312_v31 = vadd.f32 %v2280_v52, %v2214_v41  ;;  %v5393_v42 = vmul.f32 %v4239_v53, %v5273_v1  ;;  %v5400_v13 = vadd.f32 %v5387_v12, %v2441_v46 }
 0x19e   : > { %v1010_v14 = vadd.f32 1.0, %v4241_v55  ;;  %v5403_v57 = vadd.f32 %v5387_v12, %v2442_v20  ;;  %v5406_v1 = vadd.f32 %v5046_v44, %v1252_v56  ;;  %v1694_v55 = vmul.f32 %v5165_v40, %v5278_v63 }
 0x19f   : > { %1562 = vst [vmem:[#allocation2 + $0x61] sm:$0xff] %v5393_v42  ;;  %v1792_v21 = vmul.f32 %v5174_v58, %v1758_v25  ;;  %v2084_v24 = vmul.f32 %v5231_v47, %v1758_v25  ;;  %v2409_v46 = vadd.f32 %v2377_v4, %v2311_v18  ;;  %v851_v56 = vmul.f32 %v5293_v39, %v814_v45 }
 0x1a0   : > { %4246 = vrcp.f32 %v1010_v14  ;;  %v4243_v22 = vpop.eup %4242  ;;  %v1726_v52 = vadd.f32 %v1694_v55, %v1628_v32  ;;  %v1318_v17 = vsub.f32 0.0, %v5406_v1  ;;  %v2507_v53 = vsub.f32 0.0, %v5400_v13 }
 0x1a1   : > { %4248 = vpow2.f32 %v975_v15  ;;  %v2508_v63 = vsub.f32 0.0, %v5403_v57  ;;  %v2378_v20 = vmul.f32 %v5309_v60, %v5410_v10  ;;  %v2116_v18 = vadd.f32 %v2084_v24, %v5346_v11 }
 0x1a2   : > { %4250 = vpow2.f32 %v1357_v33  ;;  %v4245_v41 = vpop.eup %4244  ;;  %v1824_v15 = vadd.f32 %v1792_v21, %v1726_v52  ;;  %v5422_v33 = vmul.f32 %v4243_v22, %v5264_v30  ;;  %v1253_v32 = vmul.f32 %v5034_v38, %v1186_v36 }
 0x1a3   : > { %4252 = vpow2.f32 %v977_v2  ;;  %v1412_v14 = vadd.f32 1.0, %v4245_v41  ;;  %v816_v25 = vpop.f32.mrf.mxu0  ;;  %v2410_v2 = vadd.f32 %v2378_v20, %v2312_v31  ;;  %v2443_v45 = vmul.f32 %v5358_v5, %v2409_v46 }
 0x1a4   : > { %7057 = vst [vmem:[#allocation36_spill] sm:$0xff] %v5422_v33  ;;  %v1988_v9 = vmul.f32 %v5219_v19, %v5393_v42  ;;  %v2281_v41 = vmul.f32 %v5247_v59, %v5393_v42  ;;  %v1359_v30 = vmul.f32 1.442695, %v1318_v17  ;;  %v5435_v24 = vadd.f32 %v5301_v3, %v851_v56 }
 0x1a5   : > { %v1188_v16 = vpop.f32.mrf.mxu1  ;;  %v852_v36 = vmul.f32 %v5293_v39, %v816_v25  ;;  %4254 = vrcp.f32 %v1412_v14  ;;  %v5444_v17 = vadd.f32 %v5046_v44, %v1253_v32  ;;  %v2539_v32 = vmul.f32 1.442695, %v2507_v53 }
 0x1a6   : > { %v4247_v4 = vpop.eup %4246  ;;  %v5426_v55 = vld [vmem:[#allocation2 + $0x60] sm:$0xff]  ;;  %v1254_v56 = vmul.f32 %v5034_v38, %v1188_v16 }
 0x1a7   : > { %v4249_v21 = vpop.eup %4248  ;;  %v1890_v11 = vmul.f32 %v5192_v26, %v5426_v55  ;;  %v2183_v22 = vmul.f32 %v5237_v0, %v5426_v55  ;;  %v5441_v46 = vmul.f32 %v4247_v4, %v5304_v27  ;;  %v5450_v27 = vadd.f32 %v5387_v12, %v2443_v45 }
 0x1a8   : > { %v4251_v31 = vpop.eup %4250  ;;  %v1011_v52 = vadd.f32 1.0, %v4249_v21  ;;  %v5459_v16 = vadd.f32 %v5301_v3, %v852_v36  ;;  %v2444_v45 = vmul.f32 %v5358_v5, %v2410_v2  ;;  %v1629_v21 = vmul.f32 %v5151_v34, %v5364_v43 }
 0x1a9   : > { %7058 = vst [vmem:[#allocation37_spill] sm:$0xff] %v5441_v46  ;;  %v4253_v8 = vpop.eup %4252  ;;  %v1922_v49 = vadd.f32 %v1890_v11, %v1824_v15  ;;  %v1413_v48 = vadd.f32 1.0, %v4251_v31  ;;  %v2215_v29 = vadd.f32 %v2183_v22, %v2116_v18  ;;  %v1092_v39 = vpack.c.bf16 %v5441_v46, %v5422_v33 }
 0x1aa   : > { %4256 = vrcp.f32 %v1011_v52  ;;  %v1012_v25 = vadd.f32 1.0, %v4253_v8  ;;  %v917_v15 = vsub.f32 0.0, %v5435_v24  ;;  %v1319_v8 = vsub.f32 0.0, %v5444_v17 }
 0x1ab   : > { %v5452_v14 = vadd.f32 %v1988_v9, %v1922_v49  ;;  %4258 = vrcp.f32 %v1413_v48  ;;  %v5455_v4 = vadd.f32 %v2281_v41, %v2215_v29  ;;  %3878 = vmatmul.msk.bf16.gmra.mxu1 %vm1103_vm3, %v1092_v39  ;;  %v5464_v49 = vadd.f32 %v5046_v44, %v1254_v56  ;;  %v4255_v48 = vpop.eup %4254 }
 0x1ac   : > { %4260 = vrcp.f32 %v1012_v25  ;;  %v2541_v9 = vmul.f32 1.442695, %v2508_v63  ;;  %v2509_v41 = vsub.f32 0.0, %v5450_v27  ;;  %v5472_v3 = vmul.f32 %v4255_v48, %v5339_v61 }
 0x1ad   : > { %v1191_v20 = vpop.f32.mrf.mxu1  ;;  %4262 = vpow2.f32 %v1359_v30  ;;  %v918_v11 = vsub.f32 0.0, %v5459_v16  ;;  %v1320_v63 = vsub.f32 0.0, %v5464_v49  ;;  %v1695_v61 = vmul.f32 %v5165_v40, %v5320_v23 }
 0x1ae   : > { %v1255_v18 = vmul.f32 %v5034_v38, %v1191_v20  ;;  %v979_v38 = vmul.f32 1.442695, %v917_v15  ;;  %4264 = vpow2.f32 %v2539_v32  ;;  %1563 = vst [vmem:[#allocation2 + $0x69] sm:$0xff] %v5472_v3  ;;  %v5488_v52 = vadd.f32 %v5387_v12, %v2444_v45 }
 0x1af   : > { %4266 = vpow2.f32 %v2541_v9  ;;  %v2543_v20 = vmul.f32 1.442695, %v2509_v41  ;;  %v1727_v56 = vadd.f32 %v1695_v61, %v1629_v21  ;;  %v981_v25 = vmul.f32 1.442695, %v918_v11 }
 0x1b0   : > { %v5467_v29 = vadd.f32 %v5046_v44, %v1255_v18  ;;  %v4257_v53 = vpop.eup %4256  ;;  %v1361_v44 = vmul.f32 1.442695, %v1319_v8  ;;  %4268 = vpow2.f32 %v979_v38  ;;  %v1363_v15 = vmul.f32 1.442695, %v1320_v63 }
 0x1b1   : > { %v4259_v30 = vpop.eup %4258  ;;  %v1793_v18 = vmul.f32 %v5174_v58, %v5410_v10  ;;  %v5499_v32 = vmul.f32 %v4257_v53, %v5349_v62  ;;  %v2510_v9 = vsub.f32 0.0, %v5488_v52 }
 0x1b2   : > { %v4261_v2 = vpop.eup %4260  ;;  %v5482_v36 = vmul.f32 %v4259_v30, %v5361_v35  ;;  %v1321_v31 = vsub.f32 0.0, %v5467_v29  ;;  %v1630_v35 = vmul.f32 %v5151_v34, %v5426_v55  ;;  %4270 = vpow2.f32 %v1361_v44 }
 0x1b3   : > { %v4263_v22 = vpop.eup %4262  ;;  %v5492_v39 = vmul.f32 %v4261_v2, %v5367_v54  ;;  %7060 = vst [vmem:[#allocation39_spill] sm:$0xff] %v5499_v32  ;;  %v2085_v54 = vmul.f32 %v5231_v47, %v5410_v10  ;;  %v1696_v55 = vmul.f32 %v5165_v40, %v5393_v42  ;;  %v1825_v41 = vadd.f32 %v1793_v18, %v1727_v56 }
 0x1b4   : > { %1564 = vst [vmem:[#allocation2 + $0x79] sm:$0xff] %v5482_v36  ;;  %v1414_v23 = vadd.f32 1.0, %v4263_v22  ;;  %v1365_v8 = vmul.f32 1.442695, %v1321_v31  ;;  %v5501_v48 = vpop.eup %4264  ;;  %v2545_v31 = vmul.f32 1.442695, %v2510_v9  ;;  %v1989_v22 = vmul.f32 %v5219_v19, %v5472_v3 }
 0x1b5   : > { %v5485_v43 = vpop.f32.mrf.mxu1  ;;  %7059 = vst [vmem:[#allocation38_spill] sm:$0xff] %v5492_v39  ;;  %v5508_v45 = vpop.eup %4266  ;;  %v1597_v38 = vld [vmem:[#allocation2 + $0x68] sm:$0xff]  ;;  %v1093_v62 = vpack.c.bf16 %v5492_v39, %v5499_v32  ;;  %v2117_v11 = vadd.f32 %v2085_v54, %v5390_v37  ;;  %v1728_v30 = vadd.f32 %v1696_v55, %v1630_v35  ;;  %v2282_v37 = vmul.f32 %v5247_v59, %v5472_v3 }
 0x1b6   : > { %4272 = vrcp.f32 %v1414_v23  ;;  %v1760_v21 = vld [vmem:[#allocation2 + $0x62] sm:$0xff]  ;;  %v4269_v53 = vpop.eup %4268  ;;  %v1761_v44 = vld [vmem:[#allocation2 + $0x6a] sm:$0xff]  ;;  %v1891_v63 = vmul.f32 %v5192_v26, %v1597_v38  ;;  %v2184_v2 = vmul.f32 %v5237_v0, %v1597_v38 }
 0x1b7   : > { %4274 = vpow2.f32 %v2543_v20  ;;  %v1794_v10 = vmul.f32 %v5174_v58, %v1760_v21  ;;  %v2086_v42 = vmul.f32 %v5231_v47, %v1760_v21  ;;  %v2379_v20 = vmul.f32 %v5309_v60, %v1760_v21 }
 0x1b8   : > { %4276 = vpow2.f32 %v981_v25  ;;  %v4271_v61 = vpop.eup %4270  ;;  %v1923_v35 = vadd.f32 %v1891_v63, %v1825_v41  ;;  %v1013_v18 = vadd.f32 1.0, %v4269_v53  ;;  %v2380_v55 = vmul.f32 %v5309_v60, %v1761_v44 }
 0x1b9   : > { %4278 = vpow2.f32 %v1363_v15  ;;  %v1826_v25 = vadd.f32 %v1794_v10, %v1728_v30  ;;  %v2216_v15 = vadd.f32 %v2184_v2, %v2117_v11  ;;  %v2118_v9 = vadd.f32 %v2086_v42, %v5452_v14 }
 0x1ba   : > { %4280 = vpow2.f32 %v1365_v8  ;;  %v2411_v39 = vadd.f32 %v2379_v20, %v5455_v4  ;;  %v2021_v46 = vadd.f32 %v1989_v22, %v1923_v35  ;;  %v1990_v10 = vmul.f32 %v5219_v19, %v5482_v36 }
 0x1bb   : > { %v5522_v56 = vld [vmem:[#allocation2 + $0x78] sm:$0xff]  ;;  %3879 = vmatmul.msk.bf16.gmra.mxu1 %vm1103_vm3, %v1093_v62  ;;  %v2314_v30 = vadd.f32 %v2282_v37, %v2216_v15  ;;  %v1415_v4 = vadd.f32 1.0, %v4271_v61  ;;  %4282 = vpow2.f32 %v2545_v31  ;;  %v2283_v22 = vmul.f32 %v5247_v59, %v5482_v36 }
 0x1bc   : > { %v4273_v23 = vpop.eup %4272  ;;  %v1892_v21 = vmul.f32 %v5192_v26, %v5522_v56  ;;  %v2185_v41 = vmul.f32 %v5237_v0, %v5522_v56  ;;  %v2445_v11 = vmul.f32 %v5358_v5, %v2411_v39  ;;  %4284 = vrcp.f32 %v1013_v18 }
 0x1bd   : > { %v5525_v8 = vpop.f32.mrf.mxu1  ;;  %v4275_v54 = vpop.eup %4274  ;;  %v5535_v62 = vmul.f32 %v4273_v23, %v5406_v1  ;;  %v2412_v42 = vadd.f32 %v2380_v55, %v2314_v30  ;;  %v1631_v1 = vmul.f32 %v5151_v34, %v1597_v38  ;;  %v1697_v61 = vmul.f32 %v5165_v40, %v5472_v3  ;;  %v5559_v3 = vld [vmem:[%s7046_s4] ss:$0 sm:$0xff] }
 0x1be   : > { %v4277_v32 = vpop.eup %4276  ;;  %v1924_v14 = vadd.f32 %v1892_v21, %v1826_v25  ;;  %v2217_v2 = vadd.f32 %v2185_v41, %v2118_v9  ;;  %v5545_v37 = vadd.f32 %v5387_v12, %v2445_v11  ;;  %4286 = vrcp.f32 %v1415_v4 }
 0x1bf   : > { %v4279_v53 = vpop.eup %4278  ;;  %1565 = vst [vmem:[#allocation2 + $0x81] sm:$0xff] %v5535_v62  ;;  %v2446_v31 = vmul.f32 %v5358_v5, %v2412_v42  ;;  %v1014_v23 = vadd.f32 1.0, %v4277_v32  ;;  %v2603_v38 = vadd.f32 1.0, %v5501_v48  ;;  %v1729_v9 = vadd.f32 %v1697_v61, %v1631_v1 }
 0x1c0   : > { %v4281_v63 = vpop.eup %4280  ;;  %v5547_v39 = vadd.f32 %v1990_v10, %v1924_v14  ;;  %v5552_v20 = vadd.f32 %v2283_v22, %v2217_v2  ;;  %v2511_v25 = vsub.f32 0.0, %v5545_v37  ;;  %v1416_v35 = vadd.f32 1.0, %v4279_v53 }
 0x1c1   : > { %v1417_v15 = vadd.f32 1.0, %v4281_v63  ;;  %4288 = vrcp.f32 %v1014_v23  ;;  %v4283_v55 = vpop.eup %4282  ;;  %v1256_v32 = vmul.f32 %v5559_v3, %v5485_v43  ;;  %v1795_v30 = vmul.f32 %v5174_v58, %v1761_v44 }
 0x1c2   : > { %4290 = vrcp.f32 %v1416_v35  ;;  %v4285_v21 = vpop.eup %4284  ;;  %v2087_v48 = vmul.f32 %v5231_v47, %v1761_v44  ;;  %v5568_v41 = vadd.f32 %v5387_v12, %v2446_v31  ;;  %v2547_v53 = vmul.f32 1.442695, %v2511_v25 }
 0x1c3   : > { %4292 = vrcp.f32 %v1417_v15  ;;  %v2604_v14 = vadd.f32 1.0, %v5508_v45  ;;  %v2605_v10 = vadd.f32 1.0, %v4275_v54  ;;  %v1827_v63 = vadd.f32 %v1795_v30, %v1729_v9  ;;  %v5583_v45 = vld [vmem:[%s7046_s4 + $0x1] ss:$0 sm:$0xff]  ;;  %v4027_v15 = vld [vmem:[%s6951_s7 + $0x38] sm:$0xff] }
 0x1c4   : > { %4294 = vrcp.f32 %v2603_v38  ;;  %v4287_v4 = vpop.eup %4286  ;;  %v2119_v42 = vadd.f32 %v2087_v48, %v2021_v46  ;;  %v1991_v44 = vmul.f32 %v5219_v19, %v5535_v62  ;;  %v2284_v61 = vmul.f32 %v5247_v59, %v5535_v62  ;;  %2810 = vmatpush.bf16.msrb.mxu0 %v4027_v15 }
 0x1c5   : > { %v5563_v18 = vpop.f32.mrf.mxu1  ;;  %v5578_v31 = vmul.f32 %v4285_v21, %v5435_v24  ;;  %v5586_v46 = vadd.f32 %v5583_v45, %v1256_v32  ;;  %v2512_v23 = vsub.f32 0.0, %v5568_v41  ;;  %4296 = vpow2.f32 %v2547_v53 }
 0x1c6   : > { %v1599_v11 = vld [vmem:[#allocation2 + $0x80] sm:$0xff]  ;;  %v1479_v21 = vmul.f32 %v4287_v4, %v5444_v17  ;;  %4298 = vrcp.f32 %v2604_v14  ;;  %v1699_v4 = vmul.f32 %v5165_v40, %v5535_v62 }
 0x1c7   : > { %v1762_v43 = vld [vmem:[#allocation2 + $0x7a] sm:$0xff]  ;;  %v1893_v2 = vmul.f32 %v5192_v26, %v1599_v11  ;;  %v2186_v22 = vmul.f32 %v5237_v0, %v1599_v11  ;;  %v4289_v1 = vpop.eup %4288  ;;  %7061 = vst [vmem:[#allocation40_spill] sm:$0xff] %v5578_v31  ;;  %v1633_v38 = vmul.f32 %v5151_v34, %v1599_v11  ;;  %v2606_v11 = vadd.f32 1.0, %v4283_v55  ;;  %v1763_v14 = vld [vmem:[#allocation2 + $0x82] sm:$0xff] }
 0x1c8   : > { %v4291_v54 = vpop.eup %4290  ;;  %v2381_v9 = vmul.f32 %v5309_v60, %v1762_v43  ;;  %v5596_v32 = vmul.f32 %v4289_v1, %v5459_v16  ;;  %1566 = vst [vmem:[#allocation2 + $0x91] sm:$0xff] %v1479_v21  ;;  %v1632_v16 = vmul.f32 %v5151_v34, %v5522_v56  ;;  %4300 = vrcp.f32 %v2605_v10 }
 0x1c9   : > { %v1925_v25 = vadd.f32 %v1893_v2, %v1827_v63  ;;  %v2218_v35 = vadd.f32 %v2186_v22, %v2119_v42  ;;  %v4293_v24 = vpop.eup %4292  ;;  %v5599_v53 = vmul.f32 %v4291_v54, %v5464_v49  ;;  %v1322_v2 = vsub.f32 0.0, %v5586_v46 }
 0x1ca   : > { %7062 = vst [vmem:[#allocation41_spill] sm:$0xff] %v5596_v32  ;;  %v5602_v63 = vmul.f32 %v4293_v24, %v5467_v29  ;;  %v5604_v42 = vpop.eup %4294  ;;  %v1094_v49 = vpack.c.bf16 %v5596_v32, %v5578_v31  ;;  %v1257_v29 = vmul.f32 %v5559_v3, %v5525_v8  ;;  %v2549_v55 = vmul.f32 1.442695, %v2512_v23 }
 0x1cb   : > { %v2023_v30 = vadd.f32 %v1991_v44, %v1925_v25  ;;  %v2316_v48 = vadd.f32 %v2284_v61, %v2218_v35  ;;  %1567 = vst [vmem:[#allocation2 + $0x99] sm:$0xff] %v5599_v53  ;;  %v2413_v22 = vadd.f32 %v2381_v9, %v5552_v20  ;;  %v4297_v1 = vpop.eup %4296  ;;  %v1698_v56 = vmul.f32 %v5165_v40, %v5482_v36 }
 0x1cc   : > { %1568 = vst [vmem:[#allocation2 + $0xa9] sm:$0xff] %v5602_v63  ;;  %v1731_v62 = vadd.f32 %v1699_v4, %v1633_v38  ;;  %v1796_v44 = vmul.f32 %v5174_v58, %v1762_v43  ;;  %v2088_v61 = vmul.f32 %v5231_v47, %v1762_v43  ;;  %3880 = vmatmul.msk.bf16.gmra.mxu1 %vm1103_vm3, %v1094_v49  ;;  %4302 = vrcp.f32 %v2606_v11  ;;  %v5631_v25 = vpop.eup %4298 }
 0x1cd   : > { %v5607_v17 = vpop.f32.mrf.mxu1  ;;  %v1367_v8 = vmul.f32 1.442695, %v1322_v2  ;;  %v1730_v10 = vadd.f32 %v1698_v56, %v1632_v16  ;;  %v1797_v54 = vmul.f32 %v5174_v58, %v1763_v14  ;;  %v5627_v20 = vadd.f32 %v5583_v45, %v1257_v29 }
 0x1ce   : > { %v1258_v23 = vmul.f32 %v5559_v3, %v5563_v18  ;;  %4304 = vpow2.f32 %v2549_v55  ;;  %v2089_v36 = vmul.f32 %v5231_v47, %v1763_v14  ;;  %v2382_v43 = vmul.f32 %v5309_v60, %v1763_v14  ;;  %v5637_v2 = vpop.eup %4300 }
 0x1cf   : > { %v2447_v35 = vmul.f32 %v5358_v5, %v2413_v22  ;;  %v2607_v15 = vadd.f32 1.0, %v4297_v1  ;;  %v1828_v24 = vadd.f32 %v1796_v44, %v1730_v10  ;;  %v1829_v38 = vadd.f32 %v1797_v54, %v1731_v62  ;;  %v1600_v11 = vld [vmem:[#allocation2 + $0x90] sm:$0xff] }
 0x1d0   : > { %v2120_v9 = vadd.f32 %v2088_v61, %v5547_v39  ;;  %v2414_v16 = vadd.f32 %v2382_v43, %v2316_v48  ;;  %v1894_v18 = vmul.f32 %v5192_v26, %v1600_v11  ;;  %v2187_v4 = vmul.f32 %v5237_v0, %v1600_v11 }
 0x1d1   : > { %4306 = vpow2.f32 %v1367_v8  ;;  %v2121_v14 = vadd.f32 %v2089_v36, %v2023_v30  ;;  %v1634_v22 = vmul.f32 %v5151_v34, %v1600_v11  ;;  %v1700_v1 = vmul.f32 %v5165_v40, %v1479_v21 }
 0x1d2   : > { %v5641_v49 = vld [vmem:[#allocation2 + $0x98] sm:$0xff]  ;;  %v1992_v39 = vmul.f32 %v5219_v19, %v1479_v21  ;;  %v5646_v56 = vpop.eup %4302  ;;  %v5649_v48 = vadd.f32 %v5387_v12, %v2447_v35  ;;  %v1926_v62 = vadd.f32 %v1894_v18, %v1828_v24  ;;  %v2219_v44 = vadd.f32 %v2187_v4, %v2120_v9 }
 0x1d3   : > { %v1764_v29 = vld [vmem:[#allocation2 + $0x92] sm:$0xff]  ;;  %v2285_v61 = vmul.f32 %v5247_v59, %v1479_v21  ;;  %v1895_v30 = vmul.f32 %v5192_v26, %v5641_v49  ;;  %v1993_v34 = vmul.f32 %v5219_v19, %v5599_v53  ;;  %v5658_v40 = vadd.f32 %v5583_v45, %v1258_v23  ;;  %v5664_v9 = vld [vmem:[#allocation2 + $0xa8] sm:$0xff] }
 0x1d4   : > { %v1798_v10 = vmul.f32 %v5174_v58, %v1764_v29  ;;  %v4305_v8 = vpop.eup %4304  ;;  %v2448_v54 = vmul.f32 %v5358_v5, %v2414_v16  ;;  %v2024_v36 = vadd.f32 %v1992_v39, %v1926_v62  ;;  %v2286_v35 = vmul.f32 %v5247_v59, %v5599_v53 }
 0x1d5   : > { %v1203_v55 = vpop.f32.mrf.mxu1  ;;  %v2317_v43 = vadd.f32 %v2285_v61, %v2219_v44  ;;  %v1732_v21 = vadd.f32 %v1700_v1, %v1634_v22  ;;  %v1927_v24 = vadd.f32 %v1895_v30, %v1829_v38  ;;  %v2090_v58 = vmul.f32 %v5231_v47, %v1764_v29 }
 0x1d6   : > { %v1323_v11 = vsub.f32 0.0, %v5627_v20  ;;  %v2513_v23 = vsub.f32 0.0, %v5649_v48  ;;  %v2188_v4 = vmul.f32 %v5237_v0, %v5641_v49  ;;  %v2383_v16 = vmul.f32 %v5309_v60, %v1764_v29 }
 0x1d7   : > { %v4307_v18 = vpop.eup %4306  ;;  %v1994_v39 = vmul.f32 %v5219_v19, %v5602_v63  ;;  %v1830_v62 = vadd.f32 %v1798_v10, %v1732_v21  ;;  %v5673_v22 = vadd.f32 %v1993_v34, %v1927_v24  ;;  %v1324_v47 = vsub.f32 0.0, %v5658_v40 }
 0x1d8   : > { %v1259_v38 = vmul.f32 %v5559_v3, %v5607_v17  ;;  %v2220_v1 = vadd.f32 %v2188_v4, %v2121_v14  ;;  %v2415_v44 = vadd.f32 %v2383_v16, %v2317_v43  ;;  %v1896_v61 = vmul.f32 %v5192_v26, %v5664_v9 }
 0x1d9   : > { %v2189_v30 = vmul.f32 %v5237_v0, %v5664_v9  ;;  %v2122_v32 = vadd.f32 %v2090_v58, %v2024_v36  ;;  %v2287_v19 = vmul.f32 %v5247_v59, %v5602_v63  ;;  %v1418_v10 = vadd.f32 1.0, %v4307_v18  ;;  %v5691_v36 = vld [vmem:[#allocation2 + $0x9a] sm:$0xff] }
 0x1da   : > { %v1369_v34 = vmul.f32 1.442695, %v1323_v11  ;;  %v5685_v21 = vadd.f32 %v5387_v12, %v2448_v54  ;;  %v2318_v24 = vadd.f32 %v2286_v35, %v2220_v1  ;;  %v2449_v17 = vmul.f32 %v5358_v5, %v2415_v44 }
 0x1db   : > { %v1928_v14 = vadd.f32 %v1896_v61, %v1830_v62  ;;  %v2221_v43 = vadd.f32 %v2189_v30, %v2122_v32  ;;  %4308 = vrcp.f32 %v1418_v10  ;;  %v1371_v26 = vmul.f32 1.442695, %v1324_v47 }
 0x1dc   : > { %v5689_v4 = vadd.f32 %v5583_v45, %v1259_v38  ;;  %4310 = vrcp.f32 %v2607_v15  ;;  %v2551_v0 = vmul.f32 1.442695, %v2513_v23  ;;  %v5694_v59 = vadd.f32 %v5387_v12, %v2449_v17 }
 0x1dd   : > { %v1206_v29 = vpop.f32.mrf.mxu1  ;;  %v5696_v58 = vadd.f32 %v1994_v39, %v1928_v14  ;;  %v5698_v54 = vadd.f32 %v2287_v19, %v2221_v43  ;;  %4312 = vpow2.f32 %v1369_v34  ;;  %v1260_v32 = vmul.f32 %v5559_v3, %v1203_v55 }
 0x1de   : > { %v1325_v35 = vsub.f32 0.0, %v5689_v4  ;;  %v2514_v11 = vsub.f32 0.0, %v5685_v21  ;;  %4314 = vpow2.f32 %v1371_v26  ;;  %v5705_v15 = vmul.f32 %v5631_v25, %v5403_v57 }
 0x1df   : > { %v2384_v18 = vmul.f32 %v5309_v60, %v5691_v36  ;;  %v1261_v16 = vmul.f32 %v5559_v3, %v1206_v29  ;;  %v2608_v39 = vadd.f32 1.0, %v4305_v8  ;;  %4316 = vpow2.f32 %v2551_v0 }
 0x1e0   : > { %7063 = vst [vmem:[#allocation42_spill] sm:$0xff] %v5705_v15  ;;  %v1373_v23 = vmul.f32 1.442695, %v1325_v35  ;;  %v5711_v62 = vadd.f32 %v5583_v45, %v1260_v32  ;;  %v5715_v38 = vmul.f32 %v5604_v42, %v5400_v13  ;;  %v2515_v57 = vsub.f32 0.0, %v5694_v59 }
 0x1e1   : > { %v4309_v55 = vpop.eup %4308  ;;  %v2416_v1 = vadd.f32 %v2384_v18, %v2318_v24  ;;  %v2553_v44 = vmul.f32 1.442695, %v2514_v11  ;;  %v5725_v29 = vmul.f32 %v5637_v2, %v5450_v27  ;;  %v5728_v13 = vadd.f32 %v5583_v45, %v1261_v16 }
 0x1e2   : > { %7064 = vst [vmem:[#allocation43_spill] sm:$0xff] %v5715_v38  ;;  %4318 = vpow2.f32 %v1373_v23  ;;  %v4311_v25 = vpop.eup %4310  ;;  %v5719_v61 = vmul.f32 %v4309_v55, %v5586_v46  ;;  %v2699_v30 = vadd.f32 %v5705_v15, %v5715_v38  ;;  %v5732_v19 = vmul.f32 %v5646_v56, %v5488_v52  ;;  %v5737_v46 = vld [vmem:[%s6949_s5] ss:$0 sm:$0xff]  ;;  %v5747_v56 = vld [vmem:[%s6949_s5 + $0x1] ss:$0 sm:$0xff] }
 0x1e3   : > { %v4313_v8 = vpop.eup %4312  ;;  %7065 = vst [vmem:[#allocation44_spill] sm:$0xff] %v5725_v29  ;;  %4320 = vrcp.f32 %v2608_v39  ;;  %v1635_v10 = vmul.f32 %v5737_v46, %v5641_v49  ;;  %v1326_v27 = vsub.f32 0.0, %v5711_v62  ;;  %v2450_v2 = vmul.f32 %v5358_v5, %v2416_v1 }
 0x1e4   : > { %v4315_v42 = vpop.eup %4314  ;;  %7066 = vst [vmem:[#allocation45_spill] sm:$0xff] %v5732_v19  ;;  %v2555_v34 = vmul.f32 1.442695, %v2515_v57  ;;  %v1419_v24 = vadd.f32 1.0, %v4313_v8  ;;  %4322 = vpow2.f32 %v2553_v44  ;;  %v1701_v14 = vmul.f32 %v5747_v56, %v5599_v53 }
 0x1e5   : > { %v1208_v47 = vpop.f32.mrf.mxu1  ;;  %1569 = vst [vmem:[#allocation2 + $0xb1] sm:$0xff] %v5719_v61  ;;  %v1420_v17 = vadd.f32 1.0, %v4315_v42  ;;  %v4317_v52 = vpop.eup %4316  ;;  %v2700_v43 = vadd.f32 %v2699_v30, %v5725_v29  ;;  %v5753_v26 = vmul.f32 %v4311_v25, %v5545_v37  ;;  %v1327_v0 = vsub.f32 0.0, %v5728_v13  ;;  %v5765_v37 = vld [vmem:[%s6949_s5 + $0x2] ss:$0 sm:$0xff] }
 0x1e6   : > { %4324 = vrcp.f32 %v1419_v24  ;;  %v1733_v35 = vadd.f32 %v1701_v14, %v1635_v10  ;;  %v1375_v11 = vmul.f32 1.442695, %v1326_v27  ;;  %v2609_v16 = vadd.f32 1.0, %v4317_v52  ;;  %v5776_v25 = vld [vmem:[%s6949_s5 + $0x5] ss:$0 sm:$0xff] }
 0x1e7   : > { %7067 = vst [vmem:[#allocation46_spill] sm:$0xff] %v5753_v26  ;;  %4326 = vrcp.f32 %v1420_v17  ;;  %v2701_v23 = vadd.f32 %v2700_v43, %v5732_v19  ;;  %v5760_v53 = vadd.f32 %v5387_v12, %v2450_v2  ;;  %v1799_v55 = vmul.f32 %v5765_v37, %v5691_v36  ;;  %v5795_v52 = vld [vmem:[%s6949_s5 + $0x6] ss:$0 sm:$0xff] }
 0x1e8   : > { %v4319_v49 = vpop.eup %4318  ;;  %4328 = vpow2.f32 %v2555_v34  ;;  %v1262_v1 = vmul.f32 %v5559_v3, %v1208_v47  ;;  %v2091_v44 = vmul.f32 %v5776_v25, %v5691_v36  ;;  %v1702_v8 = vmul.f32 %v5747_v56, %v5602_v63  ;;  %v5787_v34 = vld [vmem:[%s6949_s5 + $0x3] ss:$0 sm:$0xff] }
 0x1e9   : > { %v1421_v32 = vadd.f32 1.0, %v4319_v49  ;;  %v4321_v39 = vpop.eup %4320  ;;  %v5771_v57 = vadd.f32 %v2701_v23, %v5753_v26  ;;  %v1377_v10 = vmul.f32 1.442695, %v1327_v0  ;;  %v1831_v2 = vadd.f32 %v1799_v55, %v1733_v35  ;;  %v5801_v0 = vld [vmem:[%s6949_s5 + $0x4] ss:$0 sm:$0xff] }
 0x1ea   : > { %v4323_v27 = vpop.eup %4322  ;;  %v1636_v47 = vmul.f32 %v5737_v46, %v5664_v9  ;;  %v2123_v63 = vadd.f32 %v2091_v44, %v5673_v22  ;;  %v2516_v17 = vsub.f32 0.0, %v5760_v53  ;;  %v1995_v22 = vmul.f32 %v5801_v0, %v5719_v61  ;;  %v5812_v55 = vld [vmem:[%s6949_s5 + $0x7] ss:$0 sm:$0xff] }
 0x1eb   : > { %4330 = vrcp.f32 %v1421_v32  ;;  %v5807_v32 = vadd.f32 %v5583_v45, %v1262_v1  ;;  %v2610_v23 = vadd.f32 1.0, %v4323_v27  ;;  %v2288_v44 = vmul.f32 %v5812_v55, %v5719_v61 }
 0x1ec   : > { %v1603_v30 = vld [vmem:[#allocation2 + $0xb0] sm:$0xff]  ;;  %4332 = vpow2.f32 %v1375_v11  ;;  %v4325_v36 = vpop.eup %4324 }
 0x1ed   : > { %v5756_v18 = vpop.f32.mrf.mxu1  ;;  %v1766_v42 = vld [vmem:[#allocation2 + $0xaa] sm:$0xff]  ;;  %v1897_v24 = vmul.f32 %v5787_v34, %v1603_v30  ;;  %4334 = vrcp.f32 %v2609_v16  ;;  %v2190_v9 = vmul.f32 %v5795_v52, %v1603_v30  ;;  %v4327_v14 = vpop.eup %4326  ;;  %v1767_v49 = vld [vmem:[#allocation2 + $0xb2] sm:$0xff]  ;;  %v1637_v1 = vmul.f32 %v5737_v46, %v1603_v30 }
 0x1ee   : > { %v2385_v35 = vmul.f32 %v5309_v60, %v1766_v42  ;;  %v4329_v11 = vpop.eup %4328  ;;  %4336 = vpow2.f32 %v1377_v10  ;;  %v2386_v33 = vmul.f32 %v5309_v60, %v1767_v49  ;;  %v5824_v28 = vmul.f32 %v4327_v14, %v5658_v40 }
 0x1ef   : > { %v1929_v43 = vadd.f32 %v1897_v24, %v1831_v2  ;;  %v2222_v16 = vadd.f32 %v2190_v9, %v2123_v63  ;;  %v4026_v2 = vld [vmem:[%s6951_s7 + $0x30] sm:$0xff]  ;;  %v1483_v63 = vmul.f32 %v4325_v36, %v5627_v20  ;;  %v2557_v10 = vmul.f32 1.442695, %v2516_v17 }
 0x1f0   : > { %v2417_v27 = vadd.f32 %v2385_v35, %v5698_v54  ;;  %2811 = vmatpush.bf16.msrb.mxu0 %v4026_v2  ;;  %v1703_v30 = vmul.f32 %v5747_v56, %v5719_v61  ;;  %v1328_v20 = vsub.f32 0.0, %v5807_v32  ;;  %v5836_v36 = vmul.f32 %v4321_v39, %v5568_v41  ;;  %1571 = vst [vmem:[#allocation2 + $0xc9] sm:$0xff] %v5824_v28 }
 0x1f1   : > { %v4331_v24 = vpop.eup %4330  ;;  %v2027_v31 = vadd.f32 %v1995_v22, %v1929_v43  ;;  %v2320_v9 = vadd.f32 %v2288_v44, %v2222_v16  ;;  %1570 = vst [vmem:[#allocation2 + $0xc1] sm:$0xff] %v1483_v63  ;;  %v2611_v40 = vadd.f32 1.0, %v4329_v11  ;;  %v1800_v61 = vmul.f32 %v5765_v37, %v1766_v42 }
 0x1f2   : > { %v5827_v7 = vmul.f32 %v4331_v24, %v5689_v4  ;;  %v4333_v6 = vpop.eup %4332  ;;  %v2451_v43 = vmul.f32 %v5358_v5, %v2417_v27  ;;  %7068 = vst [vmem:[#allocation47_spill] sm:$0xff] %v5836_v36  ;;  %v1263_v4 = vmul.f32 %v5559_v3, %v5756_v18  ;;  %v1735_v17 = vadd.f32 %v1703_v30, %v1637_v1 }
 0x1f3   : > { %v4335_v60 = vpop.eup %4334  ;;  %v2418_v14 = vadd.f32 %v2386_v33, %v2320_v9  ;;  %v2092_v22 = vmul.f32 %v5776_v25, %v1766_v42  ;;  %4338 = vrcp.f32 %v2610_v23  ;;  %v1734_v41 = vadd.f32 %v1702_v8, %v1636_v47 }
 0x1f4   : > { %v5844_v35 = vadd.f32 %v5387_v12, %v2451_v43  ;;  %1572 = vst [vmem:[#allocation2 + $0xd9] sm:$0xff] %v5827_v7  ;;  %v4337_v16 = vpop.eup %4336  ;;  %v1422_v39 = vadd.f32 1.0, %v4333_v6  ;;  %v5849_v11 = vmul.f32 %v4335_v60, %v5649_v48  ;;  %4340 = vpow2.f32 %v2557_v10 }
 0x1f5   : > { %v5833_v54 = vpop.f32.mrf.mxu1  ;;  %v2452_v33 = vmul.f32 %v5358_v5, %v2418_v14  ;;  %v1801_v18 = vmul.f32 %v5765_v37, %v1767_v49  ;;  %v1379_v44 = vmul.f32 1.442695, %v1328_v20  ;;  %4342 = vrcp.f32 %v2611_v40 }
 0x1f6   : > { %7069 = vst [vmem:[#allocation48_spill] sm:$0xff] %v5849_v11  ;;  %v2093_v42 = vmul.f32 %v5776_v25, %v1767_v49  ;;  %v2517_v24 = vsub.f32 0.0, %v5844_v35  ;;  %v1832_v23 = vadd.f32 %v1800_v61, %v1734_v41  ;;  %v2124_v5 = vadd.f32 %v2092_v22, %v5696_v58 }
 0x1f7   : > { %v5854_v2 = vadd.f32 %v5387_v12, %v2452_v33  ;;  %v1833_v8 = vadd.f32 %v1801_v18, %v1735_v17  ;;  %v5859_v6 = vadd.f32 %v5583_v45, %v1263_v4  ;;  %v1704_v1 = vmul.f32 %v5747_v56, %v1483_v63 }
 0x1f8   : > { %v2125_v48 = vadd.f32 %v2093_v42, %v2027_v31  ;;  %v1604_v47 = vld [vmem:[#allocation2 + $0xc0] sm:$0xff]  ;;  %4344 = vrcp.f32 %v1422_v39  ;;  %v1423_v27 = vadd.f32 1.0, %v4337_v16  ;;  %v1996_v9 = vmul.f32 %v5801_v0, %v1483_v63  ;;  %v1605_v30 = vld [vmem:[#allocation2 + $0xc8] sm:$0xff] }
 0x1f9   : > { %v1638_v49 = vmul.f32 %v5737_v46, %v1604_v47  ;;  %v1898_v12 = vmul.f32 %v5787_v34, %v1604_v47  ;;  %v2191_v10 = vmul.f32 %v5795_v52, %v1604_v47  ;;  %v1768_v43 = vld [vmem:[#allocation2 + $0xc2] sm:$0xff]  ;;  %v5866_v58 = vpop.eup %4338  ;;  %v2518_v20 = vsub.f32 0.0, %v5854_v2 }
 0x1fa   : > { %v2559_v31 = vmul.f32 1.442695, %v2517_v24  ;;  %v2289_v60 = vmul.f32 %v5812_v55, %v1483_v63  ;;  %4346 = vpow2.f32 %v1379_v44  ;;  %v4341_v40 = vpop.eup %4340  ;;  %v1802_v17 = vmul.f32 %v5765_v37, %v1768_v43  ;;  %v5885_v47 = vld [vmem:[%s6949_s5 + $0x8] ss:$0 sm:$0xff] }
 0x1fb   : > { %v1930_v14 = vadd.f32 %v1898_v12, %v1832_v23  ;;  %v2223_v4 = vadd.f32 %v2191_v10, %v2124_v5  ;;  %v1899_v61 = vmul.f32 %v5787_v34, %v1605_v30  ;;  %v5874_v16 = vpop.eup %4342  ;;  %v1997_v41 = vmul.f32 %v5801_v0, %v5824_v28  ;;  %v1606_v39 = vld [vmem:[#allocation2 + $0xd8] sm:$0xff] }
 0x1fc   : > { %v2094_v33 = vmul.f32 %v5776_v25, %v1768_v43  ;;  %v2290_v63 = vmul.f32 %v5812_v55, %v5824_v28  ;;  %4348 = vrcp.f32 %v1423_v27  ;;  %v1736_v18 = vadd.f32 %v1704_v1, %v1638_v49  ;;  %v1769_v27 = vld [vmem:[#allocation2 + $0xca] sm:$0xff] }
 0x1fd   : > { %v5872_v22 = vpop.f32.mrf.mxu1  ;;  %v2028_v44 = vadd.f32 %v1996_v9, %v1930_v14  ;;  %v2321_v42 = vadd.f32 %v2289_v60, %v2223_v4  ;;  %v1931_v24 = vadd.f32 %v1899_v61, %v1833_v8  ;;  %4350 = vpow2.f32 %v2559_v31 }
 0x1fe   : > { %v4345_v23 = vpop.eup %4344  ;;  %v2192_v5 = vmul.f32 %v5795_v52, %v1605_v30  ;;  %v2387_v12 = vmul.f32 %v5885_v47, %v1768_v43  ;;  %v1998_v10 = vmul.f32 %v5801_v0, %v5827_v7  ;;  %v2561_v51 = vmul.f32 1.442695, %v2518_v20 }
 0x1ff   : > { %v1834_v1 = vadd.f32 %v1802_v17, %v1736_v18  ;;  %v2029_v49 = vadd.f32 %v1997_v41, %v1931_v24  ;;  %v1900_v8 = vmul.f32 %v5787_v34, %v1606_v39  ;;  %v2126_v31 = vadd.f32 %v2094_v33, %v2028_v44 }
 0x200   : > { %v4347_v9 = vpop.eup %4346  ;;  %v2224_v60 = vadd.f32 %v2192_v5, %v2125_v48  ;;  %v2419_v14 = vadd.f32 %v2387_v12, %v2321_v42  ;;  %v2193_v4 = vmul.f32 %v5795_v52, %v1606_v39  ;;  %v1639_v61 = vmul.f32 %v5737_v46, %v1605_v30  ;;  %v5902_v48 = vld [vmem:[%s6950_s6] ss:$0 sm:$0xff] }
 0x201   : > { %v1932_v50 = vadd.f32 %v1900_v8, %v1834_v1  ;;  %v2291_v43 = vmul.f32 %v5812_v55, %v5827_v7  ;;  %v5896_v26 = vmul.f32 %v4345_v23, %v5711_v62  ;;  %v2388_v41 = vmul.f32 %v5885_v47, %v1769_v27  ;;  %v5916_v23 = vld [vmem:[%s6950_s6 + $0x1] ss:$0 sm:$0xff] }
 0x202   : > { %v4349_v20 = vpop.eup %4348  ;;  %v2322_v17 = vadd.f32 %v2290_v63, %v2224_v60  ;;  %v2453_v33 = vmul.f32 %v5902_v48, %v2419_v14  ;;  %v2225_v18 = vadd.f32 %v2193_v4, %v2126_v31  ;;  %v2703_v30 = vadd.f32 %v5771_v57, %v5836_v36 }
 0x203   : > { %4352 = vpow2.f32 %v2561_v51  ;;  %v5907_v44 = vadd.f32 %v1998_v10, %v1932_v50  ;;  %1573 = vst [vmem:[#allocation2 + $0xe1] sm:$0xff] %v5896_v26  ;;  %v1329_v62 = vsub.f32 0.0, %v5859_v6  ;;  %v4351_v63 = vpop.eup %4350  ;;  %v1705_v42 = vmul.f32 %v5747_v56, %v5824_v28 }
 0x204   : > { %v2420_v24 = vadd.f32 %v2388_v41, %v2322_v17  ;;  %v5919_v5 = vadd.f32 %v5916_v23, %v2453_v33  ;;  %v5921_v51 = vadd.f32 %v2291_v43, %v2225_v18  ;;  %v2612_v57 = vadd.f32 1.0, %v4341_v40 }
 0x205   : > { %v5923_v50 = vpop.f32.mrf.mxu1  ;;  %v5926_v12 = vmul.f32 %v4349_v20, %v5728_v13  ;;  %v1424_v10 = vadd.f32 1.0, %v4347_v9  ;;  %v1264_v28 = vmul.f32 %v5559_v3, %v5833_v54  ;;  %v5931_v1 = vadd.f32 %v2703_v30, %v5849_v11 }
 0x206   : > { %v1737_v8 = vadd.f32 %v1705_v42, %v1639_v61  ;;  %v2454_v31 = vmul.f32 %v5902_v48, %v2420_v24  ;;  %v2519_v60 = vsub.f32 0.0, %v5919_v5  ;;  %v5937_v14 = vmul.f32 %v5866_v58, %v5685_v21 }
 0x207   : > { %v2613_v40 = vadd.f32 1.0, %v4351_v63  ;;  %v1640_v13 = vmul.f32 %v5737_v46, %v1606_v39  ;;  %1574 = vst [vmem:[#allocation2 + $0xf1] sm:$0xff] %v5926_v12  ;;  %v1381_v9 = vmul.f32 1.442695, %v1329_v62  ;;  %v1803_v54 = vmul.f32 %v5765_v37, %v1769_v27 }
 0x208   : > { %7070 = vst [vmem:[#allocation49_spill] sm:$0xff] %v5937_v14  ;;  %v2095_v4 = vmul.f32 %v5776_v25, %v1769_v27  ;;  %v5944_v61 = vadd.f32 %v5916_v23, %v2454_v31  ;;  %4354 = vrcp.f32 %v1424_v10  ;;  %v5948_v21 = vmul.f32 %v5874_v16, %v5694_v59 }
 0x209   : > { %v4353_v43 = vpop.eup %4352  ;;  %4356 = vrcp.f32 %v2612_v57  ;;  %v1706_v58 = vmul.f32 %v5747_v56, %v5827_v7  ;;  %v5953_v39 = vadd.f32 %v5583_v45, %v1264_v28  ;;  %v1835_v20 = vadd.f32 %v1803_v54, %v1737_v8  ;;  %v4025_v7 = vld [vmem:[%s6951_s7 + $0x28] sm:$0xff] }
 0x20a   : > { %7071 = vst [vmem:[#allocation50_spill] sm:$0xff] %v5948_v21  ;;  %v2127_v17 = vadd.f32 %v2095_v4, %v2029_v49  ;;  %v2563_v41 = vmul.f32 1.442695, %v2519_v60  ;;  %v1607_v27 = vld [vmem:[#allocation2 + $0xe0] sm:$0xff]  ;;  %v1265_v18 = vmul.f32 %v5559_v3, %v5872_v22  ;;  %4358 = vrcp.f32 %v2613_v40  ;;  %2812 = vmatpush.bf16.msrb.mxu0 %v4025_v7 }
 0x20b   : > { %v1770_v33 = vld [vmem:[#allocation2 + $0xda] sm:$0xff]  ;;  %v2520_v30 = vsub.f32 0.0, %v5944_v61  ;;  %v1738_v62 = vadd.f32 %v1706_v58, %v1640_v13  ;;  %v2614_v16 = vadd.f32 1.0, %v4353_v43  ;;  %v1901_v63 = vmul.f32 %v5787_v34, %v1607_v27  ;;  %v1771_v28 = vld [vmem:[#allocation2 + $0xe2] sm:$0xff] }
 0x20c   : > { %v1804_v59 = vmul.f32 %v5765_v37, %v1770_v33  ;;  %v2096_v49 = vmul.f32 %v5776_v25, %v1770_v33  ;;  %4360 = vpow2.f32 %v1381_v9  ;;  %v1999_v42 = vmul.f32 %v5801_v0, %v5896_v26 }
 0x20d   : > { %v2194_v22 = vmul.f32 %v5795_v52, %v1607_v27  ;;  %v2292_v24 = vmul.f32 %v5812_v55, %v5896_v26  ;;  %v1330_v57 = vsub.f32 0.0, %v5953_v39  ;;  %4362 = vpow2.f32 %v2563_v41 }
 0x20e   : > { %v4355_v10 = vpop.eup %4354  ;;  %v1933_v8 = vadd.f32 %v1901_v63, %v1835_v20  ;;  %v5970_v31 = vld [vmem:[#allocation2 + $0xf0] sm:$0xff]  ;;  %v2000_v60 = vmul.f32 %v5801_v0, %v5926_v12  ;;  %v5975_v40 = vadd.f32 %v5583_v45, %v1265_v18  ;;  %v2565_v54 = vmul.f32 1.442695, %v2520_v30 }
 0x20f   : > { %v1221_v13 = vpop.f32.mrf.mxu1  ;;  %v4357_v9 = vpop.eup %4356  ;;  %v1836_v4 = vadd.f32 %v1804_v59, %v1738_v62  ;;  %v2226_v43 = vadd.f32 %v2194_v22, %v2127_v17  ;;  %v2389_v58 = vmul.f32 %v5885_v47, %v1770_v33  ;;  %v2128_v41 = vadd.f32 %v2096_v49, %v5907_v44 }
 0x210   : > { %v2031_v7 = vadd.f32 %v1999_v42, %v1933_v8  ;;  %v1902_v20 = vmul.f32 %v5787_v34, %v5970_v31  ;;  %v2195_v63 = vmul.f32 %v5795_v52, %v5970_v31  ;;  %v4359_v11 = vpop.eup %4358  ;;  %v2390_v18 = vmul.f32 %v5885_v47, %v1771_v28 }
 0x211   : > { %v2324_v36 = vadd.f32 %v2292_v24, %v2226_v43  ;;  %v2421_v19 = vadd.f32 %v2389_v58, %v5921_v51  ;;  %v5986_v30 = vmul.f32 %v4355_v10, %v5807_v32  ;;  %v2293_v44 = vmul.f32 %v5812_v55, %v5926_v12 }
 0x212   : > { %v4361_v17 = vpop.eup %4360  ;;  %v1934_v33 = vadd.f32 %v1902_v20, %v1836_v4  ;;  %v2227_v62 = vadd.f32 %v2195_v63, %v2128_v41  ;;  %v1331_v59 = vsub.f32 0.0, %v5975_v40  ;;  %4364 = vrcp.f32 %v2614_v16 }
 0x213   : > { %v2422_v49 = vadd.f32 %v2390_v18, %v2324_v36  ;;  %v2455_v42 = vmul.f32 %v5902_v48, %v2421_v19  ;;  %1575 = vst [vmem:[#allocation2 + $0xf9] sm:$0xff] %v5986_v30  ;;  %v1383_v22 = vmul.f32 1.442695, %v1330_v57  ;;  %v4363_v24 = vpop.eup %4362  ;;  %v1641_v51 = vmul.f32 %v5737_v46, %v1607_v27 }
 0x214   : > { %v5994_v32 = vadd.f32 %v2000_v60, %v1934_v33  ;;  %v5996_v10 = vadd.f32 %v2293_v44, %v2227_v62  ;;  %v1266_v8 = vmul.f32 %v5559_v3, %v5923_v50  ;;  %4366 = vpow2.f32 %v2565_v54 }
 0x215   : > { %v2456_v4 = vmul.f32 %v5902_v48, %v2422_v49  ;;  %v6002_v36 = vadd.f32 %v5916_v23, %v2455_v42  ;;  %v1425_v19 = vadd.f32 1.0, %v4361_v17  ;;  %v2705_v16 = vadd.f32 %v5931_v1, %v5937_v14 }
 0x216   : > { %v6007_v57 = vmul.f32 %v4357_v9, %v5760_v53  ;;  %v1707_v27 = vmul.f32 %v5747_v56, %v5896_v26  ;;  %v1385_v60 = vmul.f32 1.442695, %v1331_v59  ;;  %4368 = vpow2.f32 %v1383_v22 }
 0x217   : > { %v6012_v43 = vadd.f32 %v5916_v23, %v2456_v4  ;;  %v2521_v50 = vsub.f32 0.0, %v6002_v36  ;;  %v1267_v54 = vmul.f32 %v5559_v3, %v1221_v13  ;;  %v2706_v58 = vadd.f32 %v2705_v16, %v5948_v21  ;;  %v1223_v1 = vpop.f32.mrf.mxu1 }
 0x218   : > { %7072 = vst [vmem:[#allocation51_spill] sm:$0xff] %v6007_v57  ;;  %v2615_v41 = vadd.f32 1.0, %v4363_v24  ;;  %v1739_v20 = vadd.f32 %v1707_v27, %v1641_v51  ;;  %4370 = vrcp.f32 %v1425_v19  ;;  %v4365_v53 = vpop.eup %4364  ;;  %v6019_v26 = vadd.f32 %v5583_v45, %v1266_v8 }
 0x219   : > { %v2522_v9 = vsub.f32 0.0, %v6012_v43  ;;  %v2567_v63 = vmul.f32 1.442695, %v2521_v50  ;;  %4372 = vpow2.f32 %v1385_v60  ;;  %v2707_v18 = vadd.f32 %v2706_v58, %v6007_v57 }
 0x21a   : > { %v1805_v17 = vmul.f32 %v5765_v37, %v1771_v28  ;;  %v2097_v13 = vmul.f32 %v5776_v25, %v1771_v28  ;;  %v6026_v33 = vmul.f32 %v5747_v56, %v5926_v12  ;;  %v6028_v62 = vld [vmem:[#allocation2 + $0xf8] sm:$0xff]  ;;  %v4367_v44 = vpop.eup %4366  ;;  %v6031_v59 = vmul.f32 %v4359_v11, %v5844_v35  ;;  %v4024_v35 = vld [vmem:[%s6951_s7 + $0x20] sm:$0xff] }
 0x21b   : > { %4374 = vpow2.f32 %v2567_v63  ;;  %v6034_v49 = vadd.f32 %v5583_v45, %v1267_v54  ;;  %v1268_v42 = vmul.f32 %v5559_v3, %v1223_v1  ;;  %v6038_v22 = vmul.f32 %v4365_v53, %v5854_v2  ;;  %v1772_v51 = vld [vmem:[#allocation2 + $0xf2] sm:$0xff]  ;;  %2813 = vmatpush.bf16.msrb.mxu0 %v4024_v35  ;;  %v6052_v54 = vld [vmem:[#allocation2 + $0xfa] sm:$0xff] }
 0x21c   : > { %7073 = vst [vmem:[#allocation52_spill] sm:$0xff] %v6031_v59  ;;  %v1837_v28 = vadd.f32 %v1805_v17, %v1739_v20  ;;  %v2129_v24 = vadd.f32 %v2097_v13, %v2031_v7  ;;  %v1903_v12 = vmul.f32 %v5787_v34, %v6028_v62  ;;  %v4369_v11 = vpop.eup %4368  ;;  %4376 = vrcp.f32 %v2615_v41 }
 0x21d   : > { %7074 = vst [vmem:[#allocation53_spill] sm:$0xff] %v6038_v22  ;;  %v2569_v8 = vmul.f32 1.442695, %v2522_v9  ;;  %v2001_v4 = vmul.f32 %v5801_v0, %v5986_v30  ;;  %v1332_v19 = vsub.f32 0.0, %v6019_v26  ;;  %v2616_v16 = vadd.f32 1.0, %v4367_v44 }
 0x21e   : > { %v4371_v2 = vpop.eup %4370  ;;  %v1935_v27 = vadd.f32 %v1903_v12, %v1837_v28  ;;  %v2196_v7 = vmul.f32 %v5795_v52, %v6028_v62  ;;  %v2294_v60 = vmul.f32 %v5812_v55, %v5986_v30  ;;  %v2391_v58 = vmul.f32 %v5885_v47, %v1772_v51 }
 0x21f   : > { %v4373_v50 = vpop.eup %4372  ;;  %v6056_v41 = vmul.f32 %v4371_v2, %v5859_v6  ;;  %v1333_v20 = vsub.f32 0.0, %v6034_v49  ;;  %v6060_v1 = vadd.f32 %v5583_v45, %v1268_v42  ;;  %v1426_v63 = vadd.f32 1.0, %v4369_v11 }
 0x220   : > { %v6062_v53 = vadd.f32 %v2001_v4, %v1935_v27  ;;  %v2228_v9 = vadd.f32 %v2196_v7, %v2129_v24  ;;  %v1427_v17 = vadd.f32 1.0, %v4373_v50  ;;  %4378 = vpow2.f32 %v2569_v8 }
 0x221   : > { %v4375_v13 = vpop.eup %4374  ;;  %v1642_v44 = vmul.f32 %v5737_v46, %v5970_v31  ;;  %v2423_v28 = vadd.f32 %v2391_v58, %v5996_v10  ;;  %1576 = vst [vmem:[#allocation2 + $0x109] sm:$0xff] %v6056_v41  ;;  %v1387_v6 = vmul.f32 1.442695, %v1332_v19  ;;  %v2392_v42 = vmul.f32 %v5885_v47, %v6052_v54 }
 0x222   : > { %v2617_v12 = vadd.f32 1.0, %v4375_v13  ;;  %v2326_v35 = vadd.f32 %v2294_v60, %v2228_v9  ;;  %4380 = vrcp.f32 %v1426_v63  ;;  %v4377_v24 = vpop.eup %4376  ;;  %v1389_v8 = vmul.f32 1.442695, %v1333_v20 }
 0x223   : > { %v2457_v11 = vmul.f32 %v5902_v48, %v2423_v28  ;;  %4382 = vrcp.f32 %v1427_v17  ;;  %v1334_v2 = vsub.f32 0.0, %v6060_v1  ;;  %v2708_v31 = vadd.f32 %v2707_v18, %v6031_v59 }
 0x224   : > { %4384 = vrcp.f32 %v2616_v16  ;;  %v2424_v10 = vadd.f32 %v2392_v42, %v2326_v35  ;;  %v1806_v27 = vmul.f32 %v5765_v37, %v1772_v51  ;;  %v6080_v58 = vmul.f32 %v4377_v24, %v5919_v5 }
 0x225   : > { %v6076_v7 = vadd.f32 %v5916_v23, %v2457_v11  ;;  %4386 = vpow2.f32 %v1387_v6  ;;  %v1391_v60 = vmul.f32 1.442695, %v1334_v2  ;;  %v2709_v50 = vadd.f32 %v2708_v31, %v6038_v22 }
 0x226   : > { %7076 = vst [vmem:[#allocation55_spill] sm:$0xff] %v6080_v58  ;;  %4388 = vrcp.f32 %v2617_v12  ;;  %v2098_v20 = vmul.f32 %v5776_v25, %v1772_v51  ;;  %v4379_v18 = vpop.eup %4378  ;;  %v1740_v16 = vadd.f32 %v6026_v33, %v1642_v44  ;;  %v1643_v17 = vmul.f32 %v5737_v46, %v6028_v62 }
 0x227   : > { %7075 = vst [vmem:[#allocation54_spill] sm:$0xff] %v6076_v7  ;;  %4390 = vpow2.f32 %v1389_v8  ;;  %v1709_v5 = vmul.f32 %v5747_v56, %v5986_v30  ;;  %v2458_v13 = vmul.f32 %v5902_v48, %v2424_v10  ;;  %v6096_v35 = vadd.f32 %v2709_v50, %v6080_v58 }
 0x228   : > { %v1226_v4 = vpop.f32.mrf.mxu1  ;;  %v4381_v63 = vpop.eup %4380  ;;  %v1610_v28 = vld [vmem:[#allocation2 + $0x108] sm:$0xff]  ;;  %4392 = vpow2.f32 %v1391_v60  ;;  %v1838_v6 = vadd.f32 %v1806_v27, %v1740_v16  ;;  %v2130_v62 = vadd.f32 %v2098_v20, %v5994_v32  ;;  %v2618_v11 = vadd.f32 1.0, %v4379_v18 }
 0x229   : > { %v1269_v19 = vmul.f32 %v5559_v3, %v1226_v4  ;;  %v2523_v3 = vsub.f32 0.0, %v6076_v7  ;;  %v4383_v51 = vpop.eup %4382  ;;  %v1904_v44 = vmul.f32 %v5787_v34, %v1610_v28  ;;  %v2197_v12 = vmul.f32 %v5795_v52, %v1610_v28 }
 0x22a   : > { %v1490_v42 = vmul.f32 %v4381_v63, %v5953_v39  ;;  %v6101_v30 = vmul.f32 %v4383_v51, %v5975_v40  ;;  %v2002_v2 = vmul.f32 %v5801_v0, %v6056_v41  ;;  %v2295_v32 = vmul.f32 %v5812_v55, %v6056_v41 }
 0x22b   : > { %v6086_v9 = vadd.f32 %v5583_v45, %v1269_v19  ;;  %v2571_v33 = vmul.f32 1.442695, %v2523_v3  ;;  %v4385_v45 = vpop.eup %4384  ;;  %v1936_v8 = vadd.f32 %v1904_v44, %v1838_v6  ;;  %v2229_v19 = vadd.f32 %v2197_v12, %v2130_v62 }
 0x22c   : > { %v4387_v24 = vpop.eup %4386  ;;  %1577 = vst [vmem:[#allocation2 + $0x111] sm:$0xff] %v1490_v42  ;;  %v6109_v39 = vadd.f32 %v5916_v23, %v2458_v13  ;;  %v1741_v27 = vadd.f32 %v1709_v5, %v1643_v17  ;;  %v1807_v60 = vmul.f32 %v5765_v37, %v6052_v54  ;;  %v2099_v50 = vmul.f32 %v5776_v25, %v6052_v54  ;;  %v6123_v5 = vld [vmem:[%s7046_s4] ss:$0 sm:$0xff] }
 0x22d   : > { %v1335_v31 = vsub.f32 0.0, %v6086_v9  ;;  %v4389_v10 = vpop.eup %4388  ;;  %4394 = vpow2.f32 %v2571_v33  ;;  %v2034_v20 = vadd.f32 %v2002_v2, %v1936_v8  ;;  %1578 = vst [vmem:[#allocation2 + $0x121] sm:$0xff] %v6101_v30  ;;  %v1644_v16 = vmul.f32 %v5737_v46, %v1610_v28 }
 0x22e   : > { %7077 = vst [vmem:[#allocation56_spill] sm:$0xff] %v6109_v39  ;;  %v4391_v40 = vpop.eup %4390  ;;  %v2327_v3 = vadd.f32 %v2295_v32, %v2229_v19  ;;  %v1428_v63 = vadd.f32 1.0, %v4387_v24  ;;  %v6118_v13 = vmul.f32 %v4385_v45, %v5944_v61  ;;  %4396 = vrcp.f32 %v2618_v11 }
 0x22f   : > { %v4393_v18 = vpop.eup %4392  ;;  %v1429_v51 = vadd.f32 1.0, %v4391_v40  ;;  %v1393_v17 = vmul.f32 1.442695, %v1335_v31  ;;  %v1710_v6 = vmul.f32 %v5747_v56, %v6056_v41  ;;  %v2524_v33 = vsub.f32 0.0, %v6109_v39  ;;  %v6138_v41 = vld [vmem:[%s7046_s4 + $0x1] ss:$0 sm:$0xff] }
 0x230   : > { %v1228_v4 = vpop.f32.mrf.mxu1  ;;  %4398 = vrcp.f32 %v1428_v63  ;;  %v1430_v28 = vadd.f32 1.0, %v4393_v18  ;;  %v6130_v44 = vmul.f32 %v4389_v10, %v6002_v36  ;;  %v1839_v61 = vadd.f32 %v1807_v60, %v1741_v27  ;;  %s4673_s4 = scalar_lea.hbm %s4672_s3, 1 }
 0x231   : > { %v1270_v54 = vmul.f32 %v6123_v5, %v1228_v4  ;;  %v2131_v12 = vadd.f32 %v2099_v50, %v6062_v53  ;;  %4400 = vrcp.f32 %v1429_v51  ;;  %v1742_v62 = vadd.f32 %v1710_v6, %v1644_v16  ;;  %v4023_v6 = vld [vmem:[%s6951_s7 + $0x18] sm:$0xff]  ;;  %p4674_p11 = scmp.ne.s32.totalorder %s4672_s3, %s4673_s4  ;;  %p4679_p1 = scmp.lt.s32.totalorder %s4677_s0, %s4673_s4 }
 0x232   : > { %7078 = vst [vmem:[#allocation57_spill] sm:$0xff] %v6130_v44  ;;  %v1711_v24 = vmul.f32 %v5747_v56, %v1490_v42  ;;  %v2003_v4 = vmul.f32 %v5801_v0, %v1490_v42  ;;  %v2296_v53 = vmul.f32 %v5812_v55, %v1490_v42  ;;  %v1712_v31 = vmul.f32 %v5747_v56, %v6101_v30 }
 0x233   : > { %v4395_v45 = vpop.eup %4394  ;;  %v6141_v11 = vadd.f32 %v6138_v41, %v1270_v54  ;;  %v1611_v8 = vld [vmem:[#allocation2 + $0x110] sm:$0xff]  ;;  %v2297_v10 = vmul.f32 %v5812_v55, %v6101_v30  ;;  %4402 = vpow2.f32 %v1393_v17  ;;  %v2573_v27 = vmul.f32 1.442695, %v2524_v33  ;;  %2814 = vmatpush.bf16.msrb.mxu0 %v4023_v6  ;;  %p4675_p12 = pnand %p4674_p11, %p4852_p5  ;;  %p4680_p2 = por %p4679_p1, %p4678_p0 }
 0x234   : > { %v1774_v2 = vld [vmem:[#allocation2 + $0x10a] sm:$0xff]  ;;  %v1645_v19 = vmul.f32 %v5737_v46, %v1611_v8  ;;  %v1775_v32 = vld [vmem:[#allocation2 + $0x112] sm:$0xff]  ;;  %4404 = vrcp.f32 %v1430_v28  ;;  %v6150_v60 = vpop.eup %4396  ;;  %v2619_v50 = vadd.f32 1.0, %v4395_v45  ;;  %v1905_v18 = vmul.f32 %v5787_v34, %v1611_v8  ;;  %v1612_v63 = vld [vmem:[#allocation2 + $0x120] sm:$0xff] }
 0x235   : > { %v1808_v40 = vmul.f32 %v5765_v37, %v1774_v2  ;;  %v2100_v42 = vmul.f32 %v5776_v25, %v1774_v2  ;;  %v2198_v16 = vmul.f32 %v5795_v52, %v1611_v8  ;;  %v2393_v17 = vmul.f32 %v5885_v47, %v1774_v2  ;;  %p4676_p13 = pneg %p4675_p12 }
 0x236   : > { %v4399_v51 = vpop.eup %4398  ;;  %v1743_v54 = vadd.f32 %v1711_v24, %v1645_v19  ;;  %v1336_v28 = vsub.f32 0.0, %v6141_v11  ;;  %v1937_v22 = vadd.f32 %v1905_v18, %v1839_v61  ;;  %v2394_v57 = vmul.f32 %v5885_v47, %v1775_v32 }
 0x237   : > { %v4401_v45 = vpop.eup %4400  ;;  %v1840_v58 = vadd.f32 %v1808_v40, %v1742_v62  ;;  %v2230_v59 = vadd.f32 %v2198_v16, %v2131_v12  ;;  %v2132_v8 = vadd.f32 %v2100_v42, %v2034_v20  ;;  %v1646_v21 = vmul.f32 %v5737_v46, %v1612_v63  ;;  %p4681_p3 = pnand %p4680_p2, %p4676_p13 }
 0x238   : > { %v1231_v36 = vpop.f32.mrf.mxu1  ;;  %v1906_v24 = vmul.f32 %v5787_v34, %v1612_v63  ;;  %v2199_v2 = vmul.f32 %v5795_v52, %v1612_v63  ;;  %v2035_v14 = vadd.f32 %v2003_v4, %v1937_v22  ;;  %v2425_v15 = vadd.f32 %v2393_v17, %v2327_v3 }
 0x239   : > { %v1271_v33 = vmul.f32 %v6123_v5, %v1231_v36  ;;  %v4403_v19 = vpop.eup %4402  ;;  %v2328_v29 = vadd.f32 %v2296_v53, %v2230_v59  ;;  %v1492_v36 = vmul.f32 %v4399_v51, %v6019_v26  ;;  %v1809_v61 = vmul.f32 %v5765_v37, %v1775_v32 }
 0x23a   : > { %v4405_v38 = vpop.eup %4404  ;;  %v2231_v12 = vadd.f32 %v2199_v2, %v2132_v8  ;;  %v1493_v62 = vmul.f32 %v4401_v45, %v6034_v49  ;;  %4406 = vpow2.f32 %v2573_v27  ;;  %v2101_v20 = vmul.f32 %v5776_v25, %v1775_v32 }
 0x23b   : > { %v2426_v40 = vadd.f32 %v2394_v57, %v2328_v29  ;;  %v1938_v18 = vadd.f32 %v1906_v24, %v1840_v58  ;;  %v2004_v42 = vmul.f32 %v5801_v0, %v6101_v30  ;;  %1579 = vst [vmem:[#allocation2 + $0x129] sm:$0xff] %v1492_v36  ;;  %4408 = vrcp.f32 %v2619_v50 }
 0x23c   : > { %v1841_v59 = vadd.f32 %v1809_v61, %v1743_v54  ;;  %v1744_v3 = vadd.f32 %v1712_v31, %v1646_v21  ;;  %v2329_v26 = vadd.f32 %v2297_v10, %v2231_v12  ;;  %1580 = vst [vmem:[#allocation2 + $0x139] sm:$0xff] %v1493_v62  ;;  %v2133_v4 = vadd.f32 %v2101_v20, %v2035_v14 }
 0x23d   : > { %v2459_v53 = vmul.f32 %v5902_v48, %v2425_v15  ;;  %v1494_v49 = vmul.f32 %v4405_v38, %v6060_v1  ;;  %v1431_v27 = vadd.f32 1.0, %v4403_v19  ;;  %v1395_v16 = vmul.f32 1.442695, %v1336_v28 }
 0x23e   : > { %v6174_v29 = vadd.f32 %v6138_v41, %v1271_v33  ;;  %v2460_v58 = vmul.f32 %v5902_v48, %v2426_v40  ;;  %v2036_v30 = vadd.f32 %v2004_v42, %v1938_v18  ;;  %v1713_v32 = vmul.f32 %v5747_v56, %v1492_v36 }
 0x23f   : > { %v2005_v21 = vmul.f32 %v5801_v0, %v1492_v36  ;;  %v2298_v14 = vmul.f32 %v5812_v55, %v1492_v36  ;;  %1581 = vst [vmem:[#allocation2 + $0x141] sm:$0xff] %v1494_v49  ;;  %v1714_v38 = vmul.f32 %v5747_v56, %v1493_v62  ;;  %v2006_v1 = vmul.f32 %v5801_v0, %v1493_v62 }
 0x240   : > { %v1233_v22 = vpop.f32.mrf.mxu1  ;;  %v4407_v15 = vpop.eup %4406  ;;  %v6184_v31 = vmul.f32 %v5812_v55, %v1493_v62  ;;  %v1337_v10 = vsub.f32 0.0, %v6174_v29  ;;  %v1715_v50 = vmul.f32 %v5747_v56, %v1494_v49  ;;  %v6189_v63 = vmul.f32 %v5801_v0, %v1494_v49 }
 0x241   : > { %v1272_v57 = vmul.f32 %v6123_v5, %v1233_v22  ;;  %4410 = vrcp.f32 %v1431_v27  ;;  %v6194_v54 = vpop.eup %4408  ;;  %v6197_v33 = vmul.f32 %v5812_v55, %v1494_v49  ;;  %v6200_v45 = vadd.f32 %v5916_v23, %v2459_v53 }
 0x242   : > { %7079 = vst [vmem:[#allocation58_spill] sm:$0xff] %v6194_v54  ;;  %v1613_v17 = vld [vmem:[#allocation2 + $0x128] sm:$0xff]  ;;  %4412 = vpow2.f32 %v1395_v16  ;;  %v6203_v56 = vadd.f32 %v5916_v23, %v2460_v58  ;;  %v6208_v36 = vadd.f32 1.0, %v4407_v15  ;;  %v1397_v20 = vmul.f32 1.442695, %v1337_v10 }
 0x243   : > { %v6192_v51 = vadd.f32 %v6138_v41, %v1272_v57  ;;  %v1776_v6 = vld [vmem:[#allocation2 + $0x122] sm:$0xff]  ;;  %v1777_v28 = vld [vmem:[#allocation2 + $0x12a] sm:$0xff]  ;;  %v1647_v8 = vmul.f32 %v5737_v46, %v1613_v17  ;;  %v1907_v2 = vmul.f32 %v5787_v34, %v1613_v17  ;;  %v1614_v19 = vld [vmem:[#allocation2 + $0x138] sm:$0xff]  ;;  %v2200_v12 = vmul.f32 %v5795_v52, %v1613_v17 }
 0x244   : > { %v1810_v24 = vmul.f32 %v5765_v37, %v1776_v6  ;;  %v2102_v61 = vmul.f32 %v5776_v25, %v1776_v6  ;;  %v2395_v62 = vmul.f32 %v5885_v47, %v1776_v6  ;;  %v1811_v18 = vmul.f32 %v5765_v37, %v1777_v28 }
 0x245   : > { %v1745_v40 = vadd.f32 %v1713_v32, %v1647_v8  ;;  %v1939_v42 = vadd.f32 %v1907_v2, %v1841_v59  ;;  %v1338_v22 = vsub.f32 0.0, %v6192_v51  ;;  %v2103_v49 = vmul.f32 %v5776_v25, %v1777_v28 }
 0x246   : > { %v1842_v53 = vadd.f32 %v1810_v24, %v1744_v3  ;;  %v2232_v27 = vadd.f32 %v2200_v12, %v2133_v4  ;;  %v1648_v16 = vmul.f32 %v5737_v46, %v1614_v19  ;;  %v1615_v57 = vld [vmem:[#allocation2 + $0x140] sm:$0xff]  ;;  %v2396_v17 = vmul.f32 %v5885_v47, %v1777_v28 }
 0x247   : > { %v1778_v58 = vld [vmem:[#allocation2 + $0x13a] sm:$0xff]  ;;  %v4411_v15 = vpop.eup %4410  ;;  %v2037_v39 = vadd.f32 %v2005_v21, %v1939_v42  ;;  %v1908_v10 = vmul.f32 %v5787_v34, %v1614_v19  ;;  %v2201_v32 = vmul.f32 %v5795_v52, %v1614_v19  ;;  %v1843_v8 = vadd.f32 %v1811_v18, %v1745_v40  ;;  %v1779_v4 = vld [vmem:[#allocation2 + $0x142] sm:$0xff]  ;;  %v4022_v21 = vld [vmem:[%s6951_s7 + $0x10] sm:$0xff] }
 0x248   : > { %v4413_v59 = vpop.eup %4412  ;;  %v2134_v2 = vadd.f32 %v2102_v61, %v2036_v30  ;;  %v2427_v3 = vadd.f32 %v2395_v62, %v2329_v26  ;;  %v1649_v24 = vmul.f32 %v5737_v46, %v1615_v57  ;;  %v2330_v12 = vadd.f32 %v2298_v14, %v2232_v27  ;;  %2815 = vmatpush.bf16.msrb.mxu0 %v4022_v21 }
 0x249   : > { %v1236_v6 = vpop.f32.mrf.mxu1  ;;  %v1746_v44 = vadd.f32 %v1714_v38, %v1648_v16  ;;  %v1940_v54 = vadd.f32 %v1908_v10, %v1842_v53  ;;  %v1812_v7 = vmul.f32 %v5765_v37, %v1778_v58  ;;  %v2135_v28 = vadd.f32 %v2103_v49, %v2037_v39  ;;  %v4021_v38 = vld [vmem:[%s6951_s7 + $0x8] sm:$0xff]  ;;  %v6241_v53 = vld [vmem:[%s6949_s5 + $0x1] ss:$0 sm:$0xff] }
 0x24a   : > { %v1747_v42 = vadd.f32 %v1715_v50, %v1649_v24  ;;  %v1909_v19 = vmul.f32 %v5787_v34, %v1615_v57  ;;  %v2104_v40 = vmul.f32 %v5776_v25, %v1778_v58  ;;  %v2233_v26 = vadd.f32 %v2201_v32, %v2134_v2 }
 0x24b   : > { %v2038_v30 = vadd.f32 %v2006_v1, %v1940_v54  ;;  %v1813_v46 = vmul.f32 %v5765_v37, %v1779_v4  ;;  %v2202_v14 = vmul.f32 %v5795_v52, %v1615_v57  ;;  %v1495_v62 = vmul.f32 %v4411_v15, %v6086_v9 }
 0x24c   : > { %v1941_v61 = vadd.f32 %v1909_v19, %v1843_v8  ;;  %v1432_v39 = vadd.f32 1.0, %v4413_v59  ;;  %4414 = vpow2.f32 %v1397_v20  ;;  %v1844_v50 = vadd.f32 %v1812_v7, %v1746_v44  ;;  %2816 = vmatpush.bf16.msrb.mxu0 %v4021_v38  ;;  %v4020_v44 = vld [vmem:[%s6951_s7] sm:$0xff] }
 0x24d   : > { %v2105_v34 = vmul.f32 %v5776_v25, %v1779_v4  ;;  %v1399_v18 = vmul.f32 1.442695, %v1338_v22  ;;  %v1273_v1 = vmul.f32 %v6123_v5, %v1236_v6  ;;  %v2397_v37 = vmul.f32 %v5885_v47, %v1778_v58  ;;  %1582 = vst [vmem:[#allocation2 + $0x151] sm:$0xff] %v1495_v62  ;;  %v6282_v19 = vld [vmem:[%s6949_s5 + $0x3] ss:$0 sm:$0xff] }
 0x24e   : > { %4416 = vrcp.f32 %v1432_v39  ;;  %v6236_v52 = vadd.f32 %v1813_v46, %v1747_v42  ;;  %v2136_v54 = vadd.f32 %v2104_v40, %v2038_v30  ;;  %v1716_v9 = vmul.f32 %v6241_v53, %v1495_v62 }
 0x24f   : > { %4418 = vpow2.f32 %v1399_v18  ;;  %v6245_v25 = vadd.f32 %v6138_v41, %v1273_v1  ;;  %v2234_v20 = vadd.f32 %v2202_v14, %v2135_v28  ;;  %v2039_v49 = vadd.f32 %v6189_v63, %v1941_v61  ;;  %v6276_v28 = vld [vmem:[%s6949_s5] ss:$0 sm:$0xff] }
 0x250   : > { %v2331_v27 = vadd.f32 %v6184_v31, %v2233_v26  ;;  %v2398_v16 = vmul.f32 %v5885_v47, %v1779_v4  ;;  %v2428_v15 = vadd.f32 %v2396_v17, %v2330_v12  ;;  %v2461_v10 = vmul.f32 %v5902_v48, %v2427_v3  ;;  %2817 = vmatpush.bf16.msrb.mxu0 %v4020_v44 }
 0x251   : > { %v1238_v7 = vpop.f32.mrf.mxu1  ;;  %v1339_v57 = vsub.f32 0.0, %v6245_v25  ;;  %v2332_v58 = vadd.f32 %v6197_v33, %v2234_v20  ;;  %v2008_v6 = vmul.f32 %v5801_v0, %v1495_v62  ;;  %v6264_v17 = vadd.f32 %v2105_v34, %v2039_v49  ;;  %v6299_v34 = vld [vmem:[%s6949_s5 + $0x4] ss:$0 sm:$0xff]  ;;  %v2273_v49 = vld [vmem:[#allocation2 + $0x199] sm:$0xff] }
 0x252   : > { %v1274_v22 = vmul.f32 %v6123_v5, %v1238_v7  ;;  %v4415_v32 = vpop.eup %4414  ;;  %v2301_v5 = vmul.f32 %v5812_v55, %v1495_v62  ;;  %v2429_v63 = vadd.f32 %v2397_v37, %v2331_v27  ;;  %v2462_v2 = vmul.f32 %v5902_v48, %v2428_v15  ;;  %v4650_v7 = vld [vmem:[#allocation2] sm:$0xff] }
 0x253   : > { %v1433_v8 = vadd.f32 1.0, %v4415_v32  ;;  %v1401_v31 = vmul.f32 1.442695, %v1339_v57  ;;  %v2430_v47 = vadd.f32 %v2398_v16, %v2332_v58  ;;  %v2525_v0 = vsub.f32 0.0, %v6200_v45  ;;  %v2274_v27 = vld [vmem:[#allocation2 + $0x1a1] sm:$0xff] }
 0x254   : > { %v6259_v59 = vadd.f32 %v6138_v41, %v1274_v22  ;;  %v4417_v24 = vpop.eup %4416  ;;  %v2463_v3 = vmul.f32 %v5902_v48, %v2429_v63  ;;  %v1616_v4 = vld [vmem:[#allocation2 + $0x150] sm:$0xff]  ;;  %v6271_v21 = vadd.f32 %v5916_v23, %v2461_v10  ;;  %v6292_v46 = vadd.f32 %v5916_v23, %v2462_v2  ;;  %v6315_v16 = vld [vmem:[%s6949_s5 + $0x7] ss:$0 sm:$0xff] }
 0x255   : > { %v4419_v41 = vpop.eup %4418  ;;  %v1496_v55 = vmul.f32 %v4417_v24, %v6141_v11  ;;  %4420 = vrcp.f32 %v1433_v8  ;;  %v2464_v12 = vmul.f32 %v5902_v48, %v2430_v47  ;;  %v1650_v42 = vmul.f32 %v6276_v28, %v1616_v4  ;;  %v6288_v48 = vld [vmem:[%s6949_s5 + $0x6] ss:$0 sm:$0xff] }
 0x256   : > { %v1340_v33 = vsub.f32 0.0, %v6259_v59  ;;  %v1910_v11 = vmul.f32 %v6282_v19, %v1616_v4  ;;  %v2203_v40 = vmul.f32 %v6288_v48, %v1616_v4  ;;  %v1434_v30 = vadd.f32 1.0, %v4419_v41  ;;  %v6338_v4 = vld [vmem:[%s6949_s5 + $0x2] ss:$0 sm:$0xff] }
 0x257   : > { %1583 = vst [vmem:[#allocation2 + $0x159] sm:$0xff] %v1496_v55  ;;  %4422 = vpow2.f32 %v1401_v31  ;;  %v2526_v14 = vsub.f32 0.0, %v6203_v56  ;;  %v2575_v62 = vmul.f32 1.442695, %v2525_v0  ;;  %v1717_v39 = vmul.f32 %v6241_v53, %v1496_v55 }
 0x258   : > { %v1403_v26 = vmul.f32 1.442695, %v1340_v33  ;;  %4424 = vrcp.f32 %v1434_v30  ;;  %v1942_v38 = vadd.f32 %v1910_v11, %v1844_v50  ;;  %v2235_v61 = vadd.f32 %v2203_v40, %v2136_v54 }
 0x259   : > { %v2009_v18 = vmul.f32 %v6299_v34, %v1496_v55  ;;  %v6303_v1 = vadd.f32 %v5916_v23, %v2463_v3  ;;  %v1748_v37 = vadd.f32 %v1716_v9, %v1650_v42  ;;  %v6306_v44 = vmul.f32 %v4650_v7, %v6288_v48 }
 0x25a   : > { %4426 = vpow2.f32 %v1403_v26  ;;  %v6309_v50 = vadd.f32 %v5916_v23, %v2464_v12  ;;  %v2527_v54 = vsub.f32 0.0, %v6271_v21  ;;  %v2040_v22 = vadd.f32 %v2008_v6, %v1942_v38 }
 0x25b   : > { %v4421_v20 = vpop.eup %4420  ;;  %v6318_v9 = vmul.f32 %v6315_v16, %v1496_v55  ;;  %v2528_v57 = vsub.f32 0.0, %v6292_v46  ;;  %v2577_v58 = vmul.f32 1.442695, %v2526_v14  ;;  %v2333_v15 = vadd.f32 %v2301_v5, %v2235_v61 }
 0x25c   : > { %v1497_v23 = vmul.f32 %v4421_v20, %v6174_v29  ;;  %v2529_v10 = vsub.f32 0.0, %v6303_v1  ;;  %4428 = vpow2.f32 %v2575_v62  ;;  %v6324_v6 = vmul.f32 %v6315_v16, %v2273_v49  ;;  %v2372_v20 = vld [vmem:[#allocation2 + $0x1a2] sm:$0xff] }
 0x25d   : > { %v4423_v32 = vpop.eup %4422  ;;  %v6327_v63 = vmul.f32 %v6315_v16, %v2274_v27  ;;  %v2530_v8 = vsub.f32 0.0, %v6309_v50  ;;  %v2579_v31 = vmul.f32 1.442695, %v2527_v54  ;;  %4430 = vpow2.f32 %v2577_v58  ;;  %v2371_v54 = vld [vmem:[#allocation2 + $0x19a] sm:$0xff] }
 0x25e   : > { %v4425_v47 = vpop.eup %4424  ;;  %v1617_v2 = vld [vmem:[#allocation2 + $0x158] sm:$0xff]  ;;  %1584 = vst [vmem:[#allocation2 + $0x169] sm:$0xff] %v1497_v23  ;;  %v1435_v33 = vadd.f32 1.0, %v4423_v32  ;;  %v2581_v29 = vmul.f32 1.442695, %v2528_v57  ;;  %v6332_v5 = vmul.f32 %v6150_v60, %v6012_v43  ;;  %v1718_v43 = vmul.f32 %v6241_v53, %v1497_v23 }
 0x25f   : > { %v1780_v24 = vld [vmem:[#allocation2 + $0x152] sm:$0xff]  ;;  %v1651_v0 = vmul.f32 %v6276_v28, %v1617_v2  ;;  %v1781_v41 = vld [vmem:[#allocation2 + $0x15a] sm:$0xff]  ;;  %v1911_v12 = vmul.f32 %v6282_v19, %v1617_v2  ;;  %v1498_v42 = vmul.f32 %v4425_v47, %v6192_v51  ;;  %v6347_v60 = vld [vmem:[%s6949_s5 + $0x5] ss:$0 sm:$0xff]  ;;  %v2010_v14 = vmul.f32 %v6299_v34, %v1497_v23 }
 0x260   : > { %v4427_v3 = vpop.eup %4426  ;;  %v1814_v55 = vmul.f32 %v6338_v4, %v1780_v24  ;;  %4432 = vrcp.f32 %v1435_v33  ;;  %v2106_v40 = vmul.f32 %v6347_v60, %v1780_v24  ;;  %v2303_v38 = vmul.f32 %v6315_v16, %v1497_v23 }
 0x261   : > { %v1436_v11 = vadd.f32 1.0, %v4427_v3  ;;  %1585 = vst [vmem:[#allocation2 + $0x171] sm:$0xff] %v1498_v42  ;;  %v1749_v30 = vadd.f32 %v1717_v39, %v1651_v0  ;;  %v1943_v26 = vadd.f32 %v1911_v12, %v6236_v52  ;;  %v1719_v61 = vmul.f32 %v6241_v53, %v1498_v42  ;;  %v6366_v53 = vld [vmem:[%s6949_s5 + $0x8] ss:$0 sm:$0xff] }
 0x262   : > { %v6353_v51 = vpop.eup %4428  ;;  %v1815_v62 = vmul.f32 %v6338_v4, %v1781_v41  ;;  %v1846_v7 = vadd.f32 %v1814_v55, %v1748_v37  ;;  %v2011_v49 = vmul.f32 %v6299_v34, %v1498_v42  ;;  %v2107_v39 = vmul.f32 %v6347_v60, %v1781_v41 }
 0x263   : > { %4434 = vrcp.f32 %v1436_v11  ;;  %v2041_v27 = vadd.f32 %v2009_v18, %v1943_v26  ;;  %v2204_v52 = vmul.f32 %v6288_v48, %v1617_v2  ;;  %v6360_v57 = vpop.eup %4430  ;;  %v2138_v23 = vadd.f32 %v2106_v40, %v2040_v22 }
 0x264   : > { %v1847_v58 = vadd.f32 %v1815_v62, %v1749_v30  ;;  %v2304_v32 = vmul.f32 %v6315_v16, %v1498_v42  ;;  %v2399_v37 = vmul.f32 %v6366_v53, %v1780_v24  ;;  %v2400_v33 = vmul.f32 %v6366_v53, %v1781_v41 }
 0x265   : > { %v1618_v47 = vld [vmem:[#allocation2 + $0x168] sm:$0xff]  ;;  %v2236_v18 = vadd.f32 %v2204_v52, %v6264_v17  ;;  %v6372_v2 = vmul.f32 %v6366_v53, %v2371_v54  ;;  %v6375_v3 = vmul.f32 %v6366_v53, %v2372_v20  ;;  %v2139_v11 = vadd.f32 %v2107_v39, %v2041_v27 }
 0x266   : > { %v4433_v22 = vpop.eup %4432  ;;  %v1652_v0 = vmul.f32 %v6276_v28, %v1618_v47  ;;  %v1912_v55 = vmul.f32 %v6282_v19, %v1618_v47  ;;  %v2205_v12 = vmul.f32 %v6288_v48, %v1618_v47  ;;  %v2431_v42 = vadd.f32 %v2399_v37, %v2333_v15 }
 0x267   : > { %v1499_v24 = vmul.f32 %v4433_v22, %v6245_v25  ;;  %4436 = vpow2.f32 %v2579_v31  ;;  %v2583_v17 = vmul.f32 1.442695, %v2529_v10  ;;  %v2334_v54 = vadd.f32 %v6318_v9, %v2236_v18  ;;  %v6392_v9 = vld [vmem:[%s6950_s6] ss:$0 sm:$0xff] }
 0x268   : > { %v1619_v40 = vld [vmem:[#allocation2 + $0x170] sm:$0xff]  ;;  %v1944_v62 = vadd.f32 %v1912_v55, %v1846_v7  ;;  %4438 = vpow2.f32 %v2581_v29  ;;  %v2585_v20 = vmul.f32 1.442695, %v2530_v8  ;;  %v2237_v31 = vadd.f32 %v2205_v12, %v2138_v23 }
 0x269   : > { %v4435_v41 = vpop.eup %4434  ;;  %v1782_v30 = vld [vmem:[#allocation2 + $0x16a] sm:$0xff]  ;;  %v1783_v26 = vld [vmem:[#allocation2 + $0x172] sm:$0xff]  ;;  %1586 = vst [vmem:[#allocation2 + $0x181] sm:$0xff] %v1499_v24  ;;  %v1653_v15 = vmul.f32 %v6276_v28, %v1619_v40  ;;  %v1750_v10 = vadd.f32 %v1718_v43, %v1652_v0  ;;  %v1913_v27 = vmul.f32 %v6282_v19, %v1619_v40  ;;  %v2465_v8 = vmul.f32 %v6392_v9, %v2431_v42 }
 0x26a   : > { %v1500_v52 = vmul.f32 %v4435_v41, %v6259_v59  ;;  %v1816_v25 = vmul.f32 %v6338_v4, %v1782_v30  ;;  %v2108_v39 = vmul.f32 %v6347_v60, %v1782_v30  ;;  %v1817_v59 = vmul.f32 %v6338_v4, %v1783_v26 }
 0x26b   : > { %v1751_v29 = vadd.f32 %v1719_v61, %v1653_v15  ;;  %v2012_v28 = vmul.f32 %v6299_v34, %v1499_v24  ;;  %v2042_v7 = vadd.f32 %v2010_v14, %v1944_v62  ;;  %v1945_v43 = vadd.f32 %v1913_v27, %v1847_v58 }
 0x26c   : > { %1587 = vst [vmem:[#allocation2 + $0x189] sm:$0xff] %v1500_v52  ;;  %v1848_v23 = vadd.f32 %v1816_v25, %v1750_v10  ;;  %v2013_v37 = vmul.f32 %v6299_v34, %v1500_v52  ;;  %v2206_v47 = vmul.f32 %v6288_v48, %v1619_v40  ;;  %v2109_v22 = vmul.f32 %v6347_v60, %v1783_v26  ;;  %v6410_v40 = vld [vmem:[%s6950_s6 + $0x1] ss:$0 sm:$0xff] }
 0x26d   : > { %v6399_v18 = vpop.eup %4436  ;;  %v2140_v0 = vadd.f32 %v2108_v39, %v2042_v7  ;;  %v2335_v55 = vadd.f32 %v2303_v38, %v2237_v31  ;;  %v2401_v12 = vmul.f32 %v6366_v53, %v1782_v30  ;;  %v2043_v4 = vadd.f32 %v2011_v49, %v1945_v43 }
 0x26e   : > { %v6403_v61 = vpop.eup %4438  ;;  %v2238_v42 = vadd.f32 %v2206_v47, %v2139_v11  ;;  %v2305_v14 = vmul.f32 %v6315_v16, %v1499_v24  ;;  %v2432_v41 = vadd.f32 %v2400_v33, %v2334_v54  ;;  %v1849_v58 = vadd.f32 %v1817_v59, %v1751_v29 }
 0x26f   : > { %v2306_v34 = vmul.f32 %v6315_v16, %v1500_v52  ;;  %v2433_v62 = vadd.f32 %v2401_v12, %v2335_v55  ;;  %v6413_v38 = vadd.f32 %v6410_v40, %v2465_v8  ;;  %v2402_v49 = vmul.f32 %v6366_v53, %v1783_v26 }
 0x270   : > { %v1880_v30 = vld [vmem:[#allocation2 + $0x180] sm:$0xff]  ;;  %v2336_v15 = vadd.f32 %v2304_v32, %v2238_v42  ;;  %v2466_v11 = vmul.f32 %v6392_v9, %v2432_v41  ;;  %4440 = vpow2.f32 %v2583_v17  ;;  %v2621_v54 = vadd.f32 1.0, %v6353_v51 }
 0x271   : > { %v1914_v33 = vmul.f32 %v6282_v19, %v1880_v30  ;;  %v2207_v16 = vmul.f32 %v6288_v48, %v1880_v30  ;;  %v2467_v24 = vmul.f32 %v6392_v9, %v2433_v62  ;;  %v2141_v10 = vadd.f32 %v2109_v22, %v2043_v4 }
 0x272   : > { %v2434_v27 = vadd.f32 %v2402_v49, %v2336_v15  ;;  %v6422_v32 = vadd.f32 %v6410_v40, %v2466_v11  ;;  %v2531_v26 = vsub.f32 0.0, %v6413_v38  ;;  %4442 = vpow2.f32 %v2585_v20 }
 0x273   : > { %v1881_v52 = vld [vmem:[#allocation2 + $0x188] sm:$0xff]  ;;  %v1946_v39 = vadd.f32 %v1914_v33, %v1848_v23  ;;  %v2239_v59 = vadd.f32 %v2207_v16, %v2140_v0  ;;  %v6432_v55 = vadd.f32 %v6410_v40, %v2467_v24  ;;  %v2622_v16 = vadd.f32 1.0, %v6360_v57 }
 0x274   : > { %v2076_v25 = vld [vmem:[#allocation2 + $0x182] sm:$0xff]  ;;  %v2077_v31 = vld [vmem:[#allocation2 + $0x18a] sm:$0xff]  ;;  %v1915_v17 = vmul.f32 %v6282_v19, %v1881_v52  ;;  %v2208_v51 = vmul.f32 %v6288_v48, %v1881_v52  ;;  %v2468_v22 = vmul.f32 %v6392_v9, %v2434_v27  ;;  %v2532_v4 = vsub.f32 0.0, %v6422_v32 }
 0x275   : > { %v2110_v8 = vmul.f32 %v6347_v60, %v2076_v25  ;;  %v2111_v29 = vmul.f32 %v6347_v60, %v2077_v31  ;;  %v2403_v7 = vmul.f32 %v6366_v53, %v2076_v25  ;;  %v2044_v47 = vadd.f32 %v2012_v28, %v1946_v39 }
 0x276   : > { %v1947_v43 = vadd.f32 %v1915_v17, %v1849_v58  ;;  %v4441_v12 = vpop.eup %4440  ;;  %v2240_v19 = vadd.f32 %v2208_v51, %v2141_v10  ;;  %v2337_v23 = vadd.f32 %v2305_v14, %v2239_v59  ;;  %v2587_v20 = vmul.f32 1.442695, %v2531_v26  ;;  %v7082_v51 = vld [vmem:[#allocation57_spill] sm:$0xff] }
 0x277   : > { %v2142_v60 = vadd.f32 %v2110_v8, %v2044_v47  ;;  %v6436_v48 = vadd.f32 %v6410_v40, %v2468_v22  ;;  %v2533_v0 = vsub.f32 0.0, %v6432_v55  ;;  %v2404_v28 = vmul.f32 %v6366_v53, %v2077_v31 }
 0x278   : > { %v2045_v42 = vadd.f32 %v2013_v37, %v1947_v43  ;;  %v2338_v41 = vadd.f32 %v2306_v34, %v2240_v19  ;;  %v2435_v58 = vadd.f32 %v2403_v7, %v2337_v23  ;;  %v2589_v62 = vmul.f32 1.442695, %v2532_v4  ;;  %v4443_v30 = vpop.eup %4442 }
 0x279   : > { %v2241_v49 = vadd.f32 %v6306_v44, %v2142_v60  ;;  %v2534_v14 = vsub.f32 0.0, %v6436_v48  ;;  %v2591_v11 = vmul.f32 1.442695, %v2533_v0  ;;  %4444 = vpow2.f32 %v2587_v20 }
 0x27a   : > { %v2143_v15 = vadd.f32 %v2111_v29, %v2045_v42  ;;  %v2436_v33 = vadd.f32 %v2404_v28, %v2338_v41  ;;  %v2469_v37 = vmul.f32 %v6392_v9, %v2435_v58  ;;  %4446 = vpow2.f32 %v2589_v62  ;;  %v7083_v41 = vld [vmem:[#allocation56_spill] sm:$0xff] }
 0x27b   : > { %v2339_v34 = vadd.f32 %v6324_v6, %v2241_v49  ;;  %v2593_v53 = vmul.f32 1.442695, %v2534_v14  ;;  %4448 = vpow2.f32 %v2591_v11  ;;  %v2623_v31 = vadd.f32 1.0, %v6399_v18 }
 0x27c   : > { %v2242_v24 = vadd.f32 %v6306_v44, %v2143_v15  ;;  %v2470_v52 = vmul.f32 %v6392_v9, %v2436_v33  ;;  %v6448_v25 = vadd.f32 %v6410_v40, %v2469_v37  ;;  %v2624_v57 = vadd.f32 1.0, %v6403_v61 }
 0x27d   : > { %v2437_v27 = vadd.f32 %v6372_v2, %v2339_v34  ;;  %4450 = vpow2.f32 %v2593_v53  ;;  %v2711_v26 = vadd.f32 %v6096_v35, %v6118_v13  ;;  %v7081_v2 = vld [vmem:[#allocation58_spill] sm:$0xff]  ;;  %v2626_v47 = vadd.f32 1.0, %v4443_v30 }
 0x27e   : > { %v2340_v10 = vadd.f32 %v6327_v63, %v2242_v24  ;;  %v6455_v44 = vadd.f32 %v6410_v40, %v2470_v52  ;;  %v2535_v6 = vsub.f32 0.0, %v6448_v25  ;;  %4452 = vrcp.f32 %v6208_v36  ;;  %v7080_v63 = vld [vmem:[#allocation54_spill] sm:$0xff] }
 0x27f   : > { %v2471_v18 = vmul.f32 %v6392_v9, %v2437_v27  ;;  %4454 = vrcp.f32 %v2621_v54  ;;  %v6465_v39 = vmul.f32 %v7081_v2, %v7080_v63  ;;  %v4445_v61 = vpop.eup %4444  ;;  %v2712_v59 = vadd.f32 %v2711_v26, %v7082_v51 }
 0x280   : > { %v2438_v17 = vadd.f32 %v6375_v3, %v2340_v10  ;;  %v2536_v8 = vsub.f32 0.0, %v6455_v44  ;;  %v2595_v29 = vmul.f32 1.442695, %v2535_v6  ;;  %4456 = vrcp.f32 %v2622_v16  ;;  %v4447_v36 = vpop.eup %4446 }
 0x281   : > { %v6471_v35 = vadd.f32 %v6410_v40, %v2471_v18  ;;  %v2625_v3 = vadd.f32 1.0, %v4441_v12  ;;  %4458 = vrcp.f32 %v2623_v31  ;;  %v4449_v54 = vpop.eup %4448  ;;  %v2713_v22 = vadd.f32 %v2712_v59, %v6332_v5 }
 0x282   : > { %v2472_v7 = vmul.f32 %v6392_v9, %v2438_v17  ;;  %4460 = vpow2.f32 %v2595_v29  ;;  %v2597_v43 = vmul.f32 1.442695, %v2536_v8  ;;  %v2627_v9 = vadd.f32 1.0, %v4445_v61 }
 0x283   : > { %v4451_v19 = vpop.eup %4450  ;;  %v2537_v4 = vsub.f32 0.0, %v6471_v35  ;;  %4462 = vrcp.f32 %v2624_v57  ;;  %v2714_v42 = vadd.f32 %v2713_v22, %v6465_v39  ;;  %v2628_v62 = vadd.f32 1.0, %v4447_v36 }
 0x284   : > { %v6475_v23 = vadd.f32 %v6410_v40, %v2472_v7  ;;  %v4453_v20 = vpop.eup %4452  ;;  %4464 = vpow2.f32 %v2597_v43  ;;  %v2629_v33 = vadd.f32 1.0, %v4449_v54  ;;  %v2630_v34 = vadd.f32 1.0, %v4451_v19 }
 0x285   : > { %v4455_v12 = vpop.eup %4454  ;;  %v2599_v0 = vmul.f32 1.442695, %v2537_v4  ;;  %4466 = vrcp.f32 %v2625_v3  ;;  %v6481_v28 = vmul.f32 %v4453_v20, %v7083_v41  ;;  %v4723_v54 = vmov 256.0  }
 0x286   : > { %v2538_v60 = vsub.f32 0.0, %v6475_v23  ;;  %v4457_v58 = vpop.eup %4456  ;;  %4468 = vrcp.f32 %v2626_v47  ;;  %v6484_v40 = vmul.f32 %v4455_v12, %v6200_v45 }
 0x287   : > { %v4459_v30 = vpop.eup %4458  ;;  %4470 = vpow2.f32 %v2599_v0  ;;  %v6487_v49 = vmul.f32 %v4457_v58, %v6203_v56  ;;  %v2715_v14 = vadd.f32 %v2714_v42, %v6481_v28 }
 0x288   : > { %v2601_v15 = vmul.f32 1.442695, %v2538_v60  ;;  %v4461_v11 = vpop.eup %4460  ;;  %4472 = vrcp.f32 %v2627_v9  ;;  %v6491_v16 = vmul.f32 %v4459_v30, %v6271_v21 }
 0x289   : > { %v4463_v37 = vpop.eup %4462  ;;  %v2716_v24 = vadd.f32 %v2715_v14, %v6484_v40  ;;  %v2631_v10 = vadd.f32 1.0, %v4461_v11 }
 0x28a   : > { %4474 = vpow2.f32 %v2601_v15  ;;  %v4465_v45 = vpop.eup %4464  ;;  %v6495_v52 = vmul.f32 %v4463_v37, %v6292_v46 }
 0x28b   : > { %4476 = vrcp.f32 %v2628_v62  ;;  %v4467_v53 = vpop.eup %4466  ;;  %v2717_v56 = vadd.f32 %v2716_v24, %v6487_v49  ;;  %v2632_v26 = vadd.f32 1.0, %v4465_v45 }
 0x28c   : > { %v4469_v31 = vpop.eup %4468  ;;  %4478 = vrcp.f32 %v2629_v33  ;;  %v6499_v57 = vmul.f32 %v4467_v53, %v6303_v1 }
 0x28d   : > { %v4471_v27 = vpop.eup %4470  ;;  %v2718_v21 = vadd.f32 %v2717_v56, %v6491_v16  ;;  %4480 = vrcp.f32 %v2630_v34  ;;  %v6503_v18 = vmul.f32 %v4469_v31, %v6309_v50  ;;  %v2830_v34 = vld [vmem:[%s6953_s9] sm:$0xf]  ;;  %v4035_v56 = vld [vmem:[%s6955_s11 + $0x38] sm:$0xff] }
 0x28e   : > { %v4473_v6 = vpop.eup %4472  ;;  %v2633_v2 = vadd.f32 1.0, %v4471_v27  ;;  %4482 = vrcp.f32 %v2631_v10  ;;  %v2838_v53 = vsel %vm2836_vm5, %v2830_v34, 0  ;;  %2971 = vmatpush.bf16.msra.mxu3 %v4035_v56  ;;  %v2761_v31 = vld [vmem:[%s6952_s8] sm:$0x1]  ;;  %v7090_v56 = vld [vmem:[#allocation48_spill] sm:$0xff] }
 0x28f   : > { %v2719_v46 = vadd.f32 %v2718_v21, %v6495_v52  ;;  %v6507_v61 = vmul.f32 %v4473_v6, %v6413_v38  ;;  %4484 = vrcp.f32 %v2632_v26  ;;  %2847 = vmatpush.bf16.msra.mxu2 %v2838_v53 }
 0x290   : > { %v4475_v17 = vpop.eup %4474  ;;  %4486 = vrcp.f32 %v2633_v2 }
 0x291   : > { %v4477_v63 = vpop.eup %4476  ;;  %v2720_v1 = vadd.f32 %v2719_v46, %v6499_v57  ;;  %v2634_v29 = vadd.f32 1.0, %v4475_v17  ;;  %4488 = vrcp.f32 %v4723_v54 }
 0x292   : > { %v4479_v8 = vpop.eup %4478  ;;  %v6511_v59 = vmul.f32 %v4477_v63, %v6422_v32 }
 0x293   : > { %v2721_v36 = vadd.f32 %v2720_v1, %v6503_v18  ;;  %v4481_v50 = vpop.eup %4480  ;;  %v6515_v7 = vmul.f32 %v4479_v8, %v6432_v55  ;;  %4490 = vrcp.f32 %v2634_v29  ;;  %v4034_v8 = vld [vmem:[%s6955_s11 + $0x30] sm:$0xff]  ;;  %v4033_v29 = vld [vmem:[%s6955_s11 + $0x28] sm:$0xff] }
 0x294   : > { %v4483_v38 = vpop.eup %4482  ;;  %v6519_v43 = vmul.f32 %v4481_v50, %v6436_v48  ;;  %2972 = vmatpush.bf16.msra.mxu3 %v4034_v8  ;;  %v2831_v50 = vld [vmem:[%s6954_s10] sm:$0x1]  ;;  %v7095_v8 = vld [vmem:[#allocation53_spill] sm:$0xff] }
 0x295   : > { %v2722_v3 = vadd.f32 %v2721_v36, %v6507_v61  ;;  %v4485_v32 = vpop.eup %4484  ;;  %v6523_v22 = vmul.f32 %v4483_v38, %v6448_v25  ;;  %v4032_v36 = vld [vmem:[%s6955_s11 + $0x20] sm:$0xff]  ;;  %v4031_v38 = vld [vmem:[%s6955_s11 + $0x18] sm:$0xff] }
 0x296   : > { %v4487_v4 = vpop.eup %4486  ;;  %v6527_v20 = vmul.f32 %v4485_v32, %v6455_v44 }
 0x297   : > { %v2723_v47 = vadd.f32 %v2722_v3, %v6511_v59  ;;  %v4489_v55 = vpop.eup %4488  ;;  %v6531_v12 = vmul.f32 %v4487_v4, %v6471_v35 }
 0x298   : > { %v2737_v60 = vmul.f32 256.0, %v4489_v55  ;;  %vm2741_vm4 = vweird.f32 %v4489_v55  ;;  %2973 = vmatpush.bf16.msra.mxu3 %v4033_v29 }
 0x299   : > { %v2724_v19 = vadd.f32 %v2723_v47, %v6515_v7  ;;  %v4491_v42 = vpop.eup %4490 }
 0x29a   : > { %v6535_v0 = vmul.f32 %v4491_v42, %v6475_v23  ;;  %v2738_v58 = vsub.f32 1.0, %v2737_v60  ;;  %v4028_v42 = vld [vmem:[%s6955_s11] sm:$0xff] }
 0x29b   : > { %v2725_v9 = vadd.f32 %v2724_v19, %v6519_v43  ;;  %v4030_v19 = vld [vmem:[%s6955_s11 + $0x10] sm:$0xff] }
 0x29c   : > { %v2739_v30 = vmul.f32 %v4489_v55, %v2738_v58  ;;  %2974 = vmatpush.bf16.msra.mxu3 %v4032_v36 }
 0x29d   : > { %v2726_v48 = vadd.f32 %v2725_v9, %v6523_v22 }
 0x29e   : > { %v2740_v11 = vadd.f32 %v4489_v55, %v2739_v30 }
 0x29f   : > { %v2727_v25 = vadd.f32 %v2726_v48, %v6527_v20 }
 0x2a0   : > { %v6540_v37 = vsel %vm2741_vm4, %v4489_v55, %v2740_v11  ;;  %2975 = vmatpush.bf16.msra.mxu3 %v4031_v38  ;;  %v4029_v55 = vld [vmem:[%s6955_s11 + $0x8] sm:$0xff] }
 0x2a1   : > { %v2728_v41 = vadd.f32 %v2727_v25, %v6531_v12  ;;  %v7087_v11 = vld [vmem:[#allocation45_spill] sm:$0xff] }
 0x2a3   : > { %v2729_v44 = vadd.f32 %v2728_v41, %v6535_v0  ;;  %v7084_v41 = vld [vmem:[#allocation43_spill] sm:$0xff] }
 0x2a4   : > { %2976 = vmatpush.bf16.msra.mxu3 %v4030_v19 }
 0x2a5   : > { %v2730_v62 = vrot.slane %v2729_v44, 4 }
 0x2a7   : > { %v2731_v15 = vadd.f32 %v2730_v62, %v2729_v44  ;;  %v7085_v44 = vld [vmem:[#allocation42_spill] sm:$0xff] }
 0x2a8   : > { %2977 = vmatpush.bf16.msra.mxu3 %v4029_v55 }
 0x2a9   : > { %v2732_v14 = vrot.slane %v2731_v15, 2 }
 0x2ab   : > { %v2733_v35 = vadd.f32 %v2732_v14, %v2731_v15  ;;  %v7086_v15 = vld [vmem:[#allocation44_spill] sm:$0xff] }
 0x2ac   : > { %2978 = vmatpush.bf16.msra.mxu3 %v4028_v42 }
 0x2ad   : > { %v2734_v33 = vrot.slane %v2733_v35, 1 }
 0x2af   : > { %v2735_v24 = vadd.f32 %v2734_v33, %v2733_v35 }
 0x2b1   : > { %v2743_v23 = vmul.f32 %v6540_v37, %v2735_v24  ;;  %v7088_v24 = vld [vmem:[#allocation46_spill] sm:$0xff] }
 0x2b3   : > { %v2744_v45 = vpack.c.bf16 %v2743_v23, %v2743_v23 }
 0x2b5   : > { %2818 = vmatmul.bf16.vlgmr.msrb.gmra.mxu0 %v2744_v45  ;;  %v7089_v45 = vld [vmem:[#allocation47_spill] sm:$0xff] }
 0x332   : > { %v2819_v10 = vpop.f32.mrf.mxu0 }
 0x333   : > { %v2820_v27 = vadd.f32 %v2819_v10, %v2761_v31  ;;  %v7091_v10 = vld [vmem:[#allocation49_spill] sm:$0xff] }
 0x335   : > { %v2823_v21 = vsub.f32 0.0, %v2820_v27 }
 0x337   : > { %v2824_v6 = vmul.f32 1.442695, %v2823_v21 }
 0x339   : > { %4492 = vpow2.f32 %v2824_v6  ;;  %v7092_v6 = vld [vmem:[#allocation50_spill] sm:$0xff] }
 0x33a   : > { %v2821_v26 = vpop.f32.mrf.mxu0 }
 0x33f   : > { %v4493_v17 = vpop.eup %4492 }
 0x340   : > { %v2826_v46 = vadd.f32 1.0, %v4493_v17  ;;  %v7093_v17 = vld [vmem:[#allocation51_spill] sm:$0xff] }
 0x342   : > { %4494 = vrcp.f32 %v2826_v46 }
 0x348   : > { %v4495_v63 = vpop.eup %4494 }
 0x349   : > { %v2828_v2 = vmul.f32 %v4495_v63, %v2820_v27 }
 0x34b   : > { %v2829_v1 = vpack.c.bf16 %v2828_v2, %v2828_v2  ;;  %v7094_v2 = vld [vmem:[#allocation52_spill] sm:$0xff] }
 0x34d   : > { %3913 = vmatmul.msk.bf16.vlgmr.msra.gmra.mxu2 %vm2832_vm6, %v2829_v1 }
 0x3d0   : > { %v2849_v3 = vpop.f32.mrf.mxu2 }
 0x3d1   : > { %v2850_v54 = vadd.f32 %v2849_v3, %v2831_v50  ;;  %v7096_v50 = vld [vmem:[#allocation55_spill] sm:$0xff] }
 0x3d3   : > { %v2853_v47 = vsub.f32 0.0, %v2850_v54 }
 0x3d5   : > { %v2854_v32 = vmul.f32 1.442695, %v2853_v47  ;;  %v4036_v47 = vld [vmem:[%s6957_s13] sm:$0xff] }
 0x3d6   : > { %3239 = vmatpush.bf16.msrb.mxu2 %v4036_v47 }
 0x3d7   : > { %4496 = vpow2.f32 %v2854_v32 }
 0x3d8   : > { %v2851_v4 = vpop.f32.mrf.mxu2 }
 0x3dd   : > { %v4497_v9 = vpop.eup %4496 }
 0x3de   : > { %v2856_v48 = vadd.f32 1.0, %v4497_v9 }
 0x3e0   : > { %4498 = vrcp.f32 %v2856_v48  ;;  %v6620_v48 = vld [vmem:[%s6956_s12] ss:$0 sm:$0xff] }
 0x3e6   : > { %v4499_v60 = vpop.eup %4498 }
 0x3e7   : > { %v6576_v25 = vperm.slane %v4499_v60, 0 }
 0x3e9   : > { %v2859_v58 = vmul.f32 %v6576_v25, %v7084_v41  ;;  %v2860_v62 = vmul.f32 %v6576_v25, %v7085_v44  ;;  %v2861_v14 = vmul.f32 %v6576_v25, %v7086_v15  ;;  %v2862_v35 = vmul.f32 %v6576_v25, %v7087_v11 }
 0x3ea   : > { %v2863_v23 = vmul.f32 %v6576_v25, %v7088_v24  ;;  %v2864_v34 = vmul.f32 %v6576_v25, %v7089_v45  ;;  %v2865_v31 = vmul.f32 %v6576_v25, %v7090_v56  ;;  %v2866_v27 = vmul.f32 %v6576_v25, %v7091_v10 }
 0x3eb   : > { %v2891_v30 = vpack.c.bf16 %v2860_v62, %v2859_v58  ;;  %v2892_v33 = vpack.c.bf16 %v2862_v35, %v2861_v14  ;;  %v2867_v26 = vmul.f32 %v6576_v25, %v7092_v6  ;;  %v2868_v46 = vmul.f32 %v6576_v25, %v7093_v17  ;;  %v7098_v14 = vld [vmem:[#allocation11_spill] sm:$0xff] }
 0x3ec   : > { %v2893_v53 = vpack.c.bf16 %v2864_v34, %v2863_v23  ;;  %v2894_v21 = vpack.c.bf16 %v2866_v27, %v2865_v31  ;;  %v2869_v1 = vmul.f32 %v6576_v25, %v7094_v2  ;;  %v2870_v29 = vmul.f32 %v6576_v25, %v7095_v8  ;;  %v7099_v31 = vld [vmem:[#allocation12_spill] sm:$0xff]  ;;  %v7100_v27 = vld [vmem:[#allocation13_spill] sm:$0xff] }
 0x3ed   : > { %2979 = vmatmul.bf16.vlgmr.msra.gmra.mxu3 %v2891_v30  ;;  %v2895_v63 = vpack.c.bf16 %v2868_v46, %v2867_v26  ;;  %v2871_v3 = vmul.f32 %v6576_v25, %v7096_v50  ;;  %v2872_v54 = vmul.f32 %v6576_v25, %v6118_v13  ;;  %v2873_v32 = vmul.f32 %v6576_v25, %v7082_v51  ;;  %v7097_v30 = vld [vmem:[#allocation10_spill] sm:$0xff]  ;;  %v7102_v50 = vld [vmem:[#allocation15_spill] sm:$0xff] }
 0x3ee   : > { %v2896_v36 = vpack.c.bf16 %v2870_v29, %v2869_v1  ;;  %v2874_v19 = vmul.f32 %v6576_v25, %v6332_v5  ;;  %v2875_v55 = vmul.f32 %v6576_v25, %v6465_v39  ;;  %v2876_v13 = vmul.f32 %v6576_v25, %v6481_v28  ;;  %v6626_v5 = vld [vmem:[%s6956_s12 + $0x1] ss:$0 sm:$0xff]  ;;  %v7101_v29 = vld [vmem:[#allocation14_spill] sm:$0xff] }
 0x3ef   : > { %v2897_v38 = vpack.c.bf16 %v2872_v54, %v2871_v3  ;;  %v2877_v39 = vmul.f32 %v6576_v25, %v6484_v40  ;;  %v2878_v28 = vmul.f32 %v6576_v25, %v6487_v49  ;;  %v2879_v49 = vmul.f32 %v6576_v25, %v6491_v16 }
 0x3f0   : > { %v2898_v4 = vpack.c.bf16 %v2874_v19, %v2873_v32  ;;  %v2899_v9 = vpack.c.bf16 %v2876_v13, %v2875_v55  ;;  %v2880_v24 = vmul.f32 %v6576_v25, %v6495_v52  ;;  %v2881_v52 = vmul.f32 %v6576_v25, %v6499_v57 }
 0x3f1   : > { %v2900_v62 = vpack.c.bf16 %v2878_v28, %v2877_v39  ;;  %v2882_v17 = vmul.f32 %v6576_v25, %v6503_v18  ;;  %v2883_v18 = vmul.f32 %v6576_v25, %v6507_v61  ;;  %v2884_v47 = vmul.f32 %v6576_v25, %v6511_v59 }
 0x3f2   : > { %v2901_v56 = vpack.c.bf16 %v2880_v24, %v2879_v49  ;;  %v2885_v59 = vmul.f32 %v6576_v25, %v6515_v7  ;;  %v2888_v24 = vmul.f32 %v6576_v25, %v6527_v20  ;;  %v2889_v20 = vmul.f32 %v6576_v25, %v6531_v12 }
 0x3f3   : > { %v2902_v8 = vpack.c.bf16 %v2882_v17, %v2881_v52  ;;  %v2903_v13 = vpack.c.bf16 %v2884_v47, %v2883_v18  ;;  %v7112_v47 = vld [vmem:[#allocation25_spill] sm:$0xff] }
 0x3fd   : > { %2984 = vmatmul.bf16.gmra.mxu3 %v2892_v33 }
 0x40d   : > { %2989 = vmatmul.bf16.gmra.mxu3 %v2893_v53 }
 0x41d   : > { %2994 = vmatmul.bf16.gmra.mxu3 %v2894_v21 }
 0x42d   : > { %2999 = vmatmul.bf16.gmra.mxu3 %v2895_v63 }
 0x43d   : > { %3004 = vmatmul.bf16.gmra.mxu3 %v2896_v36 }
 0x44d   : > { %3009 = vmatmul.bf16.gmra.mxu3 %v2897_v38 }
 0x45d   : > { %3014 = vmatmul.bf16.gmra.mxu3 %v2898_v4 }
 0x46d   : > { %3019 = vmatmul.bf16.gmra.mxu3 %v2899_v9  ;;  %v7103_v9 = vld [vmem:[#allocation16_spill] sm:$0xff] }
 0x470   : > { %v2980_v42 = vpop.f32.mrf.mxu3 }
 0x471   : > { %v3062_v51 = vmul.f32 %v6620_v48, %v2980_v42 }
 0x473   : > { %v3096_v41 = vadd.f32 %v6626_v5, %v3062_v51  ;;  %v7104_v51 = vld [vmem:[#allocation17_spill] sm:$0xff] }
 0x475   : > { %v3128_v15 = vadd.f32 %v3096_v41, %v7097_v30  ;;  %v2886_v41 = vmul.f32 %v6576_v25, %v6519_v43  ;;  %v2887_v43 = vmul.f32 %v6576_v25, %v6523_v22 }
 0x478   : > { %v2982_v60 = vpop.f32.mrf.mxu3 }
 0x479   : > { %v3063_v58 = vmul.f32 %v6620_v48, %v2982_v60 }
 0x47b   : > { %v3097_v44 = vadd.f32 %v6626_v5, %v3063_v58 }
 0x47d   : > { %v3129_v11 = vadd.f32 %v3097_v44, %v7098_v14  ;;  %3024 = vmatmul.bf16.gmra.mxu3 %v2900_v62  ;;  %v7105_v14 = vld [vmem:[#allocation18_spill] sm:$0xff] }
 0x47f   : > { %v3160_v35 = vpack.c.bf16 %v3129_v11, %v3128_v15  ;;  %v2904_v15 = vpack.c.bf16 %v2886_v41, %v2885_v59 }
 0x480   : > { %v2985_v33 = vpop.f32.mrf.mxu3 }
 0x481   : > { %3950 = vmatmul.msk.bf16.vlgmr.msrb.gmra.mxu2 %vm1103_vm3, %v3160_v35  ;;  %v3064_v40 = vmul.f32 %v6620_v48, %v2985_v33  ;;  %v7106_v35 = vld [vmem:[#allocation19_spill] sm:$0xff] }
 0x483   : > { %v3098_v45 = vadd.f32 %v6626_v5, %v3064_v40 }
 0x485   : > { %v3130_v10 = vadd.f32 %v3098_v45, %v7099_v31  ;;  %v7107_v31 = vld [vmem:[#allocation20_spill] sm:$0xff] }
 0x488   : > { %v2987_v23 = vpop.f32.mrf.mxu3 }
 0x489   : > { %v3065_v34 = vmul.f32 %v6620_v48, %v2987_v23 }
 0x48b   : > { %v3099_v53 = vadd.f32 %v6626_v5, %v3065_v34 }
 0x48d   : > { %v3131_v21 = vadd.f32 %v3099_v53, %v7100_v27  ;;  %3029 = vmatmul.bf16.gmra.mxu3 %v2901_v56  ;;  %v2905_v56 = vpack.c.bf16 %v2888_v24, %v2887_v43  ;;  %v7108_v27 = vld [vmem:[#allocation21_spill] sm:$0xff]  ;;  %v7115_v24 = vld [vmem:[#allocation28_spill] sm:$0xff] }
 0x48f   : > { %v3161_v6 = vpack.c.bf16 %v3131_v21, %v3130_v10 }
 0x490   : > { %v2990_v26 = vpop.f32.mrf.mxu3 }
 0x491   : > { %3951 = vmatmul.msk.bf16.gmra.mxu2 %vm1103_vm3, %v3161_v6  ;;  %v3066_v16 = vmul.f32 %v6620_v48, %v2990_v26 }
 0x493   : > { %v3100_v63 = vadd.f32 %v6626_v5, %v3066_v16  ;;  %v2890_v16 = vmul.f32 %v6576_v25, %v6535_v0 }
 0x495   : > { %v3132_v36 = vadd.f32 %v3100_v63, %v7101_v29  ;;  %v7110_v29 = vld [vmem:[#allocation23_spill] sm:$0xff] }
 0x498   : > { %v2992_v46 = vpop.f32.mrf.mxu3 }
 0x499   : > { %v3067_v2 = vmul.f32 %v6620_v48, %v2992_v46 }
 0x49b   : > { %v3101_v1 = vadd.f32 %v6626_v5, %v3067_v2  ;;  %v2906_v2 = vpack.c.bf16 %v2890_v16, %v2889_v20 }
 0x49d   : > { %v3133_v3 = vadd.f32 %v3101_v1, %v7102_v50  ;;  %3034 = vmatmul.bf16.gmra.mxu3 %v2902_v8  ;;  %v7109_v1 = vld [vmem:[#allocation22_spill] sm:$0xff] }
 0x49f   : > { %v3162_v54 = vpack.c.bf16 %v3133_v3, %v3132_v36 }
 0x4a0   : > { %v2995_v38 = vpop.f32.mrf.mxu3 }
 0x4a1   : > { %3952 = vmatmul.msk.bf16.gmra.mxu2 %vm1103_vm3, %v3162_v54  ;;  %v3068_v57 = vmul.f32 %v6620_v48, %v2995_v38 }
 0x4a3   : > { %v3102_v19 = vadd.f32 %v6626_v5, %v3068_v57  ;;  %v7111_v57 = vld [vmem:[#allocation24_spill] sm:$0xff] }
 0x4a5   : > { %v3134_v42 = vadd.f32 %v3102_v19, %v7103_v9 }
 0x4a8   : > { %v2997_v32 = vpop.f32.mrf.mxu3 }
 0x4a9   : > { %v3069_v4 = vmul.f32 %v6620_v48, %v2997_v32 }
 0x4ab   : > { %v3103_v55 = vadd.f32 %v6626_v5, %v3069_v4 }
 0x4ad   : > { %v3135_v39 = vadd.f32 %v3103_v55, %v7104_v51  ;;  %3039 = vmatmul.bf16.gmra.mxu3 %v2903_v13 }
 0x4af   : > { %v3163_v28 = vpack.c.bf16 %v3135_v39, %v3134_v42  ;;  %v7113_v39 = vld [vmem:[#allocation26_spill] sm:$0xff] }
 0x4b0   : > { %v3000_v60 = vpop.f32.mrf.mxu3 }
 0x4b1   : > { %3953 = vmatmul.msk.bf16.gmra.mxu2 %vm1103_vm3, %v3163_v28  ;;  %v3070_v61 = vmul.f32 %v6620_v48, %v3000_v60  ;;  %v7114_v60 = vld [vmem:[#allocation27_spill] sm:$0xff] }
 0x4b3   : > { %v3104_v44 = vadd.f32 %v6626_v5, %v3070_v61 }
 0x4b5   : > { %v3136_v11 = vadd.f32 %v3104_v44, %v7105_v14  ;;  %v6726_v44 = vld [vmem:[%s6958_s14 + $0x1] ss:$0 sm:$0xff] }
 0x4b8   : > { %v3002_v58 = vpop.f32.mrf.mxu3 }
 0x4b9   : > { %v3071_v62 = vmul.f32 %v6620_v48, %v3002_v58  ;;  %v6721_v58 = vld [vmem:[%s6958_s14] ss:$0 sm:$0xff] }
 0x4bb   : > { %v3105_v30 = vadd.f32 %v6626_v5, %v3071_v62 }
 0x4bd   : > { %v3137_v33 = vadd.f32 %v3105_v30, %v7106_v35  ;;  %3044 = vmatmul.bf16.gmra.mxu3 %v2904_v15 }
 0x4bf   : > { %v3164_v40 = vpack.c.bf16 %v3137_v33, %v3136_v11 }
 0x4c0   : > { %v3005_v49 = vpop.f32.mrf.mxu3 }
 0x4c1   : > { %3954 = vmatmul.msk.bf16.gmra.mxu2 %vm1103_vm3, %v3164_v40  ;;  %v3072_v7 = vmul.f32 %v6620_v48, %v3005_v49 }
 0x4c3   : > { %v3106_v45 = vadd.f32 %v6626_v5, %v3072_v7 }
 0x4c5   : > { %v3138_v10 = vadd.f32 %v3106_v45, %v7107_v31  ;;  %v7116_v45 = vld [vmem:[#allocation29_spill] sm:$0xff] }
 0x4c8   : > { %v3007_v23 = vpop.f32.mrf.mxu3 }
 0x4c9   : > { %v3073_v34 = vmul.f32 %v6620_v48, %v3007_v23 }
 0x4cb   : > { %v3107_v53 = vadd.f32 %v6626_v5, %v3073_v34 }
 0x4cd   : > { %v3139_v21 = vadd.f32 %v3107_v53, %v7108_v27  ;;  %3049 = vmatmul.bf16.gmra.mxu3 %v2905_v56 }
 0x4cf   : > { %v3165_v6 = vpack.c.bf16 %v3139_v21, %v3138_v10 }
 0x4d0   : > { %v3010_v26 = vpop.f32.mrf.mxu3 }
 0x4d1   : > { %3955 = vmatmul.msk.bf16.gmra.mxu2 %vm1103_vm3, %v3165_v6  ;;  %v3074_v22 = vmul.f32 %v6620_v48, %v3010_v26 }
 0x4d3   : > { %v3108_v17 = vadd.f32 %v6626_v5, %v3074_v22 }
 0x4d5   : > { %v3140_v8 = vadd.f32 %v3108_v17, %v7109_v1 }
 0x4d8   : > { %v3012_v52 = vpop.f32.mrf.mxu3 }
 0x4d9   : > { %v3075_v46 = vmul.f32 %v6620_v48, %v3012_v52 }
 0x4db   : > { %v3109_v63 = vadd.f32 %v6626_v5, %v3075_v46 }
 0x4dd   : > { %v3141_v36 = vadd.f32 %v3109_v63, %v7110_v29  ;;  %3054 = vmatmul.bf16.gmra.mxu3 %v2906_v2 }
 0x4df   : > { %v3166_v50 = vpack.c.bf16 %v3141_v36, %v3140_v8 }
 0x4e0   : > { %v3015_v3 = vpop.f32.mrf.mxu3 }
 0x4e1   : > { %3956 = vmatmul.msk.bf16.gmra.mxu2 %vm1103_vm3, %v3166_v50  ;;  %v3076_v12 = vmul.f32 %v6620_v48, %v3015_v3  ;;  %v7117_v3 = vld [vmem:[#allocation31_spill] sm:$0xff] }
 0x4e3   : > { %v3110_v25 = vadd.f32 %v6626_v5, %v3076_v12 }
 0x4e5   : > { %v3142_v18 = vadd.f32 %v3110_v25, %v7111_v57 }
 0x4e8   : > { %v3017_v0 = vpop.f32.mrf.mxu3 }
 0x4e9   : > { %v3077_v54 = vmul.f32 %v6620_v48, %v3017_v0  ;;  %v7118_v0 = vld [vmem:[#allocation30_spill] sm:$0xff] }
 0x4eb   : > { %v3111_v38 = vadd.f32 %v6626_v5, %v3077_v54 }
 0x4ed   : > { %v3143_v32 = vadd.f32 %v3111_v38, %v7112_v47 }
 0x4ef   : > { %v3167_v19 = vpack.c.bf16 %v3143_v32, %v3142_v18  ;;  %v4044_v18 = vld [vmem:[%s6959_s15 + $0x38] sm:$0xff] }
 0x4f0   : > { %v3020_v4 = vpop.f32.mrf.mxu3  ;;  %3685 = vmatpush.bf16.msrb.mxu1 %v4044_v18  ;;  %v7122_v18 = vld [vmem:[#allocation35_spill] sm:$0xff] }
 0x4f1   : > { %3957 = vmatmul.msk.bf16.gmra.mxu2 %vm1103_vm3, %v3167_v19  ;;  %v3078_v55 = vmul.f32 %v6620_v48, %v3020_v4 }
 0x4f3   : > { %v3112_v9 = vadd.f32 %v6626_v5, %v3078_v55 }
 0x4f5   : > { %v3144_v28 = vadd.f32 %v3112_v9, %v7113_v39 }
 0x4f8   : > { %v3022_v13 = vpop.f32.mrf.mxu3 }
 0x4f9   : > { %v3079_v42 = vmul.f32 %v6620_v48, %v3022_v13 }
 0x4fb   : > { %v3113_v51 = vadd.f32 %v6626_v5, %v3079_v42 }
 0x4fd   : > { %v3145_v61 = vadd.f32 %v3113_v51, %v7114_v60 }
 0x4ff   : > { %v3168_v59 = vpack.c.bf16 %v3145_v61, %v3144_v28 }
 0x500   : > { %v3025_v41 = vpop.f32.mrf.mxu3 }
 0x501   : > { %3958 = vmatmul.msk.bf16.gmra.mxu2 %vm1103_vm3, %v3168_v59  ;;  %v3080_v30 = vmul.f32 %v6620_v48, %v3025_v41 }
 0x503   : > { %v3114_v35 = vadd.f32 %v6626_v5, %v3080_v30 }
 0x504   : > { %v3241_v62 = vpop.f32.mrf.mxu2 }
 0x505   : > { %v3323_v15 = vmul.f32 %v6721_v58, %v3241_v62  ;;  %v3146_v23 = vadd.f32 %v3114_v35, %v7115_v24 }
 0x507   : > { %v3357_v14 = vadd.f32 %v6726_v44, %v3323_v15 }
 0x508   : > { %v3027_v11 = vpop.f32.mrf.mxu3 }
 0x509   : > { %v3389_v33 = vsub.f32 0.0, %v3357_v14  ;;  %v3081_v40 = vmul.f32 %v6620_v48, %v3027_v11 }
 0x50b   : > { %v3421_v49 = vmul.f32 1.442695, %v3389_v33  ;;  %v3115_v7 = vadd.f32 %v6626_v5, %v3081_v40 }
 0x50c   : > { %v3243_v43 = vpop.f32.mrf.mxu2 }
 0x50d   : > { %v3147_v34 = vadd.f32 %v3115_v7, %v7116_v45  ;;  %v3324_v53 = vmul.f32 %v6721_v58, %v3243_v43  ;;  %4500 = vpow2.f32 %v3421_v49  ;;  %v7119_v49 = vld [vmem:[#allocation32_spill] sm:$0xff] }
 0x50f   : > { %v3358_v56 = vadd.f32 %v6726_v44, %v3324_v53  ;;  %v3169_v31 = vpack.c.bf16 %v3147_v34, %v3146_v23  ;;  %v7120_v23 = vld [vmem:[#allocation33_spill] sm:$0xff] }
 0x510   : > { %v3030_v10 = vpop.f32.mrf.mxu3 }
 0x511   : > { %v3390_v27 = vsub.f32 0.0, %v3358_v56  ;;  %3959 = vmatmul.msk.bf16.gmra.mxu2 %vm1103_vm3, %v3169_v31  ;;  %v3082_v22 = vmul.f32 %v6620_v48, %v3030_v10 }
 0x513   : > { %v3423_v21 = vmul.f32 1.442695, %v3390_v27  ;;  %v4501_v26 = vpop.eup %4500  ;;  %v3116_v46 = vadd.f32 %v6626_v5, %v3082_v22 }
 0x514   : > { %v3246_v6 = vpop.f32.mrf.mxu2  ;;  %v3485_v52 = vadd.f32 1.0, %v4501_v26 }
 0x515   : > { %4502 = vpow2.f32 %v3423_v21  ;;  %v3325_v20 = vmul.f32 %v6721_v58, %v3246_v6  ;;  %v3148_v12 = vadd.f32 %v3116_v46, %v7117_v3 }
 0x516   : > { %4504 = vrcp.f32 %v3485_v52 }
 0x517   : > { %v3359_v16 = vadd.f32 %v6726_v44, %v3325_v20 }
 0x518   : > { %v3032_v17 = vpop.f32.mrf.mxu3 }
 0x519   : > { %v3391_v63 = vsub.f32 0.0, %v3359_v16  ;;  %v3083_v2 = vmul.f32 %v6620_v48, %v3032_v17 }
 0x51b   : > { %v4503_v1 = vpop.eup %4502  ;;  %v3425_v8 = vmul.f32 1.442695, %v3391_v63  ;;  %v3117_v29 = vadd.f32 %v6626_v5, %v3083_v2 }
 0x51c   : > { %v3486_v36 = vadd.f32 1.0, %v4503_v1  ;;  %v3248_v50 = vpop.f32.mrf.mxu2  ;;  %v4505_v19 = vpop.eup %4504 }
 0x51d   : > { %4506 = vpow2.f32 %v3425_v8  ;;  %v3149_v25 = vadd.f32 %v3117_v29, %v7118_v0  ;;  %v3326_v54 = vmul.f32 %v6721_v58, %v3248_v50  ;;  %v3549_v39 = vmul.f32 %v4505_v19, %v3357_v14 }
 0x51e   : > { %4508 = vrcp.f32 %v3486_v36 }
 0x51f   : > { %v3360_v38 = vadd.f32 %v6726_v44, %v3326_v54  ;;  %v3170_v57 = vpack.c.bf16 %v3149_v25, %v3148_v12  ;;  %v7121_v25 = vld [vmem:[#allocation34_spill] sm:$0xff] }
 0x520   : > { %v3035_v47 = vpop.f32.mrf.mxu3 }
 0x521   : > { %v3392_v32 = vsub.f32 0.0, %v3360_v38  ;;  %3960 = vmatmul.msk.bf16.gmra.mxu2 %vm1103_vm3, %v3170_v57  ;;  %v3084_v42 = vmul.f32 %v6620_v48, %v3035_v47 }
 0x523   : > { %v4507_v4 = vpop.eup %4506  ;;  %v3427_v55 = vmul.f32 1.442695, %v3392_v32  ;;  %v3118_v41 = vadd.f32 %v6626_v5, %v3084_v42 }
 0x524   : > { %v4509_v13 = vpop.eup %4508  ;;  %v3487_v9 = vadd.f32 1.0, %v4507_v4  ;;  %v3251_v51 = vpop.f32.mrf.mxu2 }
 0x525   : > { %v3550_v28 = vmul.f32 %v4509_v13, %v3358_v56  ;;  %4510 = vpow2.f32 %v3427_v55  ;;  %v3327_v60 = vmul.f32 %v6721_v58, %v3251_v51  ;;  %v3150_v7 = vadd.f32 %v3118_v41, %v7119_v49  ;;  %v4043_v13 = vld [vmem:[%s6959_s15 + $0x30] sm:$0xff] }
 0x526   : > { %4512 = vrcp.f32 %v3487_v9  ;;  %3686 = vmatpush.bf16.msrb.mxu1 %v4043_v13 }
 0x527   : > { %v3581_v61 = vadd.f32 %v3550_v28, %v3549_v39  ;;  %v3361_v59 = vadd.f32 %v6726_v44, %v3327_v60 }
 0x528   : > { %v3037_v62 = vpop.f32.mrf.mxu3 }
 0x529   : > { %v3393_v30 = vsub.f32 0.0, %v3361_v59  ;;  %v3085_v15 = vmul.f32 %v6620_v48, %v3037_v62 }
 0x52b   : > { %v4511_v11 = vpop.eup %4510  ;;  %v3429_v35 = vmul.f32 1.442695, %v3393_v30  ;;  %v3119_v33 = vadd.f32 %v6626_v5, %v3085_v15 }
 0x52c   : > { %v4513_v40 = vpop.eup %4512  ;;  %v3488_v14 = vadd.f32 1.0, %v4511_v11  ;;  %v3253_v43 = vpop.f32.mrf.mxu2 }
 0x52d   : > { %v3551_v24 = vmul.f32 %v4513_v40, %v3359_v16  ;;  %4514 = vpow2.f32 %v3429_v35  ;;  %v3151_v45 = vadd.f32 %v3119_v33, %v7120_v23  ;;  %v3328_v34 = vmul.f32 %v6721_v58, %v3253_v43  ;;  %v7123_v23 = vld [vmem:[#allocation36_spill] sm:$0xff] }
 0x52e   : > { %4516 = vrcp.f32 %v3488_v14 }
 0x52f   : > { %v3582_v53 = vadd.f32 %v3581_v61, %v3551_v24  ;;  %v3171_v56 = vpack.c.bf16 %v3151_v45, %v3150_v7  ;;  %v3362_v31 = vadd.f32 %v6726_v44, %v3328_v34 }
 0x530   : > { %v3040_v10 = vpop.f32.mrf.mxu3 }
 0x531   : > { %v3394_v27 = vsub.f32 0.0, %v3362_v31  ;;  %3961 = vmatmul.msk.bf16.gmra.mxu2 %vm1103_vm3, %v3171_v56  ;;  %v3086_v20 = vmul.f32 %v6620_v48, %v3040_v10  ;;  %v7124_v56 = vld [vmem:[#allocation37_spill] sm:$0xff] }
 0x533   : > { %v4515_v21 = vpop.eup %4514  ;;  %v3431_v6 = vmul.f32 1.442695, %v3394_v27  ;;  %v3120_v2 = vadd.f32 %v6626_v5, %v3086_v20 }
 0x534   : > { %v4517_v26 = vpop.eup %4516  ;;  %v3489_v22 = vadd.f32 1.0, %v4515_v21  ;;  %v3256_v16 = vpop.f32.mrf.mxu2 }
 0x535   : > { %v3552_v52 = vmul.f32 %v4517_v26, %v3360_v38  ;;  %4518 = vpow2.f32 %v3431_v6  ;;  %v3329_v17 = vmul.f32 %v6721_v58, %v3256_v16  ;;  %v3152_v54 = vadd.f32 %v3120_v2, %v7121_v25 }
 0x536   : > { %4520 = vrcp.f32 %v3489_v22 }
 0x537   : > { %v3583_v46 = vadd.f32 %v3582_v53, %v3552_v52  ;;  %v3363_v63 = vadd.f32 %v6726_v44, %v3329_v17 }
 0x538   : > { %v3042_v1 = vpop.f32.mrf.mxu3 }
 0x539   : > { %v3395_v8 = vsub.f32 0.0, %v3363_v63  ;;  %v3087_v29 = vmul.f32 %v6620_v48, %v3042_v1 }
 0x53b   : > { %v4519_v36 = vpop.eup %4518  ;;  %v3433_v50 = vmul.f32 1.442695, %v3395_v8  ;;  %v3121_v3 = vadd.f32 %v6626_v5, %v3087_v29 }
 0x53c   : > { %v4521_v12 = vpop.eup %4520  ;;  %v3490_v0 = vadd.f32 1.0, %v4519_v36  ;;  %v3258_v38 = vpop.f32.mrf.mxu2 }
 0x53d   : > { %v3553_v57 = vmul.f32 %v4521_v12, %v3361_v59  ;;  %4522 = vpow2.f32 %v3433_v50  ;;  %v3153_v47 = vadd.f32 %v3121_v3, %v7122_v18  ;;  %v3330_v32 = vmul.f32 %v6721_v58, %v3258_v38  ;;  %v7125_v18 = vld [vmem:[#allocation39_spill] sm:$0xff] }
 0x53e   : > { %4524 = vrcp.f32 %v3490_v0 }
 0x53f   : > { %v3584_v19 = vadd.f32 %v3583_v46, %v3553_v57  ;;  %v3172_v4 = vpack.c.bf16 %v3153_v47, %v3152_v54  ;;  %v3364_v55 = vadd.f32 %v6726_v44, %v3330_v32 }
 0x540   : > { %v3045_v9 = vpop.f32.mrf.mxu3 }
 0x541   : > { %v3396_v42 = vsub.f32 0.0, %v3364_v55  ;;  %3962 = vmatmul.msk.bf16.gmra.mxu2 %vm1103_vm3, %v3172_v4  ;;  %v3088_v61 = vmul.f32 %v6620_v48, %v3045_v9  ;;  %v7126_v4 = vld [vmem:[#allocation38_spill] sm:$0xff] }
 0x543   : > { %v4523_v51 = vpop.eup %4522  ;;  %v3435_v39 = vmul.f32 1.442695, %v3396_v42  ;;  %v3122_v11 = vadd.f32 %v6626_v5, %v3088_v61 }
 0x544   : > { %v4525_v28 = vpop.eup %4524  ;;  %v3491_v60 = vadd.f32 1.0, %v4523_v51  ;;  %v3261_v59 = vpop.f32.mrf.mxu2 }
 0x545   : > { %v3554_v41 = vmul.f32 %v4525_v28, %v3362_v31  ;;  %4526 = vpow2.f32 %v3435_v39  ;;  %v3331_v62 = vmul.f32 %v6721_v58, %v3261_v59  ;;  %v3154_v45 = vadd.f32 %v3122_v11, %v7123_v23  ;;  %v4042_v39 = vld [vmem:[%s6959_s15 + $0x28] sm:$0xff] }
 0x546   : > { %4528 = vrcp.f32 %v3491_v60  ;;  %3687 = vmatpush.bf16.msrb.mxu1 %v4042_v39 }
 0x547   : > { %v3585_v30 = vadd.f32 %v3584_v19, %v3554_v41  ;;  %v3365_v15 = vadd.f32 %v6726_v44, %v3331_v62 }
 0x548   : > { %v3047_v35 = vpop.f32.mrf.mxu3 }
 0x549   : > { %v3397_v33 = vsub.f32 0.0, %v3365_v15  ;;  %v3089_v40 = vmul.f32 %v6620_v48, %v3047_v35 }
 0x54b   : > { %v4527_v14 = vpop.eup %4526  ;;  %v3437_v49 = vmul.f32 1.442695, %v3397_v33  ;;  %v3123_v7 = vadd.f32 %v6626_v5, %v3089_v40 }
 0x54c   : > { %v4529_v43 = vpop.eup %4528  ;;  %v3492_v24 = vadd.f32 1.0, %v4527_v14  ;;  %v3263_v34 = vpop.f32.mrf.mxu2 }
 0x54d   : > { %v3555_v53 = vmul.f32 %v4529_v43, %v3363_v63  ;;  %4530 = vpow2.f32 %v3437_v49  ;;  %v3155_v31 = vadd.f32 %v3123_v7, %v7124_v56  ;;  %v3332_v10 = vmul.f32 %v6721_v58, %v3263_v34  ;;  %v7127_v56 = vld [vmem:[#allocation40_spill] sm:$0xff] }
 0x54e   : > { %4532 = vrcp.f32 %v3492_v24 }
 0x54f   : > { %v3586_v27 = vadd.f32 %v3585_v30, %v3555_v53  ;;  %v3173_v21 = vpack.c.bf16 %v3155_v31, %v3154_v45  ;;  %v3366_v6 = vadd.f32 %v6726_v44, %v3332_v10 }
 0x550   : > { %v3050_v26 = vpop.f32.mrf.mxu3 }
 0x551   : > { %v3398_v22 = vsub.f32 0.0, %v3366_v6  ;;  %3963 = vmatmul.msk.bf16.gmra.mxu2 %vm1103_vm3, %v3173_v21  ;;  %v3090_v46 = vmul.f32 %v6620_v48, %v3050_v26  ;;  %v7128_v21 = vld [vmem:[#allocation41_spill] sm:$0xff] }
 0x553   : > { %v4531_v20 = vpop.eup %4530  ;;  %v3439_v16 = vmul.f32 1.442695, %v3398_v22  ;;  %v3124_v36 = vadd.f32 %v6626_v5, %v3090_v46 }
 0x554   : > { %v4533_v52 = vpop.eup %4532  ;;  %v3493_v17 = vadd.f32 1.0, %v4531_v20  ;;  %v3266_v63 = vpop.f32.mrf.mxu2 }
 0x555   : > { %v3556_v2 = vmul.f32 %v4533_v52, %v3364_v55  ;;  %4534 = vpow2.f32 %v3439_v16  ;;  %v3333_v1 = vmul.f32 %v6721_v58, %v3266_v63  ;;  %v3156_v47 = vadd.f32 %v3124_v36, %v7125_v18 }
 0x556   : > { %4536 = vrcp.f32 %v3493_v17 }
 0x557   : > { %v3587_v8 = vadd.f32 %v3586_v27, %v3556_v2  ;;  %v3367_v29 = vadd.f32 %v6726_v44, %v3333_v1 }
 0x558   : > { %v3052_v50 = vpop.f32.mrf.mxu3 }
 0x559   : > { %v3399_v3 = vsub.f32 0.0, %v3367_v29  ;;  %v3091_v12 = vmul.f32 %v6620_v48, %v3052_v50 }
 0x55b   : > { %v4535_v0 = vpop.eup %4534  ;;  %v3441_v25 = vmul.f32 1.442695, %v3399_v3  ;;  %v3125_v54 = vadd.f32 %v6626_v5, %v3091_v12 }
 0x55c   : > { %v4537_v38 = vpop.eup %4536  ;;  %v3494_v57 = vadd.f32 1.0, %v4535_v0  ;;  %v3268_v32 = vpop.f32.mrf.mxu2 }
 0x55d   : > { %v3557_v19 = vmul.f32 %v4537_v38, %v3365_v15  ;;  %4538 = vpow2.f32 %v3441_v25  ;;  %v3157_v55 = vadd.f32 %v3125_v54, %v7126_v4  ;;  %v3334_v13 = vmul.f32 %v6721_v58, %v3268_v32 }
 0x55e   : > { %4540 = vrcp.f32 %v3494_v57 }
 0x55f   : > { %v3588_v9 = vadd.f32 %v3587_v8, %v3557_v19  ;;  %v3174_v42 = vpack.c.bf16 %v3157_v55, %v3156_v47  ;;  %v3368_v51 = vadd.f32 %v6726_v44, %v3334_v13  ;;  %v4041_v47 = vld [vmem:[%s6959_s15 + $0x20] sm:$0xff] }
 0x560   : > { %v3055_v28 = vpop.f32.mrf.mxu3  ;;  %3688 = vmatpush.bf16.msrb.mxu1 %v4041_v47 }
 0x561   : > { %v3400_v60 = vsub.f32 0.0, %v3368_v51  ;;  %3964 = vmatmul.msk.bf16.gmra.mxu2 %vm1103_vm3, %v3174_v42  ;;  %v3092_v30 = vmul.f32 %v6620_v48, %v3055_v28 }
 0x563   : > { %v4539_v61 = vpop.eup %4538  ;;  %v3443_v59 = vmul.f32 1.442695, %v3400_v60  ;;  %v3126_v14 = vadd.f32 %v6626_v5, %v3092_v30 }
 0x564   : > { %v4541_v41 = vpop.eup %4540  ;;  %v3495_v62 = vadd.f32 1.0, %v4539_v61  ;;  %v3271_v15 = vpop.f32.mrf.mxu2 }
 0x565   : > { %v3558_v11 = vmul.f32 %v4541_v41, %v3366_v6  ;;  %4542 = vpow2.f32 %v3443_v59  ;;  %v3335_v35 = vmul.f32 %v6721_v58, %v3271_v15  ;;  %v3158_v31 = vadd.f32 %v3126_v14, %v7127_v56 }
 0x566   : > { %4544 = vrcp.f32 %v3495_v62 }
 0x567   : > { %v3589_v33 = vadd.f32 %v3588_v9, %v3558_v11  ;;  %v3369_v40 = vadd.f32 %v6726_v44, %v3335_v35 }
 0x568   : > { %v3057_v49 = vpop.f32.mrf.mxu3 }
 0x569   : > { %v3401_v7 = vsub.f32 0.0, %v3369_v40  ;;  %v3093_v43 = vmul.f32 %v6620_v48, %v3057_v49 }
 0x56b   : > { %v4543_v24 = vpop.eup %4542  ;;  %v3445_v23 = vmul.f32 1.442695, %v3401_v7  ;;  %v3127_v45 = vadd.f32 %v6626_v5, %v3093_v43 }
 0x56c   : > { %v4545_v34 = vpop.eup %4544  ;;  %v3496_v53 = vadd.f32 1.0, %v4543_v24  ;;  %v3273_v10 = vpop.f32.mrf.mxu2 }
 0x56d   : > { %v3559_v27 = vmul.f32 %v4545_v34, %v3367_v29  ;;  %4546 = vpow2.f32 %v3445_v23  ;;  %v3159_v6 = vadd.f32 %v3127_v45, %v7128_v21  ;;  %v3336_v26 = vmul.f32 %v6721_v58, %v3273_v10 }
 0x56e   : > { %4548 = vrcp.f32 %v3496_v53 }
 0x56f   : > { %v3590_v22 = vadd.f32 %v3589_v33, %v3559_v27  ;;  %v3175_v20 = vpack.c.bf16 %v3159_v6, %v3158_v31  ;;  %v3370_v48 = vadd.f32 %v6726_v44, %v3336_v26 }
 0x571   : > { %v3402_v16 = vsub.f32 0.0, %v3370_v48  ;;  %3965 = vmatmul.msk.bf16.gmra.mxu2 %vm1103_vm3, %v3175_v20 }
 0x573   : > { %v4547_v5 = vpop.eup %4546  ;;  %v3447_v52 = vmul.f32 1.442695, %v3402_v16  ;;  %v4040_v16 = vld [vmem:[%s6959_s15 + $0x18] sm:$0xff] }
 0x574   : > { %v4549_v17 = vpop.eup %4548  ;;  %v3497_v46 = vadd.f32 1.0, %v4547_v5  ;;  %v3276_v63 = vpop.f32.mrf.mxu2  ;;  %3689 = vmatpush.bf16.msrb.mxu1 %v4040_v16 }
 0x575   : > { %v3560_v2 = vmul.f32 %v4549_v17, %v3368_v51  ;;  %4550 = vpow2.f32 %v3447_v52  ;;  %v3337_v1 = vmul.f32 %v6721_v58, %v3276_v63 }
 0x576   : > { %4552 = vrcp.f32 %v3497_v46 }
 0x577   : > { %v3591_v8 = vadd.f32 %v3590_v22, %v3560_v2  ;;  %v3371_v29 = vadd.f32 %v6726_v44, %v3337_v1 }
 0x579   : > { %v3403_v36 = vsub.f32 0.0, %v3371_v29 }
 0x57b   : > { %v4551_v50 = vpop.eup %4550  ;;  %v3449_v3 = vmul.f32 1.442695, %v3403_v36 }
 0x57c   : > { %v4553_v12 = vpop.eup %4552  ;;  %v3498_v0 = vadd.f32 1.0, %v4551_v50  ;;  %v3278_v25 = vpop.f32.mrf.mxu2 }
 0x57d   : > { %v3561_v54 = vmul.f32 %v4553_v12, %v3369_v40  ;;  %4554 = vpow2.f32 %v3449_v3  ;;  %v3338_v38 = vmul.f32 %v6721_v58, %v3278_v25 }
 0x57e   : > { %4556 = vrcp.f32 %v3498_v0 }
 0x57f   : > { %v3592_v57 = vadd.f32 %v3591_v8, %v3561_v54  ;;  %v3372_v18 = vadd.f32 %v6726_v44, %v3338_v38 }
 0x581   : > { %v3404_v32 = vsub.f32 0.0, %v3372_v18 }
 0x583   : > { %v4555_v19 = vpop.eup %4554  ;;  %v3451_v4 = vmul.f32 1.442695, %v3404_v32 }
 0x584   : > { %v4557_v55 = vpop.eup %4556  ;;  %v3499_v13 = vadd.f32 1.0, %v4555_v19  ;;  %v3281_v9 = vpop.f32.mrf.mxu2 }
 0x585   : > { %v3562_v42 = vmul.f32 %v4557_v55, %v3370_v48  ;;  %4558 = vpow2.f32 %v3451_v4  ;;  %v3339_v51 = vmul.f32 %v6721_v58, %v3281_v9 }
 0x586   : > { %4560 = vrcp.f32 %v3499_v13 }
 0x587   : > { %v3593_v39 = vadd.f32 %v3592_v57, %v3562_v42  ;;  %v3373_v28 = vadd.f32 %v6726_v44, %v3339_v51 }
 0x589   : > { %v3405_v60 = vsub.f32 0.0, %v3373_v28 }
 0x58b   : > { %v4559_v61 = vpop.eup %4558  ;;  %v3453_v59 = vmul.f32 1.442695, %v3405_v60 }
 0x58c   : > { %v4561_v41 = vpop.eup %4560  ;;  %v3500_v62 = vadd.f32 1.0, %v4559_v61  ;;  %v3283_v30 = vpop.f32.mrf.mxu2 }
 0x58d   : > { %v3563_v15 = vmul.f32 %v4561_v41, %v3371_v29  ;;  %4562 = vpow2.f32 %v3453_v59  ;;  %v3340_v11 = vmul.f32 %v6721_v58, %v3283_v30 }
 0x58e   : > { %4564 = vrcp.f32 %v3500_v62 }
 0x58f   : > { %v3594_v35 = vadd.f32 %v3593_v39, %v3563_v15  ;;  %v3374_v33 = vadd.f32 %v6726_v44, %v3340_v11  ;;  %v4039_v39 = vld [vmem:[%s6959_s15 + $0x10] sm:$0xff] }
 0x590   : > { %3690 = vmatpush.bf16.msrb.mxu1 %v4039_v39 }
 0x591   : > { %v3406_v40 = vsub.f32 0.0, %v3374_v33 }
 0x593   : > { %v4563_v14 = vpop.eup %4562  ;;  %v3455_v49 = vmul.f32 1.442695, %v3406_v40 }
 0x594   : > { %v4565_v7 = vpop.eup %4564  ;;  %v3501_v43 = vadd.f32 1.0, %v4563_v14  ;;  %v3286_v24 = vpop.f32.mrf.mxu2 }
 0x595   : > { %v3564_v23 = vmul.f32 %v4565_v7, %v3372_v18  ;;  %4566 = vpow2.f32 %v3455_v49  ;;  %v3341_v45 = vmul.f32 %v6721_v58, %v3286_v24 }
 0x596   : > { %4568 = vrcp.f32 %v3501_v43 }
 0x597   : > { %v3595_v34 = vadd.f32 %v3594_v35, %v3564_v23  ;;  %v3375_v53 = vadd.f32 %v6726_v44, %v3341_v45 }
 0x599   : > { %v3407_v56 = vsub.f32 0.0, %v3375_v53 }
 0x59b   : > { %v4567_v31 = vpop.eup %4566  ;;  %v3457_v10 = vmul.f32 1.442695, %v3407_v56 }
 0x59c   : > { %v4569_v27 = vpop.eup %4568  ;;  %v3502_v21 = vadd.f32 1.0, %v4567_v31  ;;  %v3288_v6 = vpop.f32.mrf.mxu2 }
 0x59d   : > { %v3565_v26 = vmul.f32 %v4569_v27, %v3373_v28  ;;  %4570 = vpow2.f32 %v3457_v10  ;;  %v3342_v22 = vmul.f32 %v6721_v58, %v3288_v6 }
 0x59e   : > { %4572 = vrcp.f32 %v3502_v21 }
 0x59f   : > { %v3596_v20 = vadd.f32 %v3595_v34, %v3565_v26  ;;  %v3376_v48 = vadd.f32 %v6726_v44, %v3342_v22 }
 0x5a1   : > { %v3408_v5 = vsub.f32 0.0, %v3376_v48 }
 0x5a3   : > { %v4571_v52 = vpop.eup %4570  ;;  %v3459_v17 = vmul.f32 1.442695, %v3408_v5 }
 0x5a4   : > { %v4573_v46 = vpop.eup %4572  ;;  %v3503_v63 = vadd.f32 1.0, %v4571_v52  ;;  %v3291_v2 = vpop.f32.mrf.mxu2 }
 0x5a5   : > { %v3566_v1 = vmul.f32 %v4573_v46, %v3374_v33  ;;  %4574 = vpow2.f32 %v3459_v17  ;;  %v3343_v8 = vmul.f32 %v6721_v58, %v3291_v2  ;;  %v4038_v33 = vld [vmem:[%s6959_s15 + $0x8] sm:$0xff] }
 0x5a6   : > { %4576 = vrcp.f32 %v3503_v63  ;;  %3691 = vmatpush.bf16.msrb.mxu1 %v4038_v33 }
 0x5a7   : > { %v3597_v29 = vadd.f32 %v3596_v20, %v3566_v1  ;;  %v3377_v36 = vadd.f32 %v6726_v44, %v3343_v8 }
 0x5a9   : > { %v3409_v50 = vsub.f32 0.0, %v3377_v36 }
 0x5ab   : > { %v4575_v3 = vpop.eup %4574  ;;  %v3461_v12 = vmul.f32 1.442695, %v3409_v50 }
 0x5ac   : > { %v4577_v0 = vpop.eup %4576  ;;  %v3504_v25 = vadd.f32 1.0, %v4575_v3  ;;  %v3293_v54 = vpop.f32.mrf.mxu2 }
 0x5ad   : > { %v3567_v38 = vmul.f32 %v4577_v0, %v3375_v53  ;;  %4578 = vpow2.f32 %v3461_v12  ;;  %v3344_v59 = vmul.f32 %v6721_v58, %v3293_v54 }
 0x5ae   : > { %4580 = vrcp.f32 %v3504_v25 }
 0x5af   : > { %v3598_v57 = vadd.f32 %v3597_v29, %v3567_v38  ;;  %v6842_v30 = vadd.f32 %v6726_v44, %v3344_v59 }
 0x5b1   : > { %v3410_v40 = vsub.f32 0.0, %v6842_v30 }
 0x5b3   : > { %v4579_v18 = vpop.eup %4578  ;;  %v3463_v45 = vmul.f32 1.442695, %v3410_v40 }
 0x5b4   : > { %v4581_v47 = vpop.eup %4580  ;;  %v3505_v32 = vadd.f32 1.0, %v4579_v18  ;;  %v3296_v19 = vpop.f32.mrf.mxu2 }
 0x5b5   : > { %v3568_v4 = vmul.f32 %v4581_v47, %v3376_v48  ;;  %v3345_v41 = vmul.f32 %v6721_v58, %v3296_v19 }
 0x5b6   : > { %4582 = vrcp.f32 %v3505_v32 }
 0x5b7   : > { %v3599_v55 = vadd.f32 %v3598_v57, %v3568_v4  ;;  %v6846_v11 = vadd.f32 %v6726_v44, %v3345_v41  ;;  %4584 = vpow2.f32 %v3463_v45 }
 0x5b9   : > { %v3411_v7 = vsub.f32 0.0, %v6846_v11 }
 0x5bb   : > { %v3465_v31 = vmul.f32 1.442695, %v3411_v7 }
 0x5bc   : > { %v4583_v13 = vpop.eup %4582  ;;  %v3298_v9 = vpop.f32.mrf.mxu2 }
 0x5bd   : > { %v3569_v42 = vmul.f32 %v4583_v13, %v3377_v36  ;;  %v3346_v15 = vmul.f32 %v6721_v58, %v3298_v9  ;;  %4586 = vpow2.f32 %v3465_v31  ;;  %v4585_v63 = vpop.eup %4584 }
 0x5be   : > { %v3506_v3 = vadd.f32 1.0, %v4585_v63 }
 0x5bf   : > { %v6834_v51 = vadd.f32 %v3599_v55, %v3569_v42  ;;  %v6854_v14 = vadd.f32 %v6726_v44, %v3346_v15 }
 0x5c1   : > { %v3412_v34 = vsub.f32 0.0, %v6854_v14 }
 0x5c3   : > { %v3467_v6 = vmul.f32 1.442695, %v3412_v34  ;;  %v4587_v29 = vpop.eup %4586 }
 0x5c4   : > { %v3301_v28 = vpop.f32.mrf.mxu2  ;;  %v3507_v25 = vadd.f32 1.0, %v4587_v29 }
 0x5c5   : > { %v3347_v35 = vmul.f32 %v6721_v58, %v3301_v28  ;;  %4588 = vpow2.f32 %v3467_v6 }
 0x5c7   : > { %v6859_v43 = vadd.f32 %v6726_v44, %v3347_v35 }
 0x5c9   : > { %v3413_v10 = vsub.f32 0.0, %v6859_v43 }
 0x5cb   : > { %v3469_v20 = vmul.f32 1.442695, %v3413_v10  ;;  %v4589_v12 = vpop.eup %4588 }
 0x5cc   : > { %v3303_v60 = vpop.f32.mrf.mxu2  ;;  %v3508_v47 = vadd.f32 1.0, %v4589_v12 }
 0x5cd   : > { %v3348_v49 = vmul.f32 %v6721_v58, %v3303_v60  ;;  %4590 = vpow2.f32 %v3469_v20 }
 0x5cf   : > { %v6864_v53 = vadd.f32 %v6726_v44, %v3348_v49  ;;  %v4037_v49 = vld [vmem:[%s6959_s15] sm:$0xff] }
 0x5d0   : > { %3692 = vmatpush.bf16.msrb.mxu1 %v4037_v49 }
 0x5d1   : > { %v3414_v26 = vsub.f32 0.0, %v6864_v53 }
 0x5d3   : > { %v3471_v52 = vmul.f32 1.442695, %v3414_v26  ;;  %v4591_v38 = vpop.eup %4590 }
 0x5d4   : > { %v3306_v61 = vpop.f32.mrf.mxu2  ;;  %v3509_v4 = vadd.f32 1.0, %v4591_v38 }
 0x5d5   : > { %v3349_v24 = vmul.f32 %v6721_v58, %v3306_v61  ;;  %4592 = vpow2.f32 %v3471_v52 }
 0x5d7   : > { %v6869_v27 = vadd.f32 %v6726_v44, %v3349_v24 }
 0x5d9   : > { %v3415_v48 = vsub.f32 0.0, %v6869_v27 }
 0x5db   : > { %v3473_v2 = vmul.f32 1.442695, %v3415_v48  ;;  %v4593_v32 = vpop.eup %4592 }
 0x5dc   : > { %v3308_v62 = vpop.f32.mrf.mxu2  ;;  %v3510_v9 = vadd.f32 1.0, %v4593_v32 }
 0x5dd   : > { %v3350_v56 = vmul.f32 %v6721_v58, %v3308_v62  ;;  %4594 = vpow2.f32 %v3473_v2 }
 0x5df   : > { %v6874_v22 = vadd.f32 %v6726_v44, %v3350_v56 }
 0x5e1   : > { %v3416_v17 = vsub.f32 0.0, %v6874_v22 }
 0x5e3   : > { %v3475_v36 = vmul.f32 1.442695, %v3416_v17  ;;  %v4595_v55 = vpop.eup %4594 }
 0x5e4   : > { %v3311_v23 = vpop.f32.mrf.mxu2  ;;  %v3511_v60 = vadd.f32 1.0, %v4595_v55 }
 0x5e5   : > { %v3351_v21 = vmul.f32 %v6721_v58, %v3311_v23  ;;  %4596 = vpow2.f32 %v3475_v36 }
 0x5e6   : > { %4598 = vrcp.f32 %v3506_v3 }
 0x5e7   : > { %v6878_v16 = vadd.f32 %v6726_v44, %v3351_v21 }
 0x5e9   : > { %v3417_v1 = vsub.f32 0.0, %v6878_v16 }
 0x5eb   : > { %v3477_v0 = vmul.f32 1.442695, %v3417_v1  ;;  %v4597_v42 = vpop.eup %4596 }
 0x5ec   : > { %v3313_v5 = vpop.f32.mrf.mxu2  ;;  %v4599_v28 = vpop.eup %4598  ;;  %v3512_v15 = vadd.f32 1.0, %v4597_v42 }
 0x5ed   : > { %v3352_v46 = vmul.f32 %v6721_v58, %v3313_v5  ;;  %4600 = vpow2.f32 %v3477_v0  ;;  %v3570_v33 = vmul.f32 %v4599_v28, %v6842_v30 }
 0x5ee   : > { %4602 = vrcp.f32 %v3507_v25 }
 0x5ef   : > { %v6884_v8 = vadd.f32 %v6726_v44, %v3352_v46  ;;  %v3601_v31 = vadd.f32 %v6834_v51, %v3570_v33 }
 0x5f1   : > { %v3418_v50 = vsub.f32 0.0, %v6884_v8 }
 0x5f3   : > { %v3479_v57 = vmul.f32 1.442695, %v3418_v50  ;;  %v4601_v59 = vpop.eup %4600 }
 0x5f4   : > { %v3316_v54 = vpop.f32.mrf.mxu2  ;;  %v4603_v62 = vpop.eup %4602  ;;  %v3513_v24 = vadd.f32 1.0, %v4601_v59 }
 0x5f5   : > { %v3353_v18 = vmul.f32 %v6721_v58, %v3316_v54  ;;  %4604 = vpow2.f32 %v3479_v57  ;;  %v3571_v23 = vmul.f32 %v4603_v62, %v6846_v11 }
 0x5f6   : > { %4606 = vrcp.f32 %v3508_v47 }
 0x5f7   : > { %v6889_v19 = vadd.f32 %v6726_v44, %v3353_v18  ;;  %4608 = vrcp.f32 %v3509_v4  ;;  %v3602_v6 = vadd.f32 %v3601_v31, %v3571_v23 }
 0x5f9   : > { %v3419_v13 = vsub.f32 0.0, %v6889_v19 }
 0x5fb   : > { %v3481_v39 = vmul.f32 1.442695, %v3419_v13  ;;  %v4605_v35 = vpop.eup %4604 }
 0x5fc   : > { %v3318_v61 = vpop.f32.mrf.mxu2  ;;  %v4607_v7 = vpop.eup %4606  ;;  %v3514_v34 = vadd.f32 1.0, %v4605_v35 }
 0x5fd   : > { %4610 = vpow2.f32 %v3481_v39  ;;  %v3354_v41 = vmul.f32 %v6721_v58, %v3318_v61  ;;  %v4609_v58 = vpop.eup %4608  ;;  %v3572_v30 = vmul.f32 %v4607_v7, %v6854_v14 }
 0x5fe   : > { %4612 = vrcp.f32 %v3510_v9  ;;  %v3573_v26 = vmul.f32 %v4609_v58, %v6859_v43 }
 0x5ff   : > { %v3388_v40 = vadd.f32 %v6726_v44, %v3354_v41  ;;  %4614 = vrcp.f32 %v3511_v60  ;;  %v3603_v11 = vadd.f32 %v3602_v6, %v3572_v30 }
 0x600   : > { %4616 = vrcp.f32 %v3512_v15 }
 0x601   : > { %v3420_v45 = vsub.f32 0.0, %v3388_v40  ;;  %4618 = vrcp.f32 %v3513_v24  ;;  %v3604_v52 = vadd.f32 %v3603_v11, %v3573_v26 }
 0x603   : > { %v4611_v56 = vpop.eup %4610  ;;  %v3483_v44 = vmul.f32 1.442695, %v3420_v45 }
 0x604   : > { %v4613_v10 = vpop.eup %4612  ;;  %v3515_v21 = vadd.f32 1.0, %v4611_v56 }
 0x605   : > { %4620 = vpow2.f32 %v3483_v44  ;;  %v4615_v20 = vpop.eup %4614  ;;  %v3574_v48 = vmul.f32 %v4613_v10, %v6864_v53 }
 0x606   : > { %4622 = vrcp.f32 %v3514_v34  ;;  %v4617_v5 = vpop.eup %4616  ;;  %v3575_v51 = vmul.f32 %v4615_v20, %v6869_v27 }
 0x607   : > { %4624 = vrcp.f32 %v3515_v21  ;;  %v4619_v17 = vpop.eup %4618  ;;  %v3605_v46 = vadd.f32 %v3604_v52, %v3574_v48  ;;  %v3576_v63 = vmul.f32 %v4617_v5, %v6874_v22 }
 0x608   : > { %v3577_v43 = vmul.f32 %v4619_v17, %v6878_v16 }
 0x609   : > { %v3606_v29 = vadd.f32 %v3605_v46, %v3575_v51 }
 0x60b   : > { %v4621_v14 = vpop.eup %4620  ;;  %v3607_v50 = vadd.f32 %v3606_v29, %v3576_v63 }
 0x60c   : > { %v4623_v2 = vpop.eup %4622  ;;  %v3516_v1 = vadd.f32 1.0, %v4621_v14 }
 0x60d   : > { %v4625_v36 = vpop.eup %4624  ;;  %v3578_v53 = vmul.f32 %v4623_v2, %v6884_v8  ;;  %v3608_v3 = vadd.f32 %v3607_v50, %v3577_v43  ;;  %v3636_v8 = vld [vmem:[%s6960_s16] sm:$0x1] }
 0x60e   : > { %4626 = vrcp.f32 %v3516_v1  ;;  %v3579_v12 = vmul.f32 %v4625_v36, %v6889_v19 }
 0x60f   : > { %v3609_v27 = vadd.f32 %v3608_v3, %v3578_v53 }
 0x611   : > { %v3610_v25 = vadd.f32 %v3609_v27, %v3579_v12 }
 0x614   : > { %v4627_v0 = vpop.eup %4626 }
 0x615   : > { %v3580_v54 = vmul.f32 %v4627_v0, %v3388_v40 }
 0x617   : > { %v3611_v22 = vadd.f32 %v3610_v25, %v3580_v54 }
 0x619   : > { %v3612_v38 = vrot.slane %v3611_v22, 4 }
 0x61b   : > { %v3613_v57 = vadd.f32 %v3612_v38, %v3611_v22 }
 0x61d   : > { %v3614_v18 = vrot.slane %v3613_v57, 2 }
 0x61f   : > { %v3615_v47 = vadd.f32 %v3614_v18, %v3613_v57 }
 0x621   : > { %v3616_v16 = vrot.slane %v3615_v47, 1 }
 0x623   : > { %v3617_v32 = vadd.f32 %v3616_v16, %v3615_v47 }
 0x625   : > { %v3618_v4 = vmul.f32 %v3617_v32, %v6540_v37 }
 0x627   : > { %v3619_v55 = vpack.c.bf16 %v3618_v4, %v3618_v4 }
 0x629   : > { %3693 = vmatmul.bf16.vlgmr.msrb.gmra.mxu1 %v3619_v55 }
 0x6a6   : > { %v3694_v19 = vpop.f32.mrf.mxu1 }
 0x6a7   : > { %v3695_v13 = vadd.f32 %v3694_v19, %v3636_v8 }
 0x6a9   : > { %3698 = vst [vmem:[%s540_s18] sm:$0x1] %v3695_v13 }
 0x6aa   : > { %4684 = shalt.err (!%p4681_p3)
}
 0x6ab   : > { %4045 = dma.vmem_to_hbm [thread:$0]  (%p4852_p5), %s3711_s21, 16, %s3713_s22, %s3700_s2  }
 0x6ae   : > { %v3696_v37 = vpop.f32.mrf.mxu1 }
 0x6af PF: > { %p4051_p4 = scmp.ge.s32.totalorder %s4719_s27, 2  ;;  %s3724_s19 = sand.u32 1, %s4707_s24  }
 0x6b0   : > { %s3725_s18 = scalar_lea.sflag [#allocation4], %s3724_s19 }
 0x6b1   : > { %p4048_p7 = pnand %p4051_p4, %p4856_p6 }
 0x6b3   : > { %p4049_p8 = pneg %p4048_p7 }
 0x6b5   : > { %4702 = dma.done.wait (%p4049_p8), %s3725_s18, 16  }
 0x6b6   : > { %4704 = vsyncadd (%p4049_p8), %s3725_s18, 4294967280  ;;  %s7130_s27 = sld [smem:[#allocation7_spill]]  ;;  %s7133_s24 = smov %s4711_s25 }
 0x6b7   : > { %s7131_s3 = sld [smem:[#allocation6_spill]] }
 0x6b8   : > { %s7132_s26 = sld [smem:[#allocation8_spill]] }
 0x6bc   : > { %p27_p9 = scmp.ge.s32.totalorder %s7130_s27, 4  }
 0x6bd   : > { %s7134_s25 = smov %s7131_s3 }
 0x6be   :  { %29 = sbr.rel (!%p27_p9) target bundleno = 9 (0x9), region = 125 }
 0x6c3   :  { %3730 = vsyncpa [#allocation4], 1 }
 0x6c4   :  { %3732 = vsyncpa [#allocation4 + $0x1], 1 }

</bundles_post_ra>
